<compile_context>
chip_gen: v5e
topology: v5e:2x2
jax: 0.10.0
libtpu: 0.0.40
codegen_flags: <defaults>
</compile_context>

<pallas_src>
from functools import partial

import jax
import jax.numpy as jnp
from jax import lax
from jax.experimental import pallas as pl
from jax.experimental.pallas import tpu as pltpu


def _sigmoid(x):
    # exp goes to the EUP; approx reciprocal also uses the EUP slot (no f32 divide).
    return pl.reciprocal(1.0 + jnp.exp(-x), approx=True)


def bilstm_fc_kernel(x_ref, wih_ref, whh_f_ref, whh_b_ref, b_ref,
                     fcw_ref, fcb_ref, out_ref,
                     gx_sc, hs_sc, *, seq_len, batch):
    """Shapes (all padded):
      x_ref:      (T*Bp, E)
      wih_ref:    (E, 8*Hp)       both directions' input projections, gates 128-aligned
      whh_*_ref:  (Hp, 4*Hp)      b_ref: (1, 8*Hp)   (bih + bhh folded, both directions)
      fcw_ref:    (2*Hp, Op)      fcb_ref: (1, Op)
      out_ref:    (T*Bp, Op)
      gx_sc:      (T*Bp, 8*Hp)    hoisted input projections (fwd lanes 0:4Hp, bwd 4Hp:8Hp)
      hs_sc:      (T*Bp, 2*Hp)    packed per-step hidden states (fwd 0:Hp, bwd Hp:2Hp)
    Gate order is PyTorch's (i, f, g, o); each gate occupies a 128-aligned lane block.
    """
    Hp = whh_f_ref.shape[0]
    G = 4 * Hp

    # ---- hoisted non-recurrent input projection: ONE MXU dot for both directions ----
    gx_sc[...] = (jnp.dot(x_ref[...], wih_ref[...],
                          preferred_element_type=jnp.float32) + b_ref[...])

    whh_f = whh_f_ref[...]                                              # hoisted loads
    whh_b = whh_b_ref[...]

    def cell(gx, h, c, whh):
        gates = gx + jnp.dot(h, whh, preferred_element_type=jnp.float32)  # (Bp, 4Hp)
        i = _sigmoid(gates[:, 0 * Hp:1 * Hp])      # 128-lane aligned slices
        f = _sigmoid(gates[:, 1 * Hp:2 * Hp])
        g = jnp.tanh(gates[:, 2 * Hp:3 * Hp])
        o = _sigmoid(gates[:, 3 * Hp:4 * Hp])
        c_new = f * c + i * g
        h_new = o * jnp.tanh(c_new)
        return h_new, c_new

    def body(t, carry):
        hf, cf, hb, cb = carry
        # forward step t and backward step (T-1-t) interleaved in the same iteration:
        # two independent recurrences overlap MXU / EUP latencies.
        rf = pl.multiple_of(t * batch, batch)
        hf, cf = cell(gx_sc[pl.ds(rf, batch), pl.ds(0, G)], hf, cf, whh_f)
        hs_sc[pl.ds(rf, batch), pl.ds(0, Hp)] = hf

        s = seq_len - 1 - t
        rb = pl.multiple_of(s * batch, batch)
        hb, cb = cell(gx_sc[pl.ds(rb, batch), pl.ds(G, G)], hb, cb, whh_b)
        hs_sc[pl.ds(rb, batch), pl.ds(Hp, Hp)] = hb
        return hf, cf, hb, cb

    z = jnp.zeros((batch, Hp), jnp.float32)
    # T is small and static -> fully unroll so the LLO scheduler sees across iterations.
    lax.fori_loop(0, seq_len, body, (z, z, z, z), unroll=True)

    # ---- final Linear over packed [fwd | bwd] hidden states: ONE lane-dense dot ----
    out_ref[...] = (jnp.dot(hs_sc[...], fcw_ref[...],
                            preferred_element_type=jnp.float32) + fcb_ref[...])


def init_params(key, vocab_size, output_size, embedding_size, hidden_size,
                padding_idx=0):
    ks = jax.random.split(key, 12)
    k_lstm = 1.0 / jnp.sqrt(jnp.float32(hidden_size))
    k_fc = 1.0 / jnp.sqrt(jnp.float32(2 * hidden_size))

    def u(k, shape, scale):
        return jax.random.uniform(k, shape, jnp.float32, -scale, scale)

    emb = jax.random.normal(ks[0], (vocab_size, embedding_size), jnp.float32)
    emb = emb.at[padding_idx].set(0.0)   # nn.Embedding(padding_idx=...) zeroes this row

    return dict(
        embedding=emb,
        wih_f=u(ks[1], (4 * hidden_size, embedding_size), k_lstm),
        whh_f=u(ks[2], (4 * hidden_size, hidden_size), k_lstm),
        bih_f=u(ks[3], (4 * hidden_size,), k_lstm),
        bhh_f=u(ks[4], (4 * hidden_size,), k_lstm),
        wih_b=u(ks[5], (4 * hidden_size, embedding_size), k_lstm),
        whh_b=u(ks[6], (4 * hidden_size, hidden_size), k_lstm),
        bih_b=u(ks[7], (4 * hidden_size,), k_lstm),
        bhh_b=u(ks[8], (4 * hidden_size,), k_lstm),
        fc_w=u(ks[9], (output_size, 2 * hidden_size), k_fc),
        fc_b=u(ks[10], (output_size,), k_fc),
    )


def _round_up(n, m):
    return -(-n // m) * m


@jax.jit
def tagger_lstm_forward(texts, params):
    emb = jnp.take(params["embedding"], texts, axis=0)    # (T, B, E) gather (plain-JAX glue)
    T, B, E = emb.shape
    H = params["whh_f"].shape[1]
    O = params["fc_w"].shape[0]

    Bp = max(8, _round_up(B, 8))          # sublane-multiple batch
    Hp = max(128, _round_up(H, 128))      # one 128-lane block per gate
    Op = max(128, _round_up(O, 128))      # lane-dense output

    def pad_to(w, shape):
        out = jnp.zeros(shape, jnp.float32)
        return out.at[tuple(slice(0, s) for s in w.shape)].set(w)

    def pad_gate_cols(w, h, hp):
        # w: (rows, 4h) with gates stacked i,f,g,o -> (rows, 4hp), each gate 128-aligned.
        out = jnp.zeros((w.shape[0], 4 * hp), jnp.float32)
        for k in range(4):
            out = out.at[:, k * hp:k * hp + h].set(w[:, k * h:(k + 1) * h])
        return out

    # Fused input-projection weight/bias for both directions: (E, 8Hp), (1, 8Hp).
    wih = jnp.concatenate(
        [pad_gate_cols(params["wih_f"].T, H, Hp),
         pad_gate_cols(params["wih_b"].T, H, Hp)], axis=1)
    b = jnp.concatenate(
        [pad_gate_cols((params["bih_f"] + params["bhh_f"]).reshape(1, 4 * H), H, Hp),
         pad_gate_cols((params["bih_b"] + params["bhh_b"]).reshape(1, 4 * H), H, Hp)],
        axis=1)

    whh_f = pad_to(pad_gate_cols(params["whh_f"].T, H, Hp), (Hp, 4 * Hp))
    whh_b = pad_to(pad_gate_cols(params["whh_b"].T, H, Hp), (Hp, 4 * Hp))

    # Fused FC weight: rows [0:Hp) consume fwd hidden states, [Hp:2Hp) consume bwd.
    fcw = jnp.concatenate(
        [pad_to(params["fc_w"][:, :H].T, (Hp, Op)),
         pad_to(params["fc_w"][:, H:].T, (Hp, Op))], axis=0)            # (2Hp, Op)
    fcb = pad_to(params["fc_b"].reshape(1, O), (1, Op))

    x = pad_to(emb, (T, Bp, E)).reshape(T * Bp, E)        # flatten: kernel sees (T*Bp, E)

    vmem = pl.BlockSpec(memory_space=pltpu.MemorySpace.VMEM)
    out = pl.pallas_call(
        partial(bilstm_fc_kernel, seq_len=T, batch=Bp),
        out_shape=jax.ShapeDtypeStruct((T * Bp, Op), jnp.float32),
        in_specs=[vmem] * 7,
        out_specs=vmem,
        scratch_shapes=[
            pltpu.VMEM((T * Bp, 8 * Hp), jnp.float32),   # hoisted input projections (f|b)
            pltpu.VMEM((T * Bp, 2 * Hp), jnp.float32),   # packed per-step hidden states
        ],
        # TODO(synk): at production T/B/H, stream gx/hs tiles (grid over T) instead of
        # keeping (T*Bp, ·) resident — this scheme hits v7x's 64 MiB VMEM first.
        compiler_params=pltpu.CompilerParams(vmem_limit_bytes=32 * 1024 * 1024),
    )(x, wih, whh_f, whh_b, b, fcw, fcb)

    return out.reshape(T, Bp, Op)[:, :B, :O]


def reference_forward(texts, params):
    """Pure-JAX reference matching PyTorch nn.LSTM(bidirectional=True) semantics."""
    emb = jnp.take(params["embedding"], texts, axis=0)
    T, B, E = emb.shape
    H = params["whh_f"].shape[1]

    def run_dir(xs, wih, whh, bih, bhh):
        def step(carry, x_t):
            h, c = carry
            gates = x_t @ wih.T + bih + h @ whh.T + bhh
            i = jax.nn.sigmoid(gates[:, 0 * H:1 * H])
            f = jax.nn.sigmoid(gates[:, 1 * H:2 * H])
            g = jnp.tanh(gates[:, 2 * H:3 * H])
            o = jax.nn.sigmoid(gates[:, 3 * H:4 * H])
            c = f * c + i * g
            h = o * jnp.tanh(c)
            return (h, c), h
        h0 = jnp.zeros((B, H), jnp.float32)
        _, hs = lax.scan(step, (h0, h0), xs)
        return hs

    h_f = run_dir(emb, params["wih_f"], params["whh_f"], params["bih_f"], params["bhh_f"])
    h_b = run_dir(emb[::-1], params["wih_b"], params["whh_b"],
                  params["bih_b"], params["bhh_b"])[::-1]
    h = jnp.concatenate([h_f, h_b], axis=-1)
    return h @ params["fc_w"].T + params["fc_b"]


if __name__ == "__main__":
    VOCAB_SIZE = 50
    OUTPUT_SIZE = 16
    EMBEDDING_SIZE = 32
    HIDDEN_SIZE = 32
    T, B = 8, 4

    key = jax.random.PRNGKey(0)
    pkey, dkey = jax.random.split(key)
    params = init_params(pkey, VOCAB_SIZE, OUTPUT_SIZE, EMBEDDING_SIZE, HIDDEN_SIZE)
    texts = jax.random.randint(dkey, (T, B), 0, VOCAB_SIZE, jnp.int32)

    out = jax.block_until_ready(tagger_lstm_forward(texts, params))
    assert out.shape == (T, B, OUTPUT_SIZE)

    ref = reference_forward(texts, params)
    max_err = float(jnp.max(jnp.abs(out - ref)))
    assert max_err < 1e-2, f"mismatch vs reference: {max_err}"
    print("KERNEL_OK")
</pallas_src>

<mosaic_0001>
module attributes {stable_mosaic.version = 11 : i64} {
  func.func @bilstm_fc_kernel(%arg0: memref<64x32xf32, #tpu.memory_space<vmem>>, %arg1: memref<32x1024xf32, #tpu.memory_space<vmem>>, %arg2: memref<128x512xf32, #tpu.memory_space<vmem>>, %arg3: memref<128x512xf32, #tpu.memory_space<vmem>>, %arg4: memref<1x1024xf32, #tpu.memory_space<vmem>>, %arg5: memref<256x128xf32, #tpu.memory_space<vmem>>, %arg6: memref<1x128xf32, #tpu.memory_space<vmem>>, %arg7: memref<64x128xf32, #tpu.memory_space<vmem>>, %arg8: memref<64x1024xf32, #tpu.memory_space<vmem>>, %arg9: memref<64x256xf32, #tpu.memory_space<vmem>>) attributes {dimension_semantics = [], scalar_prefetch = 0 : i64, scratch_operands = 2 : i64, tpu.core_type = #tpu.core_type<tc>} {
    %c0 = arith.constant 0 : index
    %c0_0 = arith.constant 0 : index
    %0 = vector.load %arg0[%c0, %c0_0] : memref<64x32xf32, #tpu.memory_space<vmem>>, vector<64x32xf32>
    %c0_1 = arith.constant 0 : index
    %c0_2 = arith.constant 0 : index
    %1 = vector.load %arg1[%c0_1, %c0_2] : memref<32x1024xf32, #tpu.memory_space<vmem>>, vector<32x1024xf32>
    %cst = arith.constant dense<0.000000e+00> : vector<64x1024xf32>
    %2 = tpu.matmul %0, %1, %cst {dimension_numbers = #tpu.dot_dimension_numbers<[1], [0], [0], [1], [0, 0, 1, 1], [], []>} : vector<64x32xf32>, vector<32x1024xf32>, vector<64x1024xf32> -> vector<64x1024xf32>
    %c0_3 = arith.constant 0 : index
    %c0_4 = arith.constant 0 : index
    %3 = vector.load %arg4[%c0_3, %c0_4] : memref<1x1024xf32, #tpu.memory_space<vmem>>, vector<1x1024xf32>
    %4 = vector.broadcast %3 : vector<1x1024xf32> to vector<64x1024xf32>
    %5 = arith.addf %2, %4 : vector<64x1024xf32>
    %c0_5 = arith.constant 0 : index
    %c0_6 = arith.constant 0 : index
    %6 = vector.load %arg8[%c0_5, %c0_6] : memref<64x1024xf32, #tpu.memory_space<vmem>>, vector<64x1024xf32>
    tpu.vector_store %arg8[%c0_5, %c0_6], %5 {strides = array<i32>} : memref<64x1024xf32, #tpu.memory_space<vmem>>, vector<64x1024xf32>,
    %c0_7 = arith.constant 0 : index
    %c0_8 = arith.constant 0 : index
    %7 = vector.load %arg2[%c0_7, %c0_8] : memref<128x512xf32, #tpu.memory_space<vmem>>, vector<128x512xf32>
    %c0_9 = arith.constant 0 : index
    %c0_10 = arith.constant 0 : index
    %8 = vector.load %arg3[%c0_9, %c0_10] : memref<128x512xf32, #tpu.memory_space<vmem>>, vector<128x512xf32>
    %cst_11 = arith.constant 0.000000e+00 : f32
    %9 = vector.broadcast %cst_11 : f32 to vector<8x128xf32>
    %c0_i32 = arith.constant 0 : i32
    %c8_i32 = arith.constant 8 : i32
    %10 = arith.muli %c0_i32, %c8_i32 : i32
    %11 = tpu.assume_multiple %10, 8 : i32
    %12 = arith.index_cast %11 : i32 to index
    %c0_12 = arith.constant 0 : index
    %13 = vector.load %arg8[%12, %c0_12] : memref<64x1024xf32, #tpu.memory_space<vmem>>, vector<8x512xf32>
    %cst_13 = arith.constant dense<0.000000e+00> : vector<8x512xf32>
    %14 = tpu.matmul %9, %7, %cst_13 {dimension_numbers = #tpu.dot_dimension_numbers<[1], [0], [0], [1], [0, 0, 1, 1], [], []>} : vector<8x128xf32>, vector<128x512xf32>, vector<8x512xf32> -> vector<8x512xf32>
    %15 = arith.addf %13, %14 : vector<8x512xf32>
    %16 = vector.extract_strided_slice %15 {offsets = [0, 0], sizes = [8, 128], strides = [1, 1]} : vector<8x512xf32> to vector<8x128xf32>
    %cst_14 = arith.constant 0.000000e+00 : f32
    %17 = vector.broadcast %cst_14 : f32 to vector<8x128xf32>
    %18 = arith.subf %17, %16 : vector<8x128xf32>
    %19 = math.exp %18 : vector<8x128xf32>
    %cst_15 = arith.constant 1.000000e+00 : f32
    %20 = vector.broadcast %cst_15 : f32 to vector<8x128xf32>
    %21 = arith.addf %20, %19 : vector<8x128xf32>
    %22 = tpu.reciprocal %21 {approx = true} : vector<8x128xf32> -> vector<8x128xf32>
    %23 = vector.extract_strided_slice %15 {offsets = [0, 128], sizes = [8, 128], strides = [1, 1]} : vector<8x512xf32> to vector<8x128xf32>
    %cst_16 = arith.constant 0.000000e+00 : f32
    %24 = vector.broadcast %cst_16 : f32 to vector<8x128xf32>
    %25 = arith.subf %24, %23 : vector<8x128xf32>
    %26 = math.exp %25 : vector<8x128xf32>
    %cst_17 = arith.constant 1.000000e+00 : f32
    %27 = vector.broadcast %cst_17 : f32 to vector<8x128xf32>
    %28 = arith.addf %27, %26 : vector<8x128xf32>
    %29 = tpu.reciprocal %28 {approx = true} : vector<8x128xf32> -> vector<8x128xf32>
    %30 = vector.extract_strided_slice %15 {offsets = [0, 256], sizes = [8, 128], strides = [1, 1]} : vector<8x512xf32> to vector<8x128xf32>
    %31 = math.tanh %30 : vector<8x128xf32>
    %32 = vector.extract_strided_slice %15 {offsets = [0, 384], sizes = [8, 128], strides = [1, 1]} : vector<8x512xf32> to vector<8x128xf32>
    %cst_18 = arith.constant 0.000000e+00 : f32
    %33 = vector.broadcast %cst_18 : f32 to vector<8x128xf32>
    %34 = arith.subf %33, %32 : vector<8x128xf32>
    %35 = math.exp %34 : vector<8x128xf32>
    %cst_19 = arith.constant 1.000000e+00 : f32
    %36 = vector.broadcast %cst_19 : f32 to vector<8x128xf32>
    %37 = arith.addf %36, %35 : vector<8x128xf32>
    %38 = tpu.reciprocal %37 {approx = true} : vector<8x128xf32> -> vector<8x128xf32>
    %39 = arith.mulf %29, %9 : vector<8x128xf32>
    %40 = arith.mulf %22, %31 : vector<8x128xf32>
    %41 = arith.addf %39, %40 : vector<8x128xf32>
    %42 = math.tanh %41 : vector<8x128xf32>
    %43 = arith.mulf %38, %42 : vector<8x128xf32>
    %44 = arith.index_cast %11 : i32 to index
    %c0_20 = arith.constant 0 : index
    %45 = vector.load %arg9[%44, %c0_20] : memref<64x256xf32, #tpu.memory_space<vmem>>, vector<8x128xf32>
    tpu.vector_store %arg9[%44, %c0_20], %43 {strides = array<i32>} : memref<64x256xf32, #tpu.memory_space<vmem>>, vector<8x128xf32>,
    %c7_i32 = arith.constant 7 : i32
    %46 = arith.subi %c7_i32, %c0_i32 : i32
    %c8_i32_21 = arith.constant 8 : i32
    %47 = arith.muli %46, %c8_i32_21 : i32
    %48 = tpu.assume_multiple %47, 8 : i32
    %49 = arith.index_cast %48 : i32 to index
    %c512 = arith.constant 512 : index
    %50 = vector.load %arg8[%49, %c512] : memref<64x1024xf32, #tpu.memory_space<vmem>>, vector<8x512xf32>
    %cst_22 = arith.constant dense<0.000000e+00> : vector<8x512xf32>
    %51 = tpu.matmul %9, %8, %cst_22 {dimension_numbers = #tpu.dot_dimension_numbers<[1], [0], [0], [1], [0, 0, 1, 1], [], []>} : vector<8x128xf32>, vector<128x512xf32>, vector<8x512xf32> -> vector<8x512xf32>
    %52 = arith.addf %50, %51 : vector<8x512xf32>
    %53 = vector.extract_strided_slice %52 {offsets = [0, 0], sizes = [8, 128], strides = [1, 1]} : vector<8x512xf32> to vector<8x128xf32>
    %cst_23 = arith.constant 0.000000e+00 : f32
    %54 = vector.broadcast %cst_23 : f32 to vector<8x128xf32>
    %55 = arith.subf %54, %53 : vector<8x128xf32>
    %56 = math.exp %55 : vector<8x128xf32>
    %cst_24 = arith.constant 1.000000e+00 : f32
    %57 = vector.broadcast %cst_24 : f32 to vector<8x128xf32>
    %58 = arith.addf %57, %56 : vector<8x128xf32>
    %59 = tpu.reciprocal %58 {approx = true} : vector<8x128xf32> -> vector<8x128xf32>
    %60 = vector.extract_strided_slice %52 {offsets = [0, 128], sizes = [8, 128], strides = [1, 1]} : vector<8x512xf32> to vector<8x128xf32>
    %cst_25 = arith.constant 0.000000e+00 : f32
    %61 = vector.broadcast %cst_25 : f32 to vector<8x128xf32>
    %62 = arith.subf %61, %60 : vector<8x128xf32>
    %63 = math.exp %62 : vector<8x128xf32>
    %cst_26 = arith.constant 1.000000e+00 : f32
    %64 = vector.broadcast %cst_26 : f32 to vector<8x128xf32>
    %65 = arith.addf %64, %63 : vector<8x128xf32>
    %66 = tpu.reciprocal %65 {approx = true} : vector<8x128xf32> -> vector<8x128xf32>
    %67 = vector.extract_strided_slice %52 {offsets = [0, 256], sizes = [8, 128], strides = [1, 1]} : vector<8x512xf32> to vector<8x128xf32>
    %68 = math.tanh %67 : vector<8x128xf32>
    %69 = vector.extract_strided_slice %52 {offsets = [0, 384], sizes = [8, 128], strides = [1, 1]} : vector<8x512xf32> to vector<8x128xf32>
    %cst_27 = arith.constant 0.000000e+00 : f32
    %70 = vector.broadcast %cst_27 : f32 to vector<8x128xf32>
    %71 = arith.subf %70, %69 : vector<8x128xf32>
    %72 = math.exp %71 : vector<8x128xf32>
    %cst_28 = arith.constant 1.000000e+00 : f32
    %73 = vector.broadcast %cst_28 : f32 to vector<8x128xf32>
    %74 = arith.addf %73, %72 : vector<8x128xf32>
    %75 = tpu.reciprocal %74 {approx = true} : vector<8x128xf32> -> vector<8x128xf32>
    %76 = arith.mulf %66, %9 : vector<8x128xf32>
    %77 = arith.mulf %59, %68 : vector<8x128xf32>
    %78 = arith.addf %76, %77 : vector<8x128xf32>
    %79 = math.tanh %78 : vector<8x128xf32>
    %80 = arith.mulf %75, %79 : vector<8x128xf32>
    %81 = arith.index_cast %48 : i32 to index
    %c128 = arith.constant 128 : index
    %82 = vector.load %arg9[%81, %c128] : memref<64x256xf32, #tpu.memory_space<vmem>>, vector<8x128xf32>
    tpu.vector_store %arg9[%81, %c128], %80 {strides = array<i32>} : memref<64x256xf32, #tpu.memory_space<vmem>>, vector<8x128xf32>,
    %c1_i32 = arith.constant 1 : i32
    %c8_i32_29 = arith.constant 8 : i32
    %83 = arith.muli %c1_i32, %c8_i32_29 : i32
    %84 = tpu.assume_multiple %83, 8 : i32
    %85 = arith.index_cast %84 : i32 to index
    %c0_30 = arith.constant 0 : index
    %86 = vector.load %arg8[%85, %c0_30] : memref<64x1024xf32, #tpu.memory_space<vmem>>, vector<8x512xf32>
    %cst_31 = arith.constant dense<0.000000e+00> : vector<8x512xf32>
    %87 = tpu.matmul %43, %7, %cst_31 {dimension_numbers = #tpu.dot_dimension_numbers<[1], [0], [0], [1], [0, 0, 1, 1], [], []>} : vector<8x128xf32>, vector<128x512xf32>, vector<8x512xf32> -> vector<8x512xf32>
    %88 = arith.addf %86, %87 : vector<8x512xf32>
    %89 = vector.extract_strided_slice %88 {offsets = [0, 0], sizes = [8, 128], strides = [1, 1]} : vector<8x512xf32> to vector<8x128xf32>
    %cst_32 = arith.constant 0.000000e+00 : f32
    %90 = vector.broadcast %cst_32 : f32 to vector<8x128xf32>
    %91 = arith.subf %90, %89 : vector<8x128xf32>
    %92 = math.exp %91 : vector<8x128xf32>
    %cst_33 = arith.constant 1.000000e+00 : f32
    %93 = vector.broadcast %cst_33 : f32 to vector<8x128xf32>
    %94 = arith.addf %93, %92 : vector<8x128xf32>
    %95 = tpu.reciprocal %94 {approx = true} : vector<8x128xf32> -> vector<8x128xf32>
    %96 = vector.extract_strided_slice %88 {offsets = [0, 128], sizes = [8, 128], strides = [1, 1]} : vector<8x512xf32> to vector<8x128xf32>
    %cst_34 = arith.constant 0.000000e+00 : f32
    %97 = vector.broadcast %cst_34 : f32 to vector<8x128xf32>
    %98 = arith.subf %97, %96 : vector<8x128xf32>
    %99 = math.exp %98 : vector<8x128xf32>
    %cst_35 = arith.constant 1.000000e+00 : f32
    %100 = vector.broadcast %cst_35 : f32 to vector<8x128xf32>
    %101 = arith.addf %100, %99 : vector<8x128xf32>
    %102 = tpu.reciprocal %101 {approx = true} : vector<8x128xf32> -> vector<8x128xf32>
    %103 = vector.extract_strided_slice %88 {offsets = [0, 256], sizes = [8, 128], strides = [1, 1]} : vector<8x512xf32> to vector<8x128xf32>
    %104 = math.tanh %103 : vector<8x128xf32>
    %105 = vector.extract_strided_slice %88 {offsets = [0, 384], sizes = [8, 128], strides = [1, 1]} : vector<8x512xf32> to vector<8x128xf32>
    %cst_36 = arith.constant 0.000000e+00 : f32
    %106 = vector.broadcast %cst_36 : f32 to vector<8x128xf32>
    %107 = arith.subf %106, %105 : vector<8x128xf32>
    %108 = math.exp %107 : vector<8x128xf32>
    %cst_37 = arith.constant 1.000000e+00 : f32
    %109 = vector.broadcast %cst_37 : f32 to vector<8x128xf32>
    %110 = arith.addf %109, %108 : vector<8x128xf32>
    %111 = tpu.reciprocal %110 {approx = true} : vector<8x128xf32> -> vector<8x128xf32>
    %112 = arith.mulf %102, %41 : vector<8x128xf32>
    %113 = arith.mulf %95, %104 : vector<8x128xf32>
    %114 = arith.addf %112, %113 : vector<8x128xf32>
    %115 = math.tanh %114 : vector<8x128xf32>
    %116 = arith.mulf %111, %115 : vector<8x128xf32>
    %117 = arith.index_cast %84 : i32 to index
    %c0_38 = arith.constant 0 : index
    %118 = vector.load %arg9[%117, %c0_38] : memref<64x256xf32, #tpu.memory_space<vmem>>, vector<8x128xf32>
    tpu.vector_store %arg9[%117, %c0_38], %116 {strides = array<i32>} : memref<64x256xf32, #tpu.memory_space<vmem>>, vector<8x128xf32>,
    %c7_i32_39 = arith.constant 7 : i32
    %119 = arith.subi %c7_i32_39, %c1_i32 : i32
    %c8_i32_40 = arith.constant 8 : i32
    %120 = arith.muli %119, %c8_i32_40 : i32
    %121 = tpu.assume_multiple %120, 8 : i32
    %122 = arith.index_cast %121 : i32 to index
    %c512_41 = arith.constant 512 : index
    %123 = vector.load %arg8[%122, %c512_41] : memref<64x1024xf32, #tpu.memory_space<vmem>>, vector<8x512xf32>
    %cst_42 = arith.constant dense<0.000000e+00> : vector<8x512xf32>
    %124 = tpu.matmul %80, %8, %cst_42 {dimension_numbers = #tpu.dot_dimension_numbers<[1], [0], [0], [1], [0, 0, 1, 1], [], []>} : vector<8x128xf32>, vector<128x512xf32>, vector<8x512xf32> -> vector<8x512xf32>
    %125 = arith.addf %123, %124 : vector<8x512xf32>
    %126 = vector.extract_strided_slice %125 {offsets = [0, 0], sizes = [8, 128], strides = [1, 1]} : vector<8x512xf32> to vector<8x128xf32>
    %cst_43 = arith.constant 0.000000e+00 : f32
    %127 = vector.broadcast %cst_43 : f32 to vector<8x128xf32>
    %128 = arith.subf %127, %126 : vector<8x128xf32>
    %129 = math.exp %128 : vector<8x128xf32>
    %cst_44 = arith.constant 1.000000e+00 : f32
    %130 = vector.broadcast %cst_44 : f32 to vector<8x128xf32>
    %131 = arith.addf %130, %129 : vector<8x128xf32>
    %132 = tpu.reciprocal %131 {approx = true} : vector<8x128xf32> -> vector<8x128xf32>
    %133 = vector.extract_strided_slice %125 {offsets = [0, 128], sizes = [8, 128], strides = [1, 1]} : vector<8x512xf32> to vector<8x128xf32>
    %cst_45 = arith.constant 0.000000e+00 : f32
    %134 = vector.broadcast %cst_45 : f32 to vector<8x128xf32>
    %135 = arith.subf %134, %133 : vector<8x128xf32>
    %136 = math.exp %135 : vector<8x128xf32>
    %cst_46 = arith.constant 1.000000e+00 : f32
    %137 = vector.broadcast %cst_46 : f32 to vector<8x128xf32>
    %138 = arith.addf %137, %136 : vector<8x128xf32>
    %139 = tpu.reciprocal %138 {approx = true} : vector<8x128xf32> -> vector<8x128xf32>
    %140 = vector.extract_strided_slice %125 {offsets = [0, 256], sizes = [8, 128], strides = [1, 1]} : vector<8x512xf32> to vector<8x128xf32>
    %141 = math.tanh %140 : vector<8x128xf32>
    %142 = vector.extract_strided_slice %125 {offsets = [0, 384], sizes = [8, 128], strides = [1, 1]} : vector<8x512xf32> to vector<8x128xf32>
    %cst_47 = arith.constant 0.000000e+00 : f32
    %143 = vector.broadcast %cst_47 : f32 to vector<8x128xf32>
    %144 = arith.subf %143, %142 : vector<8x128xf32>
    %145 = math.exp %144 : vector<8x128xf32>
    %cst_48 = arith.constant 1.000000e+00 : f32
    %146 = vector.broadcast %cst_48 : f32 to vector<8x128xf32>
    %147 = arith.addf %146, %145 : vector<8x128xf32>
    %148 = tpu.reciprocal %147 {approx = true} : vector<8x128xf32> -> vector<8x128xf32>
    %149 = arith.mulf %139, %78 : vector<8x128xf32>
    %150 = arith.mulf %132, %141 : vector<8x128xf32>
    %151 = arith.addf %149, %150 : vector<8x128xf32>
    %152 = math.tanh %151 : vector<8x128xf32>
    %153 = arith.mulf %148, %152 : vector<8x128xf32>
    %154 = arith.index_cast %121 : i32 to index
    %c128_49 = arith.constant 128 : index
    %155 = vector.load %arg9[%154, %c128_49] : memref<64x256xf32, #tpu.memory_space<vmem>>, vector<8x128xf32>
    tpu.vector_store %arg9[%154, %c128_49], %153 {strides = array<i32>} : memref<64x256xf32, #tpu.memory_space<vmem>>, vector<8x128xf32>,
    %c2_i32 = arith.constant 2 : i32
    %c8_i32_50 = arith.constant 8 : i32
    %156 = arith.muli %c2_i32, %c8_i32_50 : i32
    %157 = tpu.assume_multiple %156, 8 : i32
    %158 = arith.index_cast %157 : i32 to index
    %c0_51 = arith.constant 0 : index
    %159 = vector.load %arg8[%158, %c0_51] : memref<64x1024xf32, #tpu.memory_space<vmem>>, vector<8x512xf32>
    %cst_52 = arith.constant dense<0.000000e+00> : vector<8x512xf32>
    %160 = tpu.matmul %116, %7, %cst_52 {dimension_numbers = #tpu.dot_dimension_numbers<[1], [0], [0], [1], [0, 0, 1, 1], [], []>} : vector<8x128xf32>, vector<128x512xf32>, vector<8x512xf32> -> vector<8x512xf32>
    %161 = arith.addf %159, %160 : vector<8x512xf32>
    %162 = vector.extract_strided_slice %161 {offsets = [0, 0], sizes = [8, 128], strides = [1, 1]} : vector<8x512xf32> to vector<8x128xf32>
    %cst_53 = arith.constant 0.000000e+00 : f32
    %163 = vector.broadcast %cst_53 : f32 to vector<8x128xf32>
    %164 = arith.subf %163, %162 : vector<8x128xf32>
    %165 = math.exp %164 : vector<8x128xf32>
    %cst_54 = arith.constant 1.000000e+00 : f32
    %166 = vector.broadcast %cst_54 : f32 to vector<8x128xf32>
    %167 = arith.addf %166, %165 : vector<8x128xf32>
    %168 = tpu.reciprocal %167 {approx = true} : vector<8x128xf32> -> vector<8x128xf32>
    %169 = vector.extract_strided_slice %161 {offsets = [0, 128], sizes = [8, 128], strides = [1, 1]} : vector<8x512xf32> to vector<8x128xf32>
    %cst_55 = arith.constant 0.000000e+00 : f32
    %170 = vector.broadcast %cst_55 : f32 to vector<8x128xf32>
    %171 = arith.subf %170, %169 : vector<8x128xf32>
    %172 = math.exp %171 : vector<8x128xf32>
    %cst_56 = arith.constant 1.000000e+00 : f32
    %173 = vector.broadcast %cst_56 : f32 to vector<8x128xf32>
    %174 = arith.addf %173, %172 : vector<8x128xf32>
    %175 = tpu.reciprocal %174 {approx = true} : vector<8x128xf32> -> vector<8x128xf32>
    %176 = vector.extract_strided_slice %161 {offsets = [0, 256], sizes = [8, 128], strides = [1, 1]} : vector<8x512xf32> to vector<8x128xf32>
    %177 = math.tanh %176 : vector<8x128xf32>
    %178 = vector.extract_strided_slice %161 {offsets = [0, 384], sizes = [8, 128], strides = [1, 1]} : vector<8x512xf32> to vector<8x128xf32>
    %cst_57 = arith.constant 0.000000e+00 : f32
    %179 = vector.broadcast %cst_57 : f32 to vector<8x128xf32>
    %180 = arith.subf %179, %178 : vector<8x128xf32>
    %181 = math.exp %180 : vector<8x128xf32>
    %cst_58 = arith.constant 1.000000e+00 : f32
    %182 = vector.broadcast %cst_58 : f32 to vector<8x128xf32>
    %183 = arith.addf %182, %181 : vector<8x128xf32>
    %184 = tpu.reciprocal %183 {approx = true} : vector<8x128xf32> -> vector<8x128xf32>
    %185 = arith.mulf %175, %114 : vector<8x128xf32>
    %186 = arith.mulf %168, %177 : vector<8x128xf32>
    %187 = arith.addf %185, %186 : vector<8x128xf32>
    %188 = math.tanh %187 : vector<8x128xf32>
    %189 = arith.mulf %184, %188 : vector<8x128xf32>
    %190 = arith.index_cast %157 : i32 to index
    %c0_59 = arith.constant 0 : index
    %191 = vector.load %arg9[%190, %c0_59] : memref<64x256xf32, #tpu.memory_space<vmem>>, vector<8x128xf32>
    tpu.vector_store %arg9[%190, %c0_59], %189 {strides = array<i32>} : memref<64x256xf32, #tpu.memory_space<vmem>>, vector<8x128xf32>,
    %c7_i32_60 = arith.constant 7 : i32
    %192 = arith.subi %c7_i32_60, %c2_i32 : i32
    %c8_i32_61 = arith.constant 8 : i32
    %193 = arith.muli %192, %c8_i32_61 : i32
    %194 = tpu.assume_multiple %193, 8 : i32
    %195 = arith.index_cast %194 : i32 to index
    %c512_62 = arith.constant 512 : index
    %196 = vector.load %arg8[%195, %c512_62] : memref<64x1024xf32, #tpu.memory_space<vmem>>, vector<8x512xf32>
    %cst_63 = arith.constant dense<0.000000e+00> : vector<8x512xf32>
    %197 = tpu.matmul %153, %8, %cst_63 {dimension_numbers = #tpu.dot_dimension_numbers<[1], [0], [0], [1], [0, 0, 1, 1], [], []>} : vector<8x128xf32>, vector<128x512xf32>, vector<8x512xf32> -> vector<8x512xf32>
    %198 = arith.addf %196, %197 : vector<8x512xf32>
    %199 = vector.extract_strided_slice %198 {offsets = [0, 0], sizes = [8, 128], strides = [1, 1]} : vector<8x512xf32> to vector<8x128xf32>
    %cst_64 = arith.constant 0.000000e+00 : f32
    %200 = vector.broadcast %cst_64 : f32 to vector<8x128xf32>
    %201 = arith.subf %200, %199 : vector<8x128xf32>
    %202 = math.exp %201 : vector<8x128xf32>
    %cst_65 = arith.constant 1.000000e+00 : f32
    %203 = vector.broadcast %cst_65 : f32 to vector<8x128xf32>
    %204 = arith.addf %203, %202 : vector<8x128xf32>
    %205 = tpu.reciprocal %204 {approx = true} : vector<8x128xf32> -> vector<8x128xf32>
    %206 = vector.extract_strided_slice %198 {offsets = [0, 128], sizes = [8, 128], strides = [1, 1]} : vector<8x512xf32> to vector<8x128xf32>
    %cst_66 = arith.constant 0.000000e+00 : f32
    %207 = vector.broadcast %cst_66 : f32 to vector<8x128xf32>
    %208 = arith.subf %207, %206 : vector<8x128xf32>
    %209 = math.exp %208 : vector<8x128xf32>
    %cst_67 = arith.constant 1.000000e+00 : f32
    %210 = vector.broadcast %cst_67 : f32 to vector<8x128xf32>
    %211 = arith.addf %210, %209 : vector<8x128xf32>
    %212 = tpu.reciprocal %211 {approx = true} : vector<8x128xf32> -> vector<8x128xf32>
    %213 = vector.extract_strided_slice %198 {offsets = [0, 256], sizes = [8, 128], strides = [1, 1]} : vector<8x512xf32> to vector<8x128xf32>
    %214 = math.tanh %213 : vector<8x128xf32>
    %215 = vector.extract_strided_slice %198 {offsets = [0, 384], sizes = [8, 128], strides = [1, 1]} : vector<8x512xf32> to vector<8x128xf32>
    %cst_68 = arith.constant 0.000000e+00 : f32
    %216 = vector.broadcast %cst_68 : f32 to vector<8x128xf32>
    %217 = arith.subf %216, %215 : vector<8x128xf32>
    %218 = math.exp %217 : vector<8x128xf32>
    %cst_69 = arith.constant 1.000000e+00 : f32
    %219 = vector.broadcast %cst_69 : f32 to vector<8x128xf32>
    %220 = arith.addf %219, %218 : vector<8x128xf32>
    %221 = tpu.reciprocal %220 {approx = true} : vector<8x128xf32> -> vector<8x128xf32>
    %222 = arith.mulf %212, %151 : vector<8x128xf32>
    %223 = arith.mulf %205, %214 : vector<8x128xf32>
    %224 = arith.addf %222, %223 : vector<8x128xf32>
    %225 = math.tanh %224 : vector<8x128xf32>
    %226 = arith.mulf %221, %225 : vector<8x128xf32>
    %227 = arith.index_cast %194 : i32 to index
    %c128_70 = arith.constant 128 : index
    %228 = vector.load %arg9[%227, %c128_70] : memref<64x256xf32, #tpu.memory_space<vmem>>, vector<8x128xf32>
    tpu.vector_store %arg9[%227, %c128_70], %226 {strides = array<i32>} : memref<64x256xf32, #tpu.memory_space<vmem>>, vector<8x128xf32>,
    %c3_i32 = arith.constant 3 : i32
    %c8_i32_71 = arith.constant 8 : i32
    %229 = arith.muli %c3_i32, %c8_i32_71 : i32
    %230 = tpu.assume_multiple %229, 8 : i32
    %231 = arith.index_cast %230 : i32 to index
    %c0_72 = arith.constant 0 : index
    %232 = vector.load %arg8[%231, %c0_72] : memref<64x1024xf32, #tpu.memory_space<vmem>>, vector<8x512xf32>
    %cst_73 = arith.constant dense<0.000000e+00> : vector<8x512xf32>
    %233 = tpu.matmul %189, %7, %cst_73 {dimension_numbers = #tpu.dot_dimension_numbers<[1], [0], [0], [1], [0, 0, 1, 1], [], []>} : vector<8x128xf32>, vector<128x512xf32>, vector<8x512xf32> -> vector<8x512xf32>
    %234 = arith.addf %232, %233 : vector<8x512xf32>
    %235 = vector.extract_strided_slice %234 {offsets = [0, 0], sizes = [8, 128], strides = [1, 1]} : vector<8x512xf32> to vector<8x128xf32>
    %cst_74 = arith.constant 0.000000e+00 : f32
    %236 = vector.broadcast %cst_74 : f32 to vector<8x128xf32>
    %237 = arith.subf %236, %235 : vector<8x128xf32>
    %238 = math.exp %237 : vector<8x128xf32>
    %cst_75 = arith.constant 1.000000e+00 : f32
    %239 = vector.broadcast %cst_75 : f32 to vector<8x128xf32>
    %240 = arith.addf %239, %238 : vector<8x128xf32>
    %241 = tpu.reciprocal %240 {approx = true} : vector<8x128xf32> -> vector<8x128xf32>
    %242 = vector.extract_strided_slice %234 {offsets = [0, 128], sizes = [8, 128], strides = [1, 1]} : vector<8x512xf32> to vector<8x128xf32>
    %cst_76 = arith.constant 0.000000e+00 : f32
    %243 = vector.broadcast %cst_76 : f32 to vector<8x128xf32>
    %244 = arith.subf %243, %242 : vector<8x128xf32>
    %245 = math.exp %244 : vector<8x128xf32>
    %cst_77 = arith.constant 1.000000e+00 : f32
    %246 = vector.broadcast %cst_77 : f32 to vector<8x128xf32>
    %247 = arith.addf %246, %245 : vector<8x128xf32>
    %248 = tpu.reciprocal %247 {approx = true} : vector<8x128xf32> -> vector<8x128xf32>
    %249 = vector.extract_strided_slice %234 {offsets = [0, 256], sizes = [8, 128], strides = [1, 1]} : vector<8x512xf32> to vector<8x128xf32>
    %250 = math.tanh %249 : vector<8x128xf32>
    %251 = vector.extract_strided_slice %234 {offsets = [0, 384], sizes = [8, 128], strides = [1, 1]} : vector<8x512xf32> to vector<8x128xf32>
    %cst_78 = arith.constant 0.000000e+00 : f32
    %252 = vector.broadcast %cst_78 : f32 to vector<8x128xf32>
    %253 = arith.subf %252, %251 : vector<8x128xf32>
    %254 = math.exp %253 : vector<8x128xf32>
    %cst_79 = arith.constant 1.000000e+00 : f32
    %255 = vector.broadcast %cst_79 : f32 to vector<8x128xf32>
    %256 = arith.addf %255, %254 : vector<8x128xf32>
    %257 = tpu.reciprocal %256 {approx = true} : vector<8x128xf32> -> vector<8x128xf32>
    %258 = arith.mulf %248, %187 : vector<8x128xf32>
    %259 = arith.mulf %241, %250 : vector<8x128xf32>
    %260 = arith.addf %258, %259 : vector<8x128xf32>
    %261 = math.tanh %260 : vector<8x128xf32>
    %262 = arith.mulf %257, %261 : vector<8x128xf32>
    %263 = arith.index_cast %230 : i32 to index
    %c0_80 = arith.constant 0 : index
    %264 = vector.load %arg9[%263, %c0_80] : memref<64x256xf32, #tpu.memory_space<vmem>>, vector<8x128xf32>
    tpu.vector_store %arg9[%263, %c0_80], %262 {strides = array<i32>} : memref<64x256xf32, #tpu.memory_space<vmem>>, vector<8x128xf32>,
    %c7_i32_81 = arith.constant 7 : i32
    %265 = arith.subi %c7_i32_81, %c3_i32 : i32
    %c8_i32_82 = arith.constant 8 : i32
    %266 = arith.muli %265, %c8_i32_82 : i32
    %267 = tpu.assume_multiple %266, 8 : i32
    %268 = arith.index_cast %267 : i32 to index
    %c512_83 = arith.constant 512 : index
    %269 = vector.load %arg8[%268, %c512_83] : memref<64x1024xf32, #tpu.memory_space<vmem>>, vector<8x512xf32>
    %cst_84 = arith.constant dense<0.000000e+00> : vector<8x512xf32>
    %270 = tpu.matmul %226, %8, %cst_84 {dimension_numbers = #tpu.dot_dimension_numbers<[1], [0], [0], [1], [0, 0, 1, 1], [], []>} : vector<8x128xf32>, vector<128x512xf32>, vector<8x512xf32> -> vector<8x512xf32>
    %271 = arith.addf %269, %270 : vector<8x512xf32>
    %272 = vector.extract_strided_slice %271 {offsets = [0, 0], sizes = [8, 128], strides = [1, 1]} : vector<8x512xf32> to vector<8x128xf32>
    %cst_85 = arith.constant 0.000000e+00 : f32
    %273 = vector.broadcast %cst_85 : f32 to vector<8x128xf32>
    %274 = arith.subf %273, %272 : vector<8x128xf32>
    %275 = math.exp %274 : vector<8x128xf32>
    %cst_86 = arith.constant 1.000000e+00 : f32
    %276 = vector.broadcast %cst_86 : f32 to vector<8x128xf32>
    %277 = arith.addf %276, %275 : vector<8x128xf32>
    %278 = tpu.reciprocal %277 {approx = true} : vector<8x128xf32> -> vector<8x128xf32>
    %279 = vector.extract_strided_slice %271 {offsets = [0, 128], sizes = [8, 128], strides = [1, 1]} : vector<8x512xf32> to vector<8x128xf32>
    %cst_87 = arith.constant 0.000000e+00 : f32
    %280 = vector.broadcast %cst_87 : f32 to vector<8x128xf32>
    %281 = arith.subf %280, %279 : vector<8x128xf32>
    %282 = math.exp %281 : vector<8x128xf32>
    %cst_88 = arith.constant 1.000000e+00 : f32
    %283 = vector.broadcast %cst_88 : f32 to vector<8x128xf32>
    %284 = arith.addf %283, %282 : vector<8x128xf32>
    %285 = tpu.reciprocal %284 {approx = true} : vector<8x128xf32> -> vector<8x128xf32>
    %286 = vector.extract_strided_slice %271 {offsets = [0, 256], sizes = [8, 128], strides = [1, 1]} : vector<8x512xf32> to vector<8x128xf32>
    %287 = math.tanh %286 : vector<8x128xf32>
    %288 = vector.extract_strided_slice %271 {offsets = [0, 384], sizes = [8, 128], strides = [1, 1]} : vector<8x512xf32> to vector<8x128xf32>
    %cst_89 = arith.constant 0.000000e+00 : f32
    %289 = vector.broadcast %cst_89 : f32 to vector<8x128xf32>
    %290 = arith.subf %289, %288 : vector<8x128xf32>
    %291 = math.exp %290 : vector<8x128xf32>
    %cst_90 = arith.constant 1.000000e+00 : f32
    %292 = vector.broadcast %cst_90 : f32 to vector<8x128xf32>
    %293 = arith.addf %292, %291 : vector<8x128xf32>
    %294 = tpu.reciprocal %293 {approx = true} : vector<8x128xf32> -> vector<8x128xf32>
    %295 = arith.mulf %285, %224 : vector<8x128xf32>
    %296 = arith.mulf %278, %287 : vector<8x128xf32>
    %297 = arith.addf %295, %296 : vector<8x128xf32>
    %298 = math.tanh %297 : vector<8x128xf32>
    %299 = arith.mulf %294, %298 : vector<8x128xf32>
    %300 = arith.index_cast %267 : i32 to index
    %c128_91 = arith.constant 128 : index
    %301 = vector.load %arg9[%300, %c128_91] : memref<64x256xf32, #tpu.memory_space<vmem>>, vector<8x128xf32>
    tpu.vector_store %arg9[%300, %c128_91], %299 {strides = array<i32>} : memref<64x256xf32, #tpu.memory_space<vmem>>, vector<8x128xf32>,
    %c4_i32 = arith.constant 4 : i32
    %c8_i32_92 = arith.constant 8 : i32
    %302 = arith.muli %c4_i32, %c8_i32_92 : i32
    %303 = tpu.assume_multiple %302, 8 : i32
    %304 = arith.index_cast %303 : i32 to index
    %c0_93 = arith.constant 0 : index
    %305 = vector.load %arg8[%304, %c0_93] : memref<64x1024xf32, #tpu.memory_space<vmem>>, vector<8x512xf32>
    %cst_94 = arith.constant dense<0.000000e+00> : vector<8x512xf32>
    %306 = tpu.matmul %262, %7, %cst_94 {dimension_numbers = #tpu.dot_dimension_numbers<[1], [0], [0], [1], [0, 0, 1, 1], [], []>} : vector<8x128xf32>, vector<128x512xf32>, vector<8x512xf32> -> vector<8x512xf32>
    %307 = arith.addf %305, %306 : vector<8x512xf32>
    %308 = vector.extract_strided_slice %307 {offsets = [0, 0], sizes = [8, 128], strides = [1, 1]} : vector<8x512xf32> to vector<8x128xf32>
    %cst_95 = arith.constant 0.000000e+00 : f32
    %309 = vector.broadcast %cst_95 : f32 to vector<8x128xf32>
    %310 = arith.subf %309, %308 : vector<8x128xf32>
    %311 = math.exp %310 : vector<8x128xf32>
    %cst_96 = arith.constant 1.000000e+00 : f32
    %312 = vector.broadcast %cst_96 : f32 to vector<8x128xf32>
    %313 = arith.addf %312, %311 : vector<8x128xf32>
    %314 = tpu.reciprocal %313 {approx = true} : vector<8x128xf32> -> vector<8x128xf32>
    %315 = vector.extract_strided_slice %307 {offsets = [0, 128], sizes = [8, 128], strides = [1, 1]} : vector<8x512xf32> to vector<8x128xf32>
    %cst_97 = arith.constant 0.000000e+00 : f32
    %316 = vector.broadcast %cst_97 : f32 to vector<8x128xf32>
    %317 = arith.subf %316, %315 : vector<8x128xf32>
    %318 = math.exp %317 : vector<8x128xf32>
    %cst_98 = arith.constant 1.000000e+00 : f32
    %319 = vector.broadcast %cst_98 : f32 to vector<8x128xf32>
    %320 = arith.addf %319, %318 : vector<8x128xf32>
    %321 = tpu.reciprocal %320 {approx = true} : vector<8x128xf32> -> vector<8x128xf32>
    %322 = vector.extract_strided_slice %307 {offsets = [0, 256], sizes = [8, 128], strides = [1, 1]} : vector<8x512xf32> to vector<8x128xf32>
    %323 = math.tanh %322 : vector<8x128xf32>
    %324 = vector.extract_strided_slice %307 {offsets = [0, 384], sizes = [8, 128], strides = [1, 1]} : vector<8x512xf32> to vector<8x128xf32>
    %cst_99 = arith.constant 0.000000e+00 : f32
    %325 = vector.broadcast %cst_99 : f32 to vector<8x128xf32>
    %326 = arith.subf %325, %324 : vector<8x128xf32>
    %327 = math.exp %326 : vector<8x128xf32>
    %cst_100 = arith.constant 1.000000e+00 : f32
    %328 = vector.broadcast %cst_100 : f32 to vector<8x128xf32>
    %329 = arith.addf %328, %327 : vector<8x128xf32>
    %330 = tpu.reciprocal %329 {approx = true} : vector<8x128xf32> -> vector<8x128xf32>
    %331 = arith.mulf %321, %260 : vector<8x128xf32>
    %332 = arith.mulf %314, %323 : vector<8x128xf32>
    %333 = arith.addf %331, %332 : vector<8x128xf32>
    %334 = math.tanh %333 : vector<8x128xf32>
    %335 = arith.mulf %330, %334 : vector<8x128xf32>
    %336 = arith.index_cast %303 : i32 to index
    %c0_101 = arith.constant 0 : index
    %337 = vector.load %arg9[%336, %c0_101] : memref<64x256xf32, #tpu.memory_space<vmem>>, vector<8x128xf32>
    tpu.vector_store %arg9[%336, %c0_101], %335 {strides = array<i32>} : memref<64x256xf32, #tpu.memory_space<vmem>>, vector<8x128xf32>,
    %c7_i32_102 = arith.constant 7 : i32
    %338 = arith.subi %c7_i32_102, %c4_i32 : i32
    %c8_i32_103 = arith.constant 8 : i32
    %339 = arith.muli %338, %c8_i32_103 : i32
    %340 = tpu.assume_multiple %339, 8 : i32
    %341 = arith.index_cast %340 : i32 to index
    %c512_104 = arith.constant 512 : index
    %342 = vector.load %arg8[%341, %c512_104] : memref<64x1024xf32, #tpu.memory_space<vmem>>, vector<8x512xf32>
    %cst_105 = arith.constant dense<0.000000e+00> : vector<8x512xf32>
    %343 = tpu.matmul %299, %8, %cst_105 {dimension_numbers = #tpu.dot_dimension_numbers<[1], [0], [0], [1], [0, 0, 1, 1], [], []>} : vector<8x128xf32>, vector<128x512xf32>, vector<8x512xf32> -> vector<8x512xf32>
    %344 = arith.addf %342, %343 : vector<8x512xf32>
    %345 = vector.extract_strided_slice %344 {offsets = [0, 0], sizes = [8, 128], strides = [1, 1]} : vector<8x512xf32> to vector<8x128xf32>
    %cst_106 = arith.constant 0.000000e+00 : f32
    %346 = vector.broadcast %cst_106 : f32 to vector<8x128xf32>
    %347 = arith.subf %346, %345 : vector<8x128xf32>
    %348 = math.exp %347 : vector<8x128xf32>
    %cst_107 = arith.constant 1.000000e+00 : f32
    %349 = vector.broadcast %cst_107 : f32 to vector<8x128xf32>
    %350 = arith.addf %349, %348 : vector<8x128xf32>
    %351 = tpu.reciprocal %350 {approx = true} : vector<8x128xf32> -> vector<8x128xf32>
    %352 = vector.extract_strided_slice %344 {offsets = [0, 128], sizes = [8, 128], strides = [1, 1]} : vector<8x512xf32> to vector<8x128xf32>
    %cst_108 = arith.constant 0.000000e+00 : f32
    %353 = vector.broadcast %cst_108 : f32 to vector<8x128xf32>
    %354 = arith.subf %353, %352 : vector<8x128xf32>
    %355 = math.exp %354 : vector<8x128xf32>
    %cst_109 = arith.constant 1.000000e+00 : f32
    %356 = vector.broadcast %cst_109 : f32 to vector<8x128xf32>
    %357 = arith.addf %356, %355 : vector<8x128xf32>
    %358 = tpu.reciprocal %357 {approx = true} : vector<8x128xf32> -> vector<8x128xf32>
    %359 = vector.extract_strided_slice %344 {offsets = [0, 256], sizes = [8, 128], strides = [1, 1]} : vector<8x512xf32> to vector<8x128xf32>
    %360 = math.tanh %359 : vector<8x128xf32>
    %361 = vector.extract_strided_slice %344 {offsets = [0, 384], sizes = [8, 128], strides = [1, 1]} : vector<8x512xf32> to vector<8x128xf32>
    %cst_110 = arith.constant 0.000000e+00 : f32
    %362 = vector.broadcast %cst_110 : f32 to vector<8x128xf32>
    %363 = arith.subf %362, %361 : vector<8x128xf32>
    %364 = math.exp %363 : vector<8x128xf32>
    %cst_111 = arith.constant 1.000000e+00 : f32
    %365 = vector.broadcast %cst_111 : f32 to vector<8x128xf32>
    %366 = arith.addf %365, %364 : vector<8x128xf32>
    %367 = tpu.reciprocal %366 {approx = true} : vector<8x128xf32> -> vector<8x128xf32>
    %368 = arith.mulf %358, %297 : vector<8x128xf32>
    %369 = arith.mulf %351, %360 : vector<8x128xf32>
    %370 = arith.addf %368, %369 : vector<8x128xf32>
    %371 = math.tanh %370 : vector<8x128xf32>
    %372 = arith.mulf %367, %371 : vector<8x128xf32>
    %373 = arith.index_cast %340 : i32 to index
    %c128_112 = arith.constant 128 : index
    %374 = vector.load %arg9[%373, %c128_112] : memref<64x256xf32, #tpu.memory_space<vmem>>, vector<8x128xf32>
    tpu.vector_store %arg9[%373, %c128_112], %372 {strides = array<i32>} : memref<64x256xf32, #tpu.memory_space<vmem>>, vector<8x128xf32>,
    %c5_i32 = arith.constant 5 : i32
    %c8_i32_113 = arith.constant 8 : i32
    %375 = arith.muli %c5_i32, %c8_i32_113 : i32
    %376 = tpu.assume_multiple %375, 8 : i32
    %377 = arith.index_cast %376 : i32 to index
    %c0_114 = arith.constant 0 : index
    %378 = vector.load %arg8[%377, %c0_114] : memref<64x1024xf32, #tpu.memory_space<vmem>>, vector<8x512xf32>
    %cst_115 = arith.constant dense<0.000000e+00> : vector<8x512xf32>
    %379 = tpu.matmul %335, %7, %cst_115 {dimension_numbers = #tpu.dot_dimension_numbers<[1], [0], [0], [1], [0, 0, 1, 1], [], []>} : vector<8x128xf32>, vector<128x512xf32>, vector<8x512xf32> -> vector<8x512xf32>
    %380 = arith.addf %378, %379 : vector<8x512xf32>
    %381 = vector.extract_strided_slice %380 {offsets = [0, 0], sizes = [8, 128], strides = [1, 1]} : vector<8x512xf32> to vector<8x128xf32>
    %cst_116 = arith.constant 0.000000e+00 : f32
    %382 = vector.broadcast %cst_116 : f32 to vector<8x128xf32>
    %383 = arith.subf %382, %381 : vector<8x128xf32>
    %384 = math.exp %383 : vector<8x128xf32>
    %cst_117 = arith.constant 1.000000e+00 : f32
    %385 = vector.broadcast %cst_117 : f32 to vector<8x128xf32>
    %386 = arith.addf %385, %384 : vector<8x128xf32>
    %387 = tpu.reciprocal %386 {approx = true} : vector<8x128xf32> -> vector<8x128xf32>
    %388 = vector.extract_strided_slice %380 {offsets = [0, 128], sizes = [8, 128], strides = [1, 1]} : vector<8x512xf32> to vector<8x128xf32>
    %cst_118 = arith.constant 0.000000e+00 : f32
    %389 = vector.broadcast %cst_118 : f32 to vector<8x128xf32>
    %390 = arith.subf %389, %388 : vector<8x128xf32>
    %391 = math.exp %390 : vector<8x128xf32>
    %cst_119 = arith.constant 1.000000e+00 : f32
    %392 = vector.broadcast %cst_119 : f32 to vector<8x128xf32>
    %393 = arith.addf %392, %391 : vector<8x128xf32>
    %394 = tpu.reciprocal %393 {approx = true} : vector<8x128xf32> -> vector<8x128xf32>
    %395 = vector.extract_strided_slice %380 {offsets = [0, 256], sizes = [8, 128], strides = [1, 1]} : vector<8x512xf32> to vector<8x128xf32>
    %396 = math.tanh %395 : vector<8x128xf32>
    %397 = vector.extract_strided_slice %380 {offsets = [0, 384], sizes = [8, 128], strides = [1, 1]} : vector<8x512xf32> to vector<8x128xf32>
    %cst_120 = arith.constant 0.000000e+00 : f32
    %398 = vector.broadcast %cst_120 : f32 to vector<8x128xf32>
    %399 = arith.subf %398, %397 : vector<8x128xf32>
    %400 = math.exp %399 : vector<8x128xf32>
    %cst_121 = arith.constant 1.000000e+00 : f32
    %401 = vector.broadcast %cst_121 : f32 to vector<8x128xf32>
    %402 = arith.addf %401, %400 : vector<8x128xf32>
    %403 = tpu.reciprocal %402 {approx = true} : vector<8x128xf32> -> vector<8x128xf32>
    %404 = arith.mulf %394, %333 : vector<8x128xf32>
    %405 = arith.mulf %387, %396 : vector<8x128xf32>
    %406 = arith.addf %404, %405 : vector<8x128xf32>
    %407 = math.tanh %406 : vector<8x128xf32>
    %408 = arith.mulf %403, %407 : vector<8x128xf32>
    %409 = arith.index_cast %376 : i32 to index
    %c0_122 = arith.constant 0 : index
    %410 = vector.load %arg9[%409, %c0_122] : memref<64x256xf32, #tpu.memory_space<vmem>>, vector<8x128xf32>
    tpu.vector_store %arg9[%409, %c0_122], %408 {strides = array<i32>} : memref<64x256xf32, #tpu.memory_space<vmem>>, vector<8x128xf32>,
    %c7_i32_123 = arith.constant 7 : i32
    %411 = arith.subi %c7_i32_123, %c5_i32 : i32
    %c8_i32_124 = arith.constant 8 : i32
    %412 = arith.muli %411, %c8_i32_124 : i32
    %413 = tpu.assume_multiple %412, 8 : i32
    %414 = arith.index_cast %413 : i32 to index
    %c512_125 = arith.constant 512 : index
    %415 = vector.load %arg8[%414, %c512_125] : memref<64x1024xf32, #tpu.memory_space<vmem>>, vector<8x512xf32>
    %cst_126 = arith.constant dense<0.000000e+00> : vector<8x512xf32>
    %416 = tpu.matmul %372, %8, %cst_126 {dimension_numbers = #tpu.dot_dimension_numbers<[1], [0], [0], [1], [0, 0, 1, 1], [], []>} : vector<8x128xf32>, vector<128x512xf32>, vector<8x512xf32> -> vector<8x512xf32>
    %417 = arith.addf %415, %416 : vector<8x512xf32>
    %418 = vector.extract_strided_slice %417 {offsets = [0, 0], sizes = [8, 128], strides = [1, 1]} : vector<8x512xf32> to vector<8x128xf32>
    %cst_127 = arith.constant 0.000000e+00 : f32
    %419 = vector.broadcast %cst_127 : f32 to vector<8x128xf32>
    %420 = arith.subf %419, %418 : vector<8x128xf32>
    %421 = math.exp %420 : vector<8x128xf32>
    %cst_128 = arith.constant 1.000000e+00 : f32
    %422 = vector.broadcast %cst_128 : f32 to vector<8x128xf32>
    %423 = arith.addf %422, %421 : vector<8x128xf32>
    %424 = tpu.reciprocal %423 {approx = true} : vector<8x128xf32> -> vector<8x128xf32>
    %425 = vector.extract_strided_slice %417 {offsets = [0, 128], sizes = [8, 128], strides = [1, 1]} : vector<8x512xf32> to vector<8x128xf32>
    %cst_129 = arith.constant 0.000000e+00 : f32
    %426 = vector.broadcast %cst_129 : f32 to vector<8x128xf32>
    %427 = arith.subf %426, %425 : vector<8x128xf32>
    %428 = math.exp %427 : vector<8x128xf32>
    %cst_130 = arith.constant 1.000000e+00 : f32
    %429 = vector.broadcast %cst_130 : f32 to vector<8x128xf32>
    %430 = arith.addf %429, %428 : vector<8x128xf32>
    %431 = tpu.reciprocal %430 {approx = true} : vector<8x128xf32> -> vector<8x128xf32>
    %432 = vector.extract_strided_slice %417 {offsets = [0, 256], sizes = [8, 128], strides = [1, 1]} : vector<8x512xf32> to vector<8x128xf32>
    %433 = math.tanh %432 : vector<8x128xf32>
    %434 = vector.extract_strided_slice %417 {offsets = [0, 384], sizes = [8, 128], strides = [1, 1]} : vector<8x512xf32> to vector<8x128xf32>
    %cst_131 = arith.constant 0.000000e+00 : f32
    %435 = vector.broadcast %cst_131 : f32 to vector<8x128xf32>
    %436 = arith.subf %435, %434 : vector<8x128xf32>
    %437 = math.exp %436 : vector<8x128xf32>
    %cst_132 = arith.constant 1.000000e+00 : f32
    %438 = vector.broadcast %cst_132 : f32 to vector<8x128xf32>
    %439 = arith.addf %438, %437 : vector<8x128xf32>
    %440 = tpu.reciprocal %439 {approx = true} : vector<8x128xf32> -> vector<8x128xf32>
    %441 = arith.mulf %431, %370 : vector<8x128xf32>
    %442 = arith.mulf %424, %433 : vector<8x128xf32>
    %443 = arith.addf %441, %442 : vector<8x128xf32>
    %444 = math.tanh %443 : vector<8x128xf32>
    %445 = arith.mulf %440, %444 : vector<8x128xf32>
    %446 = arith.index_cast %413 : i32 to index
    %c128_133 = arith.constant 128 : index
    %447 = vector.load %arg9[%446, %c128_133] : memref<64x256xf32, #tpu.memory_space<vmem>>, vector<8x128xf32>
    tpu.vector_store %arg9[%446, %c128_133], %445 {strides = array<i32>} : memref<64x256xf32, #tpu.memory_space<vmem>>, vector<8x128xf32>,
    %c6_i32 = arith.constant 6 : i32
    %c8_i32_134 = arith.constant 8 : i32
    %448 = arith.muli %c6_i32, %c8_i32_134 : i32
    %449 = tpu.assume_multiple %448, 8 : i32
    %450 = arith.index_cast %449 : i32 to index
    %c0_135 = arith.constant 0 : index
    %451 = vector.load %arg8[%450, %c0_135] : memref<64x1024xf32, #tpu.memory_space<vmem>>, vector<8x512xf32>
    %cst_136 = arith.constant dense<0.000000e+00> : vector<8x512xf32>
    %452 = tpu.matmul %408, %7, %cst_136 {dimension_numbers = #tpu.dot_dimension_numbers<[1], [0], [0], [1], [0, 0, 1, 1], [], []>} : vector<8x128xf32>, vector<128x512xf32>, vector<8x512xf32> -> vector<8x512xf32>
    %453 = arith.addf %451, %452 : vector<8x512xf32>
    %454 = vector.extract_strided_slice %453 {offsets = [0, 0], sizes = [8, 128], strides = [1, 1]} : vector<8x512xf32> to vector<8x128xf32>
    %cst_137 = arith.constant 0.000000e+00 : f32
    %455 = vector.broadcast %cst_137 : f32 to vector<8x128xf32>
    %456 = arith.subf %455, %454 : vector<8x128xf32>
    %457 = math.exp %456 : vector<8x128xf32>
    %cst_138 = arith.constant 1.000000e+00 : f32
    %458 = vector.broadcast %cst_138 : f32 to vector<8x128xf32>
    %459 = arith.addf %458, %457 : vector<8x128xf32>
    %460 = tpu.reciprocal %459 {approx = true} : vector<8x128xf32> -> vector<8x128xf32>
    %461 = vector.extract_strided_slice %453 {offsets = [0, 128], sizes = [8, 128], strides = [1, 1]} : vector<8x512xf32> to vector<8x128xf32>
    %cst_139 = arith.constant 0.000000e+00 : f32
    %462 = vector.broadcast %cst_139 : f32 to vector<8x128xf32>
    %463 = arith.subf %462, %461 : vector<8x128xf32>
    %464 = math.exp %463 : vector<8x128xf32>
    %cst_140 = arith.constant 1.000000e+00 : f32
    %465 = vector.broadcast %cst_140 : f32 to vector<8x128xf32>
    %466 = arith.addf %465, %464 : vector<8x128xf32>
    %467 = tpu.reciprocal %466 {approx = true} : vector<8x128xf32> -> vector<8x128xf32>
    %468 = vector.extract_strided_slice %453 {offsets = [0, 256], sizes = [8, 128], strides = [1, 1]} : vector<8x512xf32> to vector<8x128xf32>
    %469 = math.tanh %468 : vector<8x128xf32>
    %470 = vector.extract_strided_slice %453 {offsets = [0, 384], sizes = [8, 128], strides = [1, 1]} : vector<8x512xf32> to vector<8x128xf32>
    %cst_141 = arith.constant 0.000000e+00 : f32
    %471 = vector.broadcast %cst_141 : f32 to vector<8x128xf32>
    %472 = arith.subf %471, %470 : vector<8x128xf32>
    %473 = math.exp %472 : vector<8x128xf32>
    %cst_142 = arith.constant 1.000000e+00 : f32
    %474 = vector.broadcast %cst_142 : f32 to vector<8x128xf32>
    %475 = arith.addf %474, %473 : vector<8x128xf32>
    %476 = tpu.reciprocal %475 {approx = true} : vector<8x128xf32> -> vector<8x128xf32>
    %477 = arith.mulf %467, %406 : vector<8x128xf32>
    %478 = arith.mulf %460, %469 : vector<8x128xf32>
    %479 = arith.addf %477, %478 : vector<8x128xf32>
    %480 = math.tanh %479 : vector<8x128xf32>
    %481 = arith.mulf %476, %480 : vector<8x128xf32>
    %482 = arith.index_cast %449 : i32 to index
    %c0_143 = arith.constant 0 : index
    %483 = vector.load %arg9[%482, %c0_143] : memref<64x256xf32, #tpu.memory_space<vmem>>, vector<8x128xf32>
    tpu.vector_store %arg9[%482, %c0_143], %481 {strides = array<i32>} : memref<64x256xf32, #tpu.memory_space<vmem>>, vector<8x128xf32>,
    %c7_i32_144 = arith.constant 7 : i32
    %484 = arith.subi %c7_i32_144, %c6_i32 : i32
    %c8_i32_145 = arith.constant 8 : i32
    %485 = arith.muli %484, %c8_i32_145 : i32
    %486 = tpu.assume_multiple %485, 8 : i32
    %487 = arith.index_cast %486 : i32 to index
    %c512_146 = arith.constant 512 : index
    %488 = vector.load %arg8[%487, %c512_146] : memref<64x1024xf32, #tpu.memory_space<vmem>>, vector<8x512xf32>
    %cst_147 = arith.constant dense<0.000000e+00> : vector<8x512xf32>
    %489 = tpu.matmul %445, %8, %cst_147 {dimension_numbers = #tpu.dot_dimension_numbers<[1], [0], [0], [1], [0, 0, 1, 1], [], []>} : vector<8x128xf32>, vector<128x512xf32>, vector<8x512xf32> -> vector<8x512xf32>
    %490 = arith.addf %488, %489 : vector<8x512xf32>
    %491 = vector.extract_strided_slice %490 {offsets = [0, 0], sizes = [8, 128], strides = [1, 1]} : vector<8x512xf32> to vector<8x128xf32>
    %cst_148 = arith.constant 0.000000e+00 : f32
    %492 = vector.broadcast %cst_148 : f32 to vector<8x128xf32>
    %493 = arith.subf %492, %491 : vector<8x128xf32>
    %494 = math.exp %493 : vector<8x128xf32>
    %cst_149 = arith.constant 1.000000e+00 : f32
    %495 = vector.broadcast %cst_149 : f32 to vector<8x128xf32>
    %496 = arith.addf %495, %494 : vector<8x128xf32>
    %497 = tpu.reciprocal %496 {approx = true} : vector<8x128xf32> -> vector<8x128xf32>
    %498 = vector.extract_strided_slice %490 {offsets = [0, 128], sizes = [8, 128], strides = [1, 1]} : vector<8x512xf32> to vector<8x128xf32>
    %cst_150 = arith.constant 0.000000e+00 : f32
    %499 = vector.broadcast %cst_150 : f32 to vector<8x128xf32>
    %500 = arith.subf %499, %498 : vector<8x128xf32>
    %501 = math.exp %500 : vector<8x128xf32>
    %cst_151 = arith.constant 1.000000e+00 : f32
    %502 = vector.broadcast %cst_151 : f32 to vector<8x128xf32>
    %503 = arith.addf %502, %501 : vector<8x128xf32>
    %504 = tpu.reciprocal %503 {approx = true} : vector<8x128xf32> -> vector<8x128xf32>
    %505 = vector.extract_strided_slice %490 {offsets = [0, 256], sizes = [8, 128], strides = [1, 1]} : vector<8x512xf32> to vector<8x128xf32>
    %506 = math.tanh %505 : vector<8x128xf32>
    %507 = vector.extract_strided_slice %490 {offsets = [0, 384], sizes = [8, 128], strides = [1, 1]} : vector<8x512xf32> to vector<8x128xf32>
    %cst_152 = arith.constant 0.000000e+00 : f32
    %508 = vector.broadcast %cst_152 : f32 to vector<8x128xf32>
    %509 = arith.subf %508, %507 : vector<8x128xf32>
    %510 = math.exp %509 : vector<8x128xf32>
    %cst_153 = arith.constant 1.000000e+00 : f32
    %511 = vector.broadcast %cst_153 : f32 to vector<8x128xf32>
    %512 = arith.addf %511, %510 : vector<8x128xf32>
    %513 = tpu.reciprocal %512 {approx = true} : vector<8x128xf32> -> vector<8x128xf32>
    %514 = arith.mulf %504, %443 : vector<8x128xf32>
    %515 = arith.mulf %497, %506 : vector<8x128xf32>
    %516 = arith.addf %514, %515 : vector<8x128xf32>
    %517 = math.tanh %516 : vector<8x128xf32>
    %518 = arith.mulf %513, %517 : vector<8x128xf32>
    %519 = arith.index_cast %486 : i32 to index
    %c128_154 = arith.constant 128 : index
    %520 = vector.load %arg9[%519, %c128_154] : memref<64x256xf32, #tpu.memory_space<vmem>>, vector<8x128xf32>
    tpu.vector_store %arg9[%519, %c128_154], %518 {strides = array<i32>} : memref<64x256xf32, #tpu.memory_space<vmem>>, vector<8x128xf32>,
    %c7_i32_155 = arith.constant 7 : i32
    %c8_i32_156 = arith.constant 8 : i32
    %521 = arith.muli %c7_i32_155, %c8_i32_156 : i32
    %522 = tpu.assume_multiple %521, 8 : i32
    %523 = arith.index_cast %522 : i32 to index
    %c0_157 = arith.constant 0 : index
    %524 = vector.load %arg8[%523, %c0_157] : memref<64x1024xf32, #tpu.memory_space<vmem>>, vector<8x512xf32>
    %cst_158 = arith.constant dense<0.000000e+00> : vector<8x512xf32>
    %525 = tpu.matmul %481, %7, %cst_158 {dimension_numbers = #tpu.dot_dimension_numbers<[1], [0], [0], [1], [0, 0, 1, 1], [], []>} : vector<8x128xf32>, vector<128x512xf32>, vector<8x512xf32> -> vector<8x512xf32>
    %526 = arith.addf %524, %525 : vector<8x512xf32>
    %527 = vector.extract_strided_slice %526 {offsets = [0, 0], sizes = [8, 128], strides = [1, 1]} : vector<8x512xf32> to vector<8x128xf32>
    %cst_159 = arith.constant 0.000000e+00 : f32
    %528 = vector.broadcast %cst_159 : f32 to vector<8x128xf32>
    %529 = arith.subf %528, %527 : vector<8x128xf32>
    %530 = math.exp %529 : vector<8x128xf32>
    %cst_160 = arith.constant 1.000000e+00 : f32
    %531 = vector.broadcast %cst_160 : f32 to vector<8x128xf32>
    %532 = arith.addf %531, %530 : vector<8x128xf32>
    %533 = tpu.reciprocal %532 {approx = true} : vector<8x128xf32> -> vector<8x128xf32>
    %534 = vector.extract_strided_slice %526 {offsets = [0, 128], sizes = [8, 128], strides = [1, 1]} : vector<8x512xf32> to vector<8x128xf32>
    %cst_161 = arith.constant 0.000000e+00 : f32
    %535 = vector.broadcast %cst_161 : f32 to vector<8x128xf32>
    %536 = arith.subf %535, %534 : vector<8x128xf32>
    %537 = math.exp %536 : vector<8x128xf32>
    %cst_162 = arith.constant 1.000000e+00 : f32
    %538 = vector.broadcast %cst_162 : f32 to vector<8x128xf32>
    %539 = arith.addf %538, %537 : vector<8x128xf32>
    %540 = tpu.reciprocal %539 {approx = true} : vector<8x128xf32> -> vector<8x128xf32>
    %541 = vector.extract_strided_slice %526 {offsets = [0, 256], sizes = [8, 128], strides = [1, 1]} : vector<8x512xf32> to vector<8x128xf32>
    %542 = math.tanh %541 : vector<8x128xf32>
    %543 = vector.extract_strided_slice %526 {offsets = [0, 384], sizes = [8, 128], strides = [1, 1]} : vector<8x512xf32> to vector<8x128xf32>
    %cst_163 = arith.constant 0.000000e+00 : f32
    %544 = vector.broadcast %cst_163 : f32 to vector<8x128xf32>
    %545 = arith.subf %544, %543 : vector<8x128xf32>
    %546 = math.exp %545 : vector<8x128xf32>
    %cst_164 = arith.constant 1.000000e+00 : f32
    %547 = vector.broadcast %cst_164 : f32 to vector<8x128xf32>
    %548 = arith.addf %547, %546 : vector<8x128xf32>
    %549 = tpu.reciprocal %548 {approx = true} : vector<8x128xf32> -> vector<8x128xf32>
    %550 = arith.mulf %540, %479 : vector<8x128xf32>
    %551 = arith.mulf %533, %542 : vector<8x128xf32>
    %552 = arith.addf %550, %551 : vector<8x128xf32>
    %553 = math.tanh %552 : vector<8x128xf32>
    %554 = arith.mulf %549, %553 : vector<8x128xf32>
    %555 = arith.index_cast %522 : i32 to index
    %c0_165 = arith.constant 0 : index
    %556 = vector.load %arg9[%555, %c0_165] : memref<64x256xf32, #tpu.memory_space<vmem>>, vector<8x128xf32>
    tpu.vector_store %arg9[%555, %c0_165], %554 {strides = array<i32>} : memref<64x256xf32, #tpu.memory_space<vmem>>, vector<8x128xf32>,
    %c7_i32_166 = arith.constant 7 : i32
    %557 = arith.subi %c7_i32_166, %c7_i32_155 : i32
    %c8_i32_167 = arith.constant 8 : i32
    %558 = arith.muli %557, %c8_i32_167 : i32
    %559 = tpu.assume_multiple %558, 8 : i32
    %560 = arith.index_cast %559 : i32 to index
    %c512_168 = arith.constant 512 : index
    %561 = vector.load %arg8[%560, %c512_168] : memref<64x1024xf32, #tpu.memory_space<vmem>>, vector<8x512xf32>
    %cst_169 = arith.constant dense<0.000000e+00> : vector<8x512xf32>
    %562 = tpu.matmul %518, %8, %cst_169 {dimension_numbers = #tpu.dot_dimension_numbers<[1], [0], [0], [1], [0, 0, 1, 1], [], []>} : vector<8x128xf32>, vector<128x512xf32>, vector<8x512xf32> -> vector<8x512xf32>
    %563 = arith.addf %561, %562 : vector<8x512xf32>
    %564 = vector.extract_strided_slice %563 {offsets = [0, 0], sizes = [8, 128], strides = [1, 1]} : vector<8x512xf32> to vector<8x128xf32>
    %cst_170 = arith.constant 0.000000e+00 : f32
    %565 = vector.broadcast %cst_170 : f32 to vector<8x128xf32>
    %566 = arith.subf %565, %564 : vector<8x128xf32>
    %567 = math.exp %566 : vector<8x128xf32>
    %cst_171 = arith.constant 1.000000e+00 : f32
    %568 = vector.broadcast %cst_171 : f32 to vector<8x128xf32>
    %569 = arith.addf %568, %567 : vector<8x128xf32>
    %570 = tpu.reciprocal %569 {approx = true} : vector<8x128xf32> -> vector<8x128xf32>
    %571 = vector.extract_strided_slice %563 {offsets = [0, 128], sizes = [8, 128], strides = [1, 1]} : vector<8x512xf32> to vector<8x128xf32>
    %cst_172 = arith.constant 0.000000e+00 : f32
    %572 = vector.broadcast %cst_172 : f32 to vector<8x128xf32>
    %573 = arith.subf %572, %571 : vector<8x128xf32>
    %574 = math.exp %573 : vector<8x128xf32>
    %cst_173 = arith.constant 1.000000e+00 : f32
    %575 = vector.broadcast %cst_173 : f32 to vector<8x128xf32>
    %576 = arith.addf %575, %574 : vector<8x128xf32>
    %577 = tpu.reciprocal %576 {approx = true} : vector<8x128xf32> -> vector<8x128xf32>
    %578 = vector.extract_strided_slice %563 {offsets = [0, 256], sizes = [8, 128], strides = [1, 1]} : vector<8x512xf32> to vector<8x128xf32>
    %579 = math.tanh %578 : vector<8x128xf32>
    %580 = vector.extract_strided_slice %563 {offsets = [0, 384], sizes = [8, 128], strides = [1, 1]} : vector<8x512xf32> to vector<8x128xf32>
    %cst_174 = arith.constant 0.000000e+00 : f32
    %581 = vector.broadcast %cst_174 : f32 to vector<8x128xf32>
    %582 = arith.subf %581, %580 : vector<8x128xf32>
    %583 = math.exp %582 : vector<8x128xf32>
    %cst_175 = arith.constant 1.000000e+00 : f32
    %584 = vector.broadcast %cst_175 : f32 to vector<8x128xf32>
    %585 = arith.addf %584, %583 : vector<8x128xf32>
    %586 = tpu.reciprocal %585 {approx = true} : vector<8x128xf32> -> vector<8x128xf32>
    %587 = arith.mulf %577, %516 : vector<8x128xf32>
    %588 = arith.mulf %570, %579 : vector<8x128xf32>
    %589 = arith.addf %587, %588 : vector<8x128xf32>
    %590 = math.tanh %589 : vector<8x128xf32>
    %591 = arith.mulf %586, %590 : vector<8x128xf32>
    %592 = arith.index_cast %559 : i32 to index
    %c128_176 = arith.constant 128 : index
    %593 = vector.load %arg9[%592, %c128_176] : memref<64x256xf32, #tpu.memory_space<vmem>>, vector<8x128xf32>
    tpu.vector_store %arg9[%592, %c128_176], %591 {strides = array<i32>} : memref<64x256xf32, #tpu.memory_space<vmem>>, vector<8x128xf32>,
    %c8_i32_177 = arith.constant 8 : i32
    %c0_178 = arith.constant 0 : index
    %c0_179 = arith.constant 0 : index
    %594 = vector.load %arg9[%c0_178, %c0_179] : memref<64x256xf32, #tpu.memory_space<vmem>>, vector<64x256xf32>
    %c0_180 = arith.constant 0 : index
    %c0_181 = arith.constant 0 : index
    %595 = vector.load %arg5[%c0_180, %c0_181] : memref<256x128xf32, #tpu.memory_space<vmem>>, vector<256x128xf32>
    %cst_182 = arith.constant dense<0.000000e+00> : vector<64x128xf32>
    %596 = tpu.matmul %594, %595, %cst_182 {dimension_numbers = #tpu.dot_dimension_numbers<[1], [0], [0], [1], [0, 0, 1, 1], [], []>} : vector<64x256xf32>, vector<256x128xf32>, vector<64x128xf32> -> vector<64x128xf32>
    %c0_183 = arith.constant 0 : index
    %c0_184 = arith.constant 0 : index
    %597 = vector.load %arg6[%c0_183, %c0_184] : memref<1x128xf32, #tpu.memory_space<vmem>>, vector<1x128xf32>
    %598 = vector.broadcast %597 : vector<1x128xf32> to vector<64x128xf32>
    %599 = arith.addf %596, %598 : vector<64x128xf32>
    %c0_185 = arith.constant 0 : index
    %c0_186 = arith.constant 0 : index
    %600 = vector.load %arg7[%c0_185, %c0_186] : memref<64x128xf32, #tpu.memory_space<vmem>>, vector<64x128xf32>
    tpu.vector_store %arg7[%c0_185, %c0_186], %599 {strides = array<i32>} : memref<64x128xf32, #tpu.memory_space<vmem>>, vector<64x128xf32>,
    return
  }
}

</mosaic_0001>

<bundles_post_ra>
// kernel: tagger_lstm_forward.1
= control target key start
LH: loop header
LB: loop body
LE: loop exit
PB: predicated region body
PF: predicated region fallthrough
CT: control target
= control target key end

     0   :  { %vm84_vm0 = vcmask 261120   ;;  %s6983_s1 = inlined_call_operand.vmem [shape: f32[32,1024], index: 1, kind: input, shape index: {}]   ;;  %s6984_s0 = inlined_call_operand.vmem [shape: f32[64,32], index: 0, kind: input, shape index: {}]   ;;  %s6985_s2 = inlined_call_operand.vmem [shape: f32[128,512], index: 2, kind: input, shape index: {}]   ;;  %s6986_s3 = inlined_call_operand.vmem [shape: f32[128,512], index: 3, kind: input, shape index: {}]   ;;  %s6987_s4 = inlined_call_operand.vmem [shape: f32[1,1024], index: 4, kind: input, shape index: {}]   ;;  %s6988_s5 = inlined_call_operand.vmem [shape: f32[256,128], index: 5, kind: input, shape index: {}]   ;;  %s6989_s6 = inlined_call_operand.vmem [shape: f32[1,128], index: 6, kind: input, shape index: {}]   ;;  %s6990_s7 = inlined_call_operand.vmem [shape: f32[64,128], index: 7, kind: output, shape index: {}]  }
   0x1   :  { %v58_v0 = vld [vmem:[%s6983_s1 + $0xc0] sm:$0xff]  ;;  %v59_v1 = vld [vmem:[%s6983_s1 + $0xc8] sm:$0xff]  ;;  %v3256_v9 = vld [vmem:[%s6984_s0 + $0x18] sm:$0xff] }
   0x2   :  { %v50_v2 = vld [vmem:[%s6983_s1 + $0x80] sm:$0xff]  ;;  %121 = vmatpush.msra.mxu0 %v58_v0  ;;  %2661 = vmatpush.msra.mxu2 %v58_v0  ;;  %v51_v3 = vld [vmem:[%s6983_s1 + $0x88] sm:$0xff]  ;;  %v61_v10 = vld [vmem:[%s6983_s1 + $0xd8] sm:$0xff] }
   0x3   :  { %162 = vmatpush.msra.mxu1 %v59_v1  ;;  %2665 = vmatpush.msra.mxu3 %v59_v1  ;;  %v42_v4 = vld [vmem:[%s6983_s1 + $0x40] sm:$0xff]  ;;  %v43_v5 = vld [vmem:[%s6983_s1 + $0x48] sm:$0xff]  ;;  %v60_v11 = vld [vmem:[%s6983_s1 + $0xd0] sm:$0xff] }
   0x4   :  { %122 = vmatpush.msra.mxu0 %v50_v2  ;;  %2662 = vmatpush.msra.mxu2 %v50_v2  ;;  %v34_v6 = vld [vmem:[%s6983_s1] sm:$0xff]  ;;  %v35_v7 = vld [vmem:[%s6983_s1 + $0x8] sm:$0xff]  ;;  %v53_v14 = vld [vmem:[%s6983_s1 + $0x98] sm:$0xff] }
   0x5   :  { %163 = vmatpush.msra.mxu1 %v51_v3  ;;  %2666 = vmatpush.msra.mxu3 %v51_v3  ;;  %v3251_v8 = vld [vmem:[%s6984_s0] sm:$0xff]  ;;  %v63_v13 = vld [vmem:[%s6983_s1 + $0xe8] sm:$0xff]  ;;  %v52_v15 = vld [vmem:[%s6983_s1 + $0x90] sm:$0xff] }
   0x6   :  { %123 = vmatpush.msra.mxu0 %v42_v4  ;;  %2663 = vmatpush.msra.mxu2 %v42_v4  ;;  %v62_v12 = vld [vmem:[%s6983_s1 + $0xe0] sm:$0xff]  ;;  %v55_v17 = vld [vmem:[%s6983_s1 + $0xa8] sm:$0xff]  ;;  %v45_v18 = vld [vmem:[%s6983_s1 + $0x58] sm:$0xff] }
   0x7   :  { %164 = vmatpush.msra.mxu1 %v43_v5  ;;  %2667 = vmatpush.msra.mxu3 %v43_v5  ;;  %v54_v16 = vld [vmem:[%s6983_s1 + $0xa0] sm:$0xff]  ;;  %v44_v19 = vld [vmem:[%s6983_s1 + $0x50] sm:$0xff]  ;;  %v47_v21 = vld [vmem:[%s6983_s1 + $0x68] sm:$0xff] }
   0x8   :  { %124 = vmatpush.msra.mxu0 %v34_v6  ;;  %2664 = vmatpush.msra.mxu2 %v34_v6  ;;  %v46_v20 = vld [vmem:[%s6983_s1 + $0x60] sm:$0xff]  ;;  %v3305_v22 = vld [vmem:[%s6984_s0 + $0x8] sm:$0xff]  ;;  %v37_v26 = vld [vmem:[%s6983_s1 + $0x18] sm:$0xff] }
   0x9   :  { %165 = vmatpush.msra.mxu1 %v35_v7  ;;  %2668 = vmatpush.msra.mxu3 %v35_v7  ;;  %v3310_v23 = vld [vmem:[%s6984_s0 + $0x20] sm:$0xff]  ;;  %v39_v25 = vld [vmem:[%s6983_s1 + $0x28] sm:$0xff]  ;;  %v36_v27 = vld [vmem:[%s6983_s1 + $0x10] sm:$0xff] }
   0xa   :  { %2597 = vmatmul.msk.f32.vlgmr.msra.gmra.mxu0 %vm84_vm0, %v3251_v8  ;;  %2600 = vmatmul.msk.f32.vlgmr.msra.gmra.mxu2 %vm84_vm0, %v3256_v9  ;;  %v38_v24 = vld [vmem:[%s6983_s1 + $0x20] sm:$0xff]  ;;  %v65_v28 = vld [vmem:[%s6983_s1 + $0xf8] sm:$0xff]  ;;  %v64_v29 = vld [vmem:[%s6983_s1 + $0xf0] sm:$0xff] }
   0xb   :  { %2605 = vmatmul.msk.f32.vlgmr.msra.gmra.mxu1 %vm84_vm0, %v3251_v8  ;;  %2608 = vmatmul.msk.f32.vlgmr.msra.gmra.mxu3 %vm84_vm0, %v3256_v9  ;;  %v3341_v30 = vld [vmem:[%s6984_s0 + $0x10] sm:$0xff]  ;;  %v3346_v31 = vld [vmem:[%s6984_s0 + $0x28] sm:$0xff]  ;;  %v57_v33 = vld [vmem:[%s6983_s1 + $0xb8] sm:$0xff] }
   0xc   :  { %244 = vmatpush.msrb.mxu3 %v61_v10  ;;  %203 = vmatpush.msrb.mxu2 %v60_v11  ;;  %v3359_v32 = vld [vmem:[%s6984_s0 + $0x30] sm:$0xff]  ;;  %v3375_v34 = vld [vmem:[%s6985_s2 + $0x1e0] sm:$0xff]  ;;  %v3380_v35 = vld [vmem:[%s6985_s2 + $0x1e8] sm:$0xff] }
   0xd   :  { %285 = vmatpush.msrb.mxu0 %v62_v12  ;;  %326 = vmatpush.msrb.mxu1 %v63_v13  ;;  %v56_v36 = vld [vmem:[%s6983_s1 + $0xb0] sm:$0xff]  ;;  %v3389_v37 = vld [vmem:[%s6985_s2 + $0x1c0] sm:$0xff]  ;;  %v3394_v38 = vld [vmem:[%s6985_s2 + $0x1c8] sm:$0xff] }
   0xe   :  { %245 = vmatpush.msrb.mxu3 %v53_v14  ;;  %204 = vmatpush.msrb.mxu2 %v52_v15  ;;  %v3400_v39 = vld [vmem:[%s6985_s2 + $0x1a0] sm:$0xff]  ;;  %v3406_v40 = vld [vmem:[%s6985_s2 + $0x1a8] sm:$0xff]  ;;  %v3411_v41 = vld [vmem:[%s6984_s0 + $0x38] sm:$0xff] }
   0xf   :  { %286 = vmatpush.msrb.mxu0 %v54_v16  ;;  %327 = vmatpush.msrb.mxu1 %v55_v17  ;;  %v3419_v42 = vld [vmem:[%s6985_s2 + $0x180] sm:$0xff]  ;;  %v3424_v43 = vld [vmem:[%s6985_s2 + $0x188] sm:$0xff]  ;;  %v49_v52 = vld [vmem:[%s6983_s1 + $0x78] sm:$0xff] }
  0x10   :  { %246 = vmatpush.msrb.mxu3 %v45_v18  ;;  %205 = vmatpush.msrb.mxu2 %v44_v19  ;;  %v3437_v44 = vld [vmem:[%s6985_s2 + $0x160] sm:$0xff]  ;;  %v3442_v45 = vld [vmem:[%s6985_s2 + $0x168] sm:$0xff]  ;;  %v48_v53 = vld [vmem:[%s6983_s1 + $0x70] sm:$0xff]  ;;  %v6991_v18 = vmov 0.0  }
  0x11   :  { %287 = vmatpush.msrb.mxu0 %v46_v20  ;;  %328 = vmatpush.msrb.mxu1 %v47_v21  ;;  %v3449_v46 = vld [vmem:[%s6985_s2 + $0x140] sm:$0xff]  ;;  %v3454_v47 = vld [vmem:[%s6985_s2 + $0x148] sm:$0xff]  ;;  %v41_v2 = vld [vmem:[%s6983_s1 + $0x38] sm:$0xff] }
  0x12   :  { %2598 = vmatmul.msk.f32.gmra.mxu0 %vm84_vm0, %v3305_v22  ;;  %2601 = vmatmul.msk.f32.gmra.mxu2 %vm84_vm0, %v3310_v23  ;;  %v3463_v48 = vld [vmem:[%s6985_s2 + $0x120] sm:$0xff]  ;;  %v3468_v49 = vld [vmem:[%s6985_s2 + $0x128] sm:$0xff]  ;;  %v40_v3 = vld [vmem:[%s6983_s1 + $0x30] sm:$0xff] }
  0x13   :  { %2606 = vmatmul.msk.f32.gmra.mxu1 %vm84_vm0, %v3305_v22  ;;  %2609 = vmatmul.msk.f32.gmra.mxu3 %vm84_vm0, %v3310_v23  ;;  %v3481_v50 = vld [vmem:[%s6985_s2 + $0x100] sm:$0xff]  ;;  %v3486_v51 = vld [vmem:[%s6985_s2 + $0x108] sm:$0xff]  ;;  %v3635_v10 = vld [vmem:[%s6985_s2 + $0x1f8] sm:$0xff] }
  0x14   :  { %288 = vmatpush.msrb.mxu0 %v38_v24  ;;  %329 = vmatpush.msrb.mxu1 %v39_v25  ;;  %v3499_v54 = vld [vmem:[%s6985_s2 + $0xe0] sm:$0xff]  ;;  %v3504_v55 = vld [vmem:[%s6985_s2 + $0xe8] sm:$0xff]  ;;  %v3640_v11 = vld [vmem:[%s6985_s2 + $0x1f0] sm:$0xff] }
  0x15   :  { %247 = vmatpush.msrb.mxu3 %v37_v26  ;;  %206 = vmatpush.msrb.mxu2 %v36_v27  ;;  %v3513_v56 = vld [vmem:[%s6985_s2 + $0xc0] sm:$0xff]  ;;  %v3518_v57 = vld [vmem:[%s6985_s2 + $0xc8] sm:$0xff]  ;;  %v3645_v12 = vld [vmem:[%s6985_s2 + $0x1d8] sm:$0xff] }
  0x16   :  { %636 = vmatpush.msra.mxu0 %v3375_v34  ;;  %656 = vmatpush.msra.mxu1 %v3380_v35  ;;  %v3531_v58 = vld [vmem:[%s6985_s2 + $0xa0] sm:$0xff]  ;;  %v3536_v59 = vld [vmem:[%s6985_s2 + $0xa8] sm:$0xff]  ;;  %v3652_v13 = vld [vmem:[%s6985_s2 + $0x1d0] sm:$0xff] }
  0x17   :  { %408 = vmatpush.msra.mxu3 %v65_v28  ;;  %367 = vmatpush.msra.mxu2 %v64_v29  ;;  %v3543_v60 = vld [vmem:[%s6985_s2 + $0x80] sm:$0xff]  ;;  %v3548_v61 = vld [vmem:[%s6985_s2 + $0x88] sm:$0xff]  ;;  %v3667_v14 = vld [vmem:[%s6985_s2 + $0x1b8] sm:$0xff] }
  0x18   :  { %637 = vmatpush.msra.mxu0 %v3389_v37  ;;  %657 = vmatpush.msra.mxu1 %v3394_v38  ;;  %v3557_v62 = vld [vmem:[%s6985_s2 + $0x60] sm:$0xff]  ;;  %v3562_v63 = vld [vmem:[%s6985_s2 + $0x68] sm:$0xff]  ;;  %v3672_v15 = vld [vmem:[%s6985_s2 + $0x1b0] sm:$0xff] }
  0x19   :  { %409 = vmatpush.msra.mxu3 %v57_v33  ;;  %368 = vmatpush.msra.mxu2 %v56_v36  ;;  %v3571_v0 = vld [vmem:[%s6985_s2 + $0x40] sm:$0xff]  ;;  %v3580_v1 = vld [vmem:[%s6985_s2 + $0x48] sm:$0xff]  ;;  %v3677_v16 = vld [vmem:[%s6985_s2 + $0x198] sm:$0xff] }
  0x1a   :  { %2599 = vmatmul.msk.f32.gmra.mxu0 %vm84_vm0, %v3341_v30  ;;  %2602 = vmatmul.msk.f32.gmra.mxu2 %vm84_vm0, %v3346_v31  ;;  %v3593_v4 = vld [vmem:[%s6985_s2 + $0x20] sm:$0xff]  ;;  %v3598_v5 = vld [vmem:[%s6985_s2 + $0x28] sm:$0xff]  ;;  %v3684_v17 = vld [vmem:[%s6985_s2 + $0x190] sm:$0xff] }
  0x1b   :  { %2607 = vmatmul.msk.f32.gmra.mxu1 %vm84_vm0, %v3341_v30  ;;  %2610 = vmatmul.msk.f32.gmra.mxu3 %vm84_vm0, %v3346_v31  ;;  %v3607_v6 = vld [vmem:[%s6985_s2] sm:$0xff]  ;;  %v3612_v7 = vld [vmem:[%s6985_s2 + $0x8] sm:$0xff]  ;;  %v3697_v19 = vld [vmem:[%s6985_s2 + $0x178] sm:$0xff] }
  0x1c   :  { %638 = vmatpush.msra.mxu0 %v3400_v39  ;;  %658 = vmatpush.msra.mxu1 %v3406_v40  ;;  %v3702_v20 = vld [vmem:[%s6985_s2 + $0x170] sm:$0xff]  ;;  %v3714_v24 = vld [vmem:[%s6985_s2 + $0x158] sm:$0xff]  ;;  %v3731_v27 = vld [vmem:[%s6986_s3 + $0x1e0] sm:$0xff] }
  0x1d   :  { %410 = vmatpush.msra.mxu3 %v49_v52  ;;  %369 = vmatpush.msra.mxu2 %v48_v53  ;;  %v3707_v21 = vld [vmem:[%s6985_s2 + $0x150] sm:$0xff]  ;;  %7464 = vst [vmem:[#allocation4_spill] sm:$0xff] %v3714_v24  ;;  %v3726_v26 = vld [vmem:[%s6985_s2 + $0x138] sm:$0xff]  ;;  %v3738_v28 = vld [vmem:[%s6986_s3 + $0x1e8] sm:$0xff] }
  0x1e   :  { %639 = vmatpush.msra.mxu0 %v3419_v42  ;;  %659 = vmatpush.msra.mxu1 %v3424_v43  ;;  %v3721_v25 = vld [vmem:[%s6985_s2 + $0x130] sm:$0xff]  ;;  %7466 = vst [vmem:[#allocation6_spill] sm:$0xff] %v3726_v26  ;;  %v3751_v33 = vld [vmem:[%s6985_s2 + $0x118] sm:$0xff]  ;;  %v3756_v36 = vld [vmem:[%s6986_s3 + $0x1c0] sm:$0xff] }
  0x1f   :  { %411 = vmatpush.msra.mxu3 %v41_v2  ;;  %370 = vmatpush.msra.mxu2 %v40_v3  ;;  %7465 = vst [vmem:[#allocation5_spill] sm:$0xff] %v3721_v25  ;;  %v3746_v29 = vld [vmem:[%s6985_s2 + $0x110] sm:$0xff]  ;;  %v3764_v52 = vld [vmem:[%s6986_s3 + $0x1c8] sm:$0xff]  ;;  %v3774_v2 = vld [vmem:[%s6985_s2 + $0xf8] sm:$0xff] }
  0x20   :  { %640 = vmatpush.msra.mxu0 %v3437_v44  ;;  %660 = vmatpush.msra.mxu1 %v3442_v45  ;;  %7467 = vst [vmem:[#allocation7_spill] sm:$0xff] %v3746_v29  ;;  %v3769_v53 = vld [vmem:[%s6985_s2 + $0xf0] sm:$0xff]  ;;  %v3781_v3 = vld [vmem:[%s6986_s3 + $0x1a0] sm:$0xff] }
  0x21   :  { %7468 = vst [vmem:[#allocation8_spill] sm:$0xff] %v3751_v33 }
  0x22   :  { %2603 = vmatmul.msk.f32.gmra.mxu2 %vm84_vm0, %v3359_v32  ;;  %2629 = vmatmul.msk.f32.vlgmr.msrb.gmra.mxu0 %vm84_vm0, %v3251_v8  ;;  %7469 = vst [vmem:[#allocation9_spill] sm:$0xff] %v3769_v53 }
  0x23   :  { %2611 = vmatmul.msk.f32.gmra.mxu3 %vm84_vm0, %v3359_v32  ;;  %2637 = vmatmul.msk.f32.vlgmr.msrb.gmra.mxu1 %vm84_vm0, %v3251_v8  ;;  %7470 = vst [vmem:[#allocation10_spill] sm:$0xff] %v3774_v2 }
  0x24   :  { %641 = vmatpush.msra.mxu0 %v3449_v46  ;;  %661 = vmatpush.msra.mxu1 %v3454_v47 }
  0x26   :  { %642 = vmatpush.msra.mxu0 %v3463_v48  ;;  %662 = vmatpush.msra.mxu1 %v3468_v49 }
  0x28   :  { %643 = vmatpush.msra.mxu0 %v3481_v50  ;;  %663 = vmatpush.msra.mxu1 %v3486_v51 }
  0x2a   :  { %2604 = vmatmul.msk.f32.gmra.mxu2 %vm84_vm0, %v3411_v41  ;;  %2630 = vmatmul.msk.f32.gmra.mxu0 %vm84_vm0, %v3305_v22 }
  0x2b   :  { %2612 = vmatmul.msk.f32.gmra.mxu3 %vm84_vm0, %v3411_v41  ;;  %2638 = vmatmul.msk.f32.gmra.mxu1 %vm84_vm0, %v3305_v22 }
  0x2c   :  { %644 = vmatpush.msra.mxu0 %v3499_v54  ;;  %664 = vmatpush.msra.mxu1 %v3504_v55 }
  0x2e   :  { %645 = vmatpush.msra.mxu0 %v3513_v56  ;;  %665 = vmatpush.msra.mxu1 %v3518_v57 }
  0x30   :  { %646 = vmatpush.msra.mxu0 %v3531_v58  ;;  %666 = vmatpush.msra.mxu1 %v3536_v59 }
  0x32   :  { %2613 = vmatmul.msk.f32.vlgmr.msrb.gmra.mxu2 %vm84_vm0, %v3251_v8  ;;  %2631 = vmatmul.msk.f32.gmra.mxu0 %vm84_vm0, %v3341_v30 }
  0x33   :  { %2621 = vmatmul.msk.f32.vlgmr.msrb.gmra.mxu3 %vm84_vm0, %v3251_v8  ;;  %2639 = vmatmul.msk.f32.gmra.mxu1 %vm84_vm0, %v3341_v30 }
  0x34   :  { %647 = vmatpush.msra.mxu0 %v3543_v60  ;;  %667 = vmatpush.msra.mxu1 %v3548_v61 }
  0x35   :  { %696 = vmatpush.msrb.mxu3 %v3635_v10  ;;  %676 = vmatpush.msrb.mxu2 %v3640_v11 }
  0x36   :  { %648 = vmatpush.msra.mxu0 %v3557_v62  ;;  %668 = vmatpush.msra.mxu1 %v3562_v63 }
  0x37   :  { %697 = vmatpush.msrb.mxu3 %v3645_v12  ;;  %677 = vmatpush.msrb.mxu2 %v3652_v13 }
  0x38   :  { %649 = vmatpush.msra.mxu0 %v3571_v0  ;;  %669 = vmatpush.msra.mxu1 %v3580_v1 }
  0x39   :  { %698 = vmatpush.msrb.mxu3 %v3667_v14  ;;  %678 = vmatpush.msrb.mxu2 %v3672_v15 }
  0x3a   :  { %2614 = vmatmul.msk.f32.gmra.mxu2 %vm84_vm0, %v3305_v22  ;;  %2632 = vmatmul.msk.f32.gmra.mxu0 %vm84_vm0, %v3256_v9 }
  0x3b   :  { %2622 = vmatmul.msk.f32.gmra.mxu3 %vm84_vm0, %v3305_v22  ;;  %2640 = vmatmul.msk.f32.gmra.mxu1 %vm84_vm0, %v3256_v9 }
  0x3c   :  { %650 = vmatpush.msra.mxu0 %v3593_v4  ;;  %670 = vmatpush.msra.mxu1 %v3598_v5 }
  0x3d   :  { %699 = vmatpush.msrb.mxu3 %v3677_v16  ;;  %679 = vmatpush.msrb.mxu2 %v3684_v17 }
  0x3e   :  { %651 = vmatpush.msra.mxu0 %v3607_v6  ;;  %671 = vmatpush.msra.mxu1 %v3612_v7 }
  0x3f   :  { %700 = vmatpush.msrb.mxu3 %v3697_v19  ;;  %680 = vmatpush.msrb.mxu2 %v3702_v20 }
  0x40   :  { %752 = vmatpush.msrb.mxu0 %v3731_v27  ;;  %772 = vmatpush.msrb.mxu1 %v3738_v28 }
  0x41   :  { %681 = vmatpush.msrb.mxu2 %v3707_v21  ;;  %701 = vmatpush.msrb.mxu3 %v3714_v24  ;;  %v3844_v24 = vld [vmem:[%s6985_s2 + $0x90] sm:$0xff] }
  0x42   :  { %2615 = vmatmul.msk.f32.gmra.mxu2 %vm84_vm0, %v3341_v30  ;;  %2633 = vmatmul.msk.f32.gmra.mxu0 %vm84_vm0, %v3310_v23  ;;  %7479 = vst [vmem:[#allocation19_spill] sm:$0xff] %v3844_v24 }
  0x43   :  { %2623 = vmatmul.msk.f32.gmra.mxu3 %vm84_vm0, %v3341_v30  ;;  %2641 = vmatmul.msk.f32.gmra.mxu1 %vm84_vm0, %v3310_v23 }
  0x44   :  { %682 = vmatpush.msrb.mxu2 %v3721_v25  ;;  %702 = vmatpush.msrb.mxu3 %v3726_v26  ;;  %v3805_v26 = vld [vmem:[%s6986_s3 + $0x180] sm:$0xff]  ;;  %v3824_v25 = vld [vmem:[%s6985_s2 + $0xb8] sm:$0xff] }
  0x45   :  { %753 = vmatpush.msrb.mxu0 %v3756_v36  ;;  %773 = vmatpush.msrb.mxu1 %v3764_v52  ;;  %7473 = vst [vmem:[#allocation13_spill] sm:$0xff] %v3805_v26 }
  0x46   :  { %683 = vmatpush.msrb.mxu2 %v3746_v29  ;;  %703 = vmatpush.msrb.mxu3 %v3751_v33  ;;  %v3795_v33 = vld [vmem:[%s6985_s2 + $0xd0] sm:$0xff]  ;;  %v3800_v29 = vld [vmem:[%s6985_s2 + $0xd8] sm:$0xff]  ;;  %7476 = vst [vmem:[#allocation16_spill] sm:$0xff] %v3824_v25 }
  0x47   :  { %7471 = vst [vmem:[#allocation11_spill] sm:$0xff] %v3795_v33  ;;  %754 = vmatpush.msrb.mxu0 %v3781_v3 }
  0x48   :  { %684 = vmatpush.msrb.mxu2 %v3769_v53  ;;  %704 = vmatpush.msrb.mxu3 %v3774_v2  ;;  %7472 = vst [vmem:[#allocation12_spill] sm:$0xff] %v3800_v29  ;;  %v3812_v2 = vld [vmem:[%s6986_s3 + $0x188] sm:$0xff]  ;;  %v3819_v53 = vld [vmem:[%s6985_s2 + $0xb0] sm:$0xff] }
  0x49   :  { %7474 = vst [vmem:[#allocation14_spill] sm:$0xff] %v3812_v2  ;;  %755 = vmatpush.msrb.mxu0 %v3805_v26  ;;  %v3857_v26 = vld [vmem:[%s6986_s3 + $0x140] sm:$0xff] }
  0x4a   :  { %2616 = vmatmul.msk.f32.gmra.mxu2 %vm84_vm0, %v3256_v9  ;;  %2634 = vmatmul.msk.f32.gmra.mxu0 %vm84_vm0, %v3346_v31  ;;  %7475 = vst [vmem:[#allocation15_spill] sm:$0xff] %v3819_v53 }
  0x4b   :  { %2624 = vmatmul.msk.f32.gmra.mxu3 %vm84_vm0, %v3256_v9  ;;  %2642 = vmatmul.msk.f32.gmra.mxu1 %vm84_vm0, %v3346_v31  ;;  %7481 = vst [vmem:[#allocation21_spill] sm:$0xff] %v3857_v26 }
  0x4c   :  { %685 = vmatpush.msrb.mxu2 %v3795_v33  ;;  %705 = vmatpush.msrb.mxu3 %v3800_v29  ;;  %v3831_v33 = vld [vmem:[%s6986_s3 + $0x160] sm:$0xff]  ;;  %v3836_v29 = vld [vmem:[%s6986_s3 + $0x168] sm:$0xff] }
  0x4d   :  { %7477 = vst [vmem:[#allocation17_spill] sm:$0xff] %v3831_v33  ;;  %756 = vmatpush.msrb.mxu0 %v3831_v33  ;;  %v3881_v33 = vld [vmem:[%s6986_s3 + $0x120] sm:$0xff] }
  0x4e   :  { %7478 = vst [vmem:[#allocation18_spill] sm:$0xff] %v3836_v29  ;;  %706 = vmatpush.msrb.mxu3 %v3824_v25  ;;  %686 = vmatpush.msrb.mxu2 %v3819_v53  ;;  %v3862_v25 = vld [vmem:[%s6986_s3 + $0x148] sm:$0xff]  ;;  %v3874_v53 = vld [vmem:[%s6985_s2 + $0x78] sm:$0xff] }
  0x4f   :  { %7482 = vst [vmem:[#allocation22_spill] sm:$0xff] %v3862_v25  ;;  %757 = vmatpush.msrb.mxu0 %v3857_v26  ;;  %v3905_v26 = vld [vmem:[%s6986_s3 + $0x100] sm:$0xff] }
  0x50   :  { %7484 = vst [vmem:[#allocation24_spill] sm:$0xff] %v3874_v53  ;;  %687 = vmatpush.msrb.mxu2 %v3844_v24  ;;  %v3893_v24 = vld [vmem:[%s6985_s2 + $0x50] sm:$0xff] }
  0x51   :  { %7486 = vst [vmem:[#allocation26_spill] sm:$0xff] %v3893_v24  ;;  %758 = vmatpush.msrb.mxu0 %v3881_v33 }
  0x52   :  { %2617 = vmatmul.msk.f32.gmra.mxu2 %vm84_vm0, %v3310_v23  ;;  %2635 = vmatmul.msk.f32.gmra.mxu0 %vm84_vm0, %v3359_v32  ;;  %7488 = vst [vmem:[#allocation28_spill] sm:$0xff] %v3905_v26 }
  0x53   :  { %2625 = vmatmul.msk.f32.gmra.mxu3 %vm84_vm0, %v3310_v23  ;;  %2643 = vmatmul.msk.f32.gmra.mxu1 %vm84_vm0, %v3359_v32 }
  0x54   :  { %759 = vmatpush.msrb.mxu0 %v3905_v26  ;;  %v3950_v26 = vld [vmem:[%s6985_s2 + $0x18] sm:$0xff] }
  0x55   :  { %7495 = vst [vmem:[#allocation35_spill] sm:$0xff] %v3950_v26 }
  0x5a   :  { %2618 = vmatmul.msk.f32.gmra.mxu2 %vm84_vm0, %v3346_v31  ;;  %2636 = vmatmul.msk.f32.gmra.mxu0 %vm84_vm0, %v3411_v41 }
  0x5b   :  { %2626 = vmatmul.msk.f32.gmra.mxu3 %vm84_vm0, %v3346_v31  ;;  %2644 = vmatmul.msk.f32.gmra.mxu1 %vm84_vm0, %v3411_v41 }
  0x62   :  { %2619 = vmatmul.msk.f32.gmra.mxu2 %vm84_vm0, %v3359_v32  ;;  %652 = vmatmul.f32.vlgmr.msra.gmra.mxu0 %v6991_v18 }
  0x63   :  { %2627 = vmatmul.msk.f32.gmra.mxu3 %vm84_vm0, %v3359_v32  ;;  %672 = vmatmul.f32.vlgmr.msra.gmra.mxu1 %v6991_v18  ;;  %v3786_v18 = vld [vmem:[%s6986_s3 + $0x1a8] sm:$0xff] }
  0x64   :  { %774 = vmatpush.msrb.mxu1 %v3786_v18 }
  0x66   :  { %775 = vmatpush.msrb.mxu1 %v3812_v2  ;;  %v3849_v2 = vld [vmem:[%s6985_s2 + $0x98] sm:$0xff] }
  0x67   :  { %7480 = vst [vmem:[#allocation20_spill] sm:$0xff] %v3849_v2  ;;  %707 = vmatpush.msrb.mxu3 %v3849_v2  ;;  %v3898_v2 = vld [vmem:[%s6985_s2 + $0x58] sm:$0xff] }
  0x68   :  { %776 = vmatpush.msrb.mxu1 %v3836_v29  ;;  %v3886_v29 = vld [vmem:[%s6986_s3 + $0x128] sm:$0xff]  ;;  %7487 = vst [vmem:[#allocation27_spill] sm:$0xff] %v3898_v2 }
  0x69   :  { %7485 = vst [vmem:[#allocation25_spill] sm:$0xff] %v3886_v29  ;;  %708 = vmatpush.msrb.mxu3 %v3874_v53  ;;  %v3919_v53 = vld [vmem:[%s6985_s2 + $0x30] sm:$0xff] }
  0x6a   :  { %2620 = vmatmul.msk.f32.gmra.mxu2 %vm84_vm0, %v3411_v41  ;;  %777 = vmatpush.msrb.mxu1 %v3862_v25  ;;  %v3912_v25 = vld [vmem:[%s6986_s3 + $0x108] sm:$0xff]  ;;  %7490 = vst [vmem:[#allocation30_spill] sm:$0xff] %v3919_v53 }
  0x6b   :  { %2628 = vmatmul.msk.f32.gmra.mxu3 %vm84_vm0, %v3411_v41  ;;  %7489 = vst [vmem:[#allocation29_spill] sm:$0xff] %v3912_v25 }
  0x6c   :  { %778 = vmatpush.msrb.mxu1 %v3886_v29  ;;  %709 = vmatpush.msrb.mxu3 %v3898_v2  ;;  %v3937_v2 = vld [vmem:[%s6986_s3 + $0xe8] sm:$0xff]  ;;  %v3945_v29 = vld [vmem:[%s6985_s2 + $0x10] sm:$0xff] }
  0x6d   :  { %7493 = vst [vmem:[#allocation33_spill] sm:$0xff] %v3937_v2 }
  0x6e   :  { %779 = vmatpush.msrb.mxu1 %v3912_v25  ;;  %7494 = vst [vmem:[#allocation34_spill] sm:$0xff] %v3945_v29  ;;  %v3962_v25 = vld [vmem:[%s6986_s3 + $0xc8] sm:$0xff] }
  0x6f   :  { %7496 = vst [vmem:[#allocation36_spill] sm:$0xff] %v3962_v25 }
  0x70   :  { %780 = vmatpush.msrb.mxu1 %v3937_v2  ;;  %v3986_v2 = vld [vmem:[%s6986_s3 + $0xa8] sm:$0xff] }
  0x71   :  { %7500 = vst [vmem:[#allocation40_spill] sm:$0xff] %v3986_v2 }
  0x72   :  { %2645 = vmatmul.msk.f32.vlgmr.msra.gmra.mxu2 %vm84_vm0, %v3251_v8  ;;  %781 = vmatpush.msrb.mxu1 %v3962_v25  ;;  %v4007_v25 = vld [vmem:[%s6986_s3 + $0x80] sm:$0xff] }
  0x73   :  { %2653 = vmatmul.msk.f32.vlgmr.msra.gmra.mxu3 %vm84_vm0, %v3251_v8  ;;  %v3869_v8 = vld [vmem:[%s6985_s2 + $0x70] sm:$0xff]  ;;  %7503 = vst [vmem:[#allocation43_spill] sm:$0xff] %v4007_v25 }
  0x74   :  { %7483 = vst [vmem:[#allocation23_spill] sm:$0xff] %v3869_v8  ;;  %688 = vmatpush.msrb.mxu2 %v3869_v8  ;;  %v3924_v8 = vld [vmem:[%s6985_s2 + $0x38] sm:$0xff]  ;;  %782 = vmatpush.msrb.mxu1 %v3986_v2 }
  0x75   :  { %7491 = vst [vmem:[#allocation31_spill] sm:$0xff] %v3924_v8  ;;  %710 = vmatpush.msrb.mxu3 %v3924_v8  ;;  %v3974_v8 = vld [vmem:[%s6986_s3 + $0x1f8] sm:$0xff] }
  0x76   :  { %689 = vmatpush.msrb.mxu2 %v3893_v24  ;;  %v3932_v24 = vld [vmem:[%s6986_s3 + $0xe0] sm:$0xff]  ;;  %7498 = vst [vmem:[#allocation38_spill] sm:$0xff] %v3974_v8  ;;  %v4025_v2 = vld [vmem:[%s6986_s3 + $0x1b8] sm:$0xff] }
  0x77   :  { %7492 = vst [vmem:[#allocation32_spill] sm:$0xff] %v3932_v24  ;;  %760 = vmatpush.msrb.mxu0 %v3932_v24  ;;  %711 = vmatpush.msrb.mxu3 %v3950_v26  ;;  %v3981_v24 = vld [vmem:[%s6986_s3 + $0xa0] sm:$0xff]  ;;  %v4000_v26 = vld [vmem:[%s6986_s3 + $0x1d0] sm:$0xff] }
  0x78   :  { %690 = vmatpush.msrb.mxu2 %v3919_v53  ;;  %v3969_v53 = vld [vmem:[%s6986_s3 + $0x1f0] sm:$0xff]  ;;  %7499 = vst [vmem:[#allocation39_spill] sm:$0xff] %v3981_v24 }
  0x79   :  { %7497 = vst [vmem:[#allocation37_spill] sm:$0xff] %v3969_v53  ;;  %812 = vmatpush.msra.mxu3 %v3974_v8  ;;  %v4020_v8 = vld [vmem:[%s6986_s3 + $0x1b0] sm:$0xff] }
  0x7a   :  { %2646 = vmatmul.msk.f32.gmra.mxu2 %vm84_vm0, %v3305_v22  ;;  %7502 = vst [vmem:[#allocation42_spill] sm:$0xff] %v4000_v26 }
  0x7b   :  { %2654 = vmatmul.msk.f32.gmra.mxu3 %vm84_vm0, %v3305_v22  ;;  %v3957_v22 = vld [vmem:[%s6986_s3 + $0xc0] sm:$0xff]  ;;  %691 = vmatpush.msrb.mxu2 %v3945_v29  ;;  %v3993_v29 = vld [vmem:[%s6986_s3 + $0x1d8] sm:$0xff]  ;;  %7505 = vst [vmem:[#allocation45_spill] sm:$0xff] %v4020_v8 }
  0x7c   :  { %761 = vmatpush.msrb.mxu0 %v3957_v22  ;;  %7501 = vst [vmem:[#allocation41_spill] sm:$0xff] %v3993_v29  ;;  %813 = vmatpush.msra.mxu3 %v3993_v29  ;;  %v4038_v29 = vld [vmem:[%s6986_s3 + $0x68] sm:$0xff] }
  0x7d   :  { %792 = vmatpush.msra.mxu2 %v3969_v53  ;;  %v4012_v53 = vld [vmem:[%s6986_s3 + $0x88] sm:$0xff]  ;;  %7506 = vst [vmem:[#allocation46_spill] sm:$0xff] %v4025_v2 }
  0x7e   :  { %762 = vmatpush.msrb.mxu0 %v3981_v24  ;;  %7504 = vst [vmem:[#allocation44_spill] sm:$0xff] %v4012_v53  ;;  %v4033_v24 = vld [vmem:[%s6986_s3 + $0x60] sm:$0xff]  ;;  %783 = vmatpush.msrb.mxu1 %v4012_v53  ;;  %v4062_v53 = vld [vmem:[%s6986_s3 + $0x48] sm:$0xff] }
  0x7f   :  { %793 = vmatpush.msra.mxu2 %v4000_v26  ;;  %7507 = vst [vmem:[#allocation47_spill] sm:$0xff] %v4033_v24  ;;  %v4050_v26 = vld [vmem:[%s6986_s3 + $0x198] sm:$0xff]  ;;  %814 = vmatpush.msra.mxu3 %v4025_v2 }
  0x80   :  { %7508 = vst [vmem:[#allocation48_spill] sm:$0xff] %v4038_v29  ;;  %763 = vmatpush.msrb.mxu0 %v4007_v25  ;;  %v4057_v25 = vld [vmem:[%s6986_s3 + $0x40] sm:$0xff]  ;;  %784 = vmatpush.msrb.mxu1 %v4038_v29  ;;  %v4074_v2 = vld [vmem:[%s6986_s3 + $0x178] sm:$0xff]  ;;  %v4088_v29 = vld [vmem:[%s6986_s3 + $0x28] sm:$0xff] }
  0x81   :  { %7510 = vst [vmem:[#allocation50_spill] sm:$0xff] %v4050_v26  ;;  %794 = vmatpush.msra.mxu2 %v4020_v8  ;;  %v4069_v8 = vld [vmem:[%s6986_s3 + $0x170] sm:$0xff]  ;;  %815 = vmatpush.msra.mxu3 %v4050_v26 }
  0x82   :  { %2647 = vmatmul.msk.f32.gmra.mxu2 %vm84_vm0, %v3341_v30  ;;  %7511 = vst [vmem:[#allocation51_spill] sm:$0xff] %v4057_v25  ;;  %764 = vmatpush.msrb.mxu0 %v4033_v24  ;;  %v4081_v24 = vld [vmem:[%s6986_s3 + $0x20] sm:$0xff]  ;;  %v4095_v26 = vld [vmem:[%s6986_s3 + $0x150] sm:$0xff] }
  0x83   :  { %2655 = vmatmul.msk.f32.gmra.mxu3 %vm84_vm0, %v3341_v30  ;;  %v4045_v30 = vld [vmem:[%s6986_s3 + $0x190] sm:$0xff]  ;;  %7512 = vst [vmem:[#allocation52_spill] sm:$0xff] %v4062_v53  ;;  %785 = vmatpush.msrb.mxu1 %v4062_v53  ;;  %v4128_v53 = vld [vmem:[%s6986_s3 + $0x138] sm:$0xff] }
  0x84   :  { %7509 = vst [vmem:[#allocation49_spill] sm:$0xff] %v4045_v30  ;;  %795 = vmatpush.msra.mxu2 %v4045_v30  ;;  %765 = vmatpush.msrb.mxu0 %v4057_v25  ;;  %v4100_v30 = vld [vmem:[%s6986_s3 + $0x158] sm:$0xff] }
  0x85   :  { %7513 = vst [vmem:[#allocation53_spill] sm:$0xff] %v4069_v8  ;;  %816 = vmatpush.msra.mxu3 %v4074_v2  ;;  %786 = vmatpush.msrb.mxu1 %v4088_v29 }
  0x86   :  { %7514 = vst [vmem:[#allocation54_spill] sm:$0xff] %v4074_v2  ;;  %796 = vmatpush.msra.mxu2 %v4069_v8  ;;  %766 = vmatpush.msrb.mxu0 %v4081_v24  ;;  %v4108_v8 = vld [vmem:[%s6986_s3] sm:$0xff]  ;;  %v4113_v2 = vld [vmem:[%s6986_s3 + $0x8] sm:$0xff] }
  0x87   :  { %7515 = vst [vmem:[#allocation55_spill] sm:$0xff] %v4081_v24  ;;  %817 = vmatpush.msra.mxu3 %v4100_v30  ;;  %v4123_v24 = vld [vmem:[%s6986_s3 + $0x130] sm:$0xff]  ;;  %787 = vmatpush.msrb.mxu1 %v4113_v2 }
  0x88   :  { %7516 = vst [vmem:[#allocation56_spill] sm:$0xff] %v4088_v29  ;;  %797 = vmatpush.msra.mxu2 %v4095_v26  ;;  %767 = vmatpush.msrb.mxu0 %v4108_v8  ;;  %v4146_v29 = vld [vmem:[%s6986_s3 + $0x118] sm:$0xff] }
  0x89   :  { %7517 = vst [vmem:[#allocation57_spill] sm:$0xff] %v4095_v26  ;;  %v7524_v26 = vmov 0.0   ;;  %818 = vmatpush.msra.mxu3 %v4128_v53  ;;  %888 = vmatpush.msra.mxu1 %v3380_v35  ;;  %v4184_v35 = vld [vmem:[%s6986_s3 + $0xb0] sm:$0xff] }
  0x8a   :  { %7518 = vst [vmem:[#allocation58_spill] sm:$0xff] %v4100_v30  ;;  %2648 = vmatmul.msk.f32.gmra.mxu2 %vm84_vm0, %v3256_v9  ;;  %768 = vmatmul.f32.vlgmr.msrb.gmra.mxu0 %v7524_v26  ;;  %v4141_v30 = vld [vmem:[%s6986_s3 + $0x110] sm:$0xff] }
  0x8b   :  { %7519 = vst [vmem:[#allocation59_spill] sm:$0xff] %v4108_v8  ;;  %2656 = vmatmul.msk.f32.gmra.mxu3 %vm84_vm0, %v3256_v9  ;;  %788 = vmatmul.f32.vlgmr.msrb.gmra.mxu1 %v7524_v26 }
  0x8c   :  { %7520 = vst [vmem:[#allocation60_spill] sm:$0xff] %v4113_v2  ;;  %798 = vmatpush.msra.mxu2 %v4123_v24  ;;  %868 = vmatpush.msra.mxu0 %v3375_v34  ;;  %v4178_v34 = vld [vmem:[%s6986_s3 + $0xd8] sm:$0xff] }
  0x8d   :  { %7521 = vst [vmem:[#allocation61_spill] sm:$0xff] %v4128_v53  ;;  %v4130_v25 = vpop.f32.mrf.mxu2  ;;  %819 = vmatpush.msra.mxu3 %v4146_v29  ;;  %v4169_v53 = vld [vmem:[%s6986_s3 + $0xd0] sm:$0xff]  ;;  %889 = vmatpush.msra.mxu1 %v3394_v38  ;;  %v4209_v38 = vld [vmem:[%s6986_s3 + $0x98] sm:$0xff] }
  0x8e   :  { %7522 = vst [vmem:[#allocation62_spill] sm:$0xff] %v4130_v25  ;;  %v4134_v9 = vpop.f32.mrf.mxu3  ;;  %799 = vmatpush.msra.mxu2 %v4141_v30  ;;  %v4162_v25 = vld [vmem:[%s6986_s3 + $0xf8] sm:$0xff]  ;;  %869 = vmatpush.msra.mxu0 %v3389_v37 }
  0x8f   :  { %7523 = vst [vmem:[#allocation63_spill] sm:$0xff] %v4134_v9  ;;  %v4153_v9 = vld [vmem:[%s6986_s3 + $0xf0] sm:$0xff]  ;;  %820 = vmatpush.msra.mxu3 %v4162_v25  ;;  %890 = vmatpush.msra.mxu1 %v3406_v40  ;;  %v4223_v40 = vld [vmem:[%s6986_s3 + $0x78] sm:$0xff] }
  0x90   :  { %7525 = vst [vmem:[#allocation64_spill] sm:$0xff] %v4153_v9  ;;  %800 = vmatpush.msra.mxu2 %v4153_v9  ;;  %870 = vmatpush.msra.mxu0 %v3400_v39  ;;  %v4216_v39 = vld [vmem:[%s6986_s3 + $0x70] sm:$0xff] }
  0x91   :  { %7526 = vst [vmem:[#allocation65_spill] sm:$0xff] %v4162_v25  ;;  %821 = vmatpush.msra.mxu3 %v4178_v34  ;;  %v4202_v25 = vld [vmem:[%s6986_s3 + $0x90] sm:$0xff]  ;;  %891 = vmatpush.msra.mxu1 %v3424_v43  ;;  %v4240_v43 = vld [vmem:[%s6986_s3 + $0x58] sm:$0xff] }
  0x92   :  { %2649 = vmatmul.msk.f32.gmra.mxu2 %vm84_vm0, %v3310_v23  ;;  %871 = vmatpush.msra.mxu0 %v3419_v42  ;;  %7529 = vst [vmem:[#allocation68_spill] sm:$0xff] %v4216_v39  ;;  %v4232_v42 = vld [vmem:[%s6986_s3 + $0x50] sm:$0xff] }
  0x93   :  { %2657 = vmatmul.msk.f32.gmra.mxu3 %vm84_vm0, %v3310_v23  ;;  %801 = vmatpush.msra.mxu2 %v4169_v53  ;;  %v4193_v23 = vld [vmem:[%s6986_s3 + $0xb8] sm:$0xff]  ;;  %7530 = vst [vmem:[#allocation69_spill] sm:$0xff] %v4223_v40 }
  0x94   :  { %822 = vmatpush.msra.mxu3 %v4193_v23  ;;  %872 = vmatpush.msra.mxu0 %v3437_v44  ;;  %7531 = vst [vmem:[#allocation70_spill] sm:$0xff] %v4232_v42  ;;  %v4246_v44 = vld [vmem:[%s6986_s3 + $0x30] sm:$0xff] }
  0x95   :  { %v4187_v37 = vpop.f32.mrf.mxu2  ;;  %802 = vmatpush.msra.mxu2 %v4184_v35  ;;  %7532 = vst [vmem:[#allocation71_spill] sm:$0xff] %v4240_v43  ;;  %892 = vmatpush.msra.mxu1 %v3442_v45  ;;  %v4271_v45 = vld [vmem:[%s6986_s3 + $0x18] sm:$0xff] }
  0x96   :  { %7527 = vst [vmem:[#allocation66_spill] sm:$0xff] %v4187_v37  ;;  %v4196_v9 = vpop.f32.mrf.mxu3  ;;  %823 = vmatpush.msra.mxu3 %v4209_v38  ;;  %873 = vmatpush.msra.mxu0 %v3449_v46 }
  0x97   :  { %7528 = vst [vmem:[#allocation67_spill] sm:$0xff] %v4196_v9  ;;  %803 = vmatpush.msra.mxu2 %v4202_v25  ;;  %893 = vmatpush.msra.mxu1 %v3454_v47 }
  0x98   :  { %824 = vmatpush.msra.mxu3 %v4223_v40  ;;  %7533 = vst [vmem:[#allocation72_spill] sm:$0xff] %v4246_v44  ;;  %v4264_v40 = vld [vmem:[%s6986_s3 + $0x10] sm:$0xff]  ;;  %874 = vmatpush.msra.mxu0 %v3463_v48  ;;  %v4303_v48 = vpop.f32.mrf.mxu0 }
  0x99   :  { %804 = vmatpush.msra.mxu2 %v4216_v39  ;;  %7537 = vst [vmem:[#allocation76_spill] sm:$0xff] %v4264_v40  ;;  %894 = vmatpush.msra.mxu1 %v3468_v49 }
  0x9a   :  { %2650 = vmatmul.msk.f32.gmra.mxu2 %vm84_vm0, %v3346_v31  ;;  %825 = vmatpush.msra.mxu3 %v4240_v43  ;;  %7538 = vst [vmem:[#allocation77_spill] sm:$0xff] %v4271_v45 }
  0x9b   :  { %2658 = vmatmul.msk.f32.gmra.mxu3 %vm84_vm0, %v3346_v31  ;;  %805 = vmatpush.msra.mxu2 %v4232_v42  ;;  %v4255_v31 = vld [vmem:[%s6986_s3 + $0x38] sm:$0xff] }
  0x9c   :  { %7535 = vst [vmem:[#allocation74_spill] sm:$0xff] %v4255_v31  ;;  %826 = vmatpush.msra.mxu3 %v4255_v31  ;;  %875 = vmatpush.msra.mxu0 %v3481_v50 }
  0x9d   :  { %v4249_v9 = vpop.f32.mrf.mxu2  ;;  %806 = vmatpush.msra.mxu2 %v4246_v44  ;;  %895 = vmatpush.msra.mxu1 %v3486_v51 }
  0x9e   :  { %7534 = vst [vmem:[#allocation73_spill] sm:$0xff] %v4249_v9  ;;  %v4258_v37 = vpop.f32.mrf.mxu3  ;;  %827 = vmatpush.msra.mxu3 %v4271_v45  ;;  %876 = vmatpush.msra.mxu0 %v3499_v54  ;;  %v7611_v9 = vld [vmem:[#allocation54_spill] sm:$0xff] }
  0x9f   :  { %7536 = vst [vmem:[#allocation75_spill] sm:$0xff] %v4258_v37  ;;  %807 = vmatpush.msra.mxu2 %v4264_v40  ;;  %896 = vmatpush.msra.mxu1 %v3504_v55  ;;  %v7609_v37 = vld [vmem:[#allocation50_spill] sm:$0xff] }
  0xa0   :  { %877 = vmatpush.msra.mxu0 %v3513_v56  ;;  %v4330_v55 = vpop.f32.mrf.mxu0 }
  0xa1   :  { %897 = vmatpush.msra.mxu1 %v3518_v57  ;;  %7544 = vst [vmem:[#allocation83_spill] sm:$0xff] %v4330_v55  ;;  %v7546_v57 = vld [vmem:[#allocation13_spill] sm:$0xff] }
  0xa2   :  { %2651 = vmatmul.msk.f32.gmra.mxu2 %vm84_vm0, %v3359_v32  ;;  %878 = vmatpush.msra.mxu0 %v3531_v58 }
  0xa3   :  { %2659 = vmatmul.msk.f32.gmra.mxu3 %vm84_vm0, %v3359_v32  ;;  %898 = vmatpush.msra.mxu1 %v3536_v59  ;;  %v4300_v32 = vpop.f32.mrf.mxu1  ;;  %v7548_v59 = vld [vmem:[#allocation4_spill] sm:$0xff] }
  0xa4   :  { %879 = vmatpush.msra.mxu0 %v3543_v60  ;;  %v7549_v60 = vld [vmem:[#allocation14_spill] sm:$0xff] }
  0xa5   :  { %v4285_v46 = vpop.f32.mrf.mxu2  ;;  %899 = vmatpush.msra.mxu1 %v3548_v61  ;;  %v7550_v61 = vld [vmem:[#allocation5_spill] sm:$0xff] }
  0xa6   :  { %7539 = vst [vmem:[#allocation78_spill] sm:$0xff] %v4285_v46  ;;  %v4288_v47 = vpop.f32.mrf.mxu3  ;;  %880 = vmatpush.msra.mxu0 %v3557_v62  ;;  %v7551_v62 = vld [vmem:[#allocation17_spill] sm:$0xff]  ;;  %v7607_v46 = vld [vmem:[#allocation46_spill] sm:$0xff] }
  0xa7   :  { %7540 = vst [vmem:[#allocation79_spill] sm:$0xff] %v4288_v47  ;;  %900 = vmatpush.msra.mxu1 %v3562_v63  ;;  %v7606_v47 = vld [vmem:[#allocation45_spill] sm:$0xff] }
  0xa8   :  { %881 = vmatpush.msra.mxu0 %v3571_v0  ;;  %v7553_v0 = vld [vmem:[#allocation6_spill] sm:$0xff] }
  0xa9   :  { %901 = vmatpush.msra.mxu1 %v3580_v1  ;;  %v7554_v1 = vld [vmem:[#allocation18_spill] sm:$0xff] }
  0xaa   :  { %2652 = vmatmul.msk.f32.gmra.mxu2 %vm84_vm0, %v3411_v41  ;;  %882 = vmatpush.msra.mxu0 %v3593_v4  ;;  %v4358_v4 = vpop.f32.mrf.mxu0 }
  0xab   :  { %2660 = vmatmul.msk.f32.gmra.mxu3 %vm84_vm0, %v3411_v41  ;;  %902 = vmatpush.msra.mxu1 %v3598_v5  ;;  %v4324_v51 = vpop.f32.mrf.mxu1  ;;  %7555 = vst [vmem:[#allocation14_spill] sm:$0xff] %v4358_v4  ;;  %v7556_v5 = vld [vmem:[#allocation7_spill] sm:$0xff]  ;;  %v7619_v4 = vld [vmem:[#allocation64_spill] sm:$0xff] }
  0xac   :  { %883 = vmatpush.msra.mxu0 %v3607_v6  ;;  %7543 = vst [vmem:[#allocation82_spill] sm:$0xff] %v4324_v51  ;;  %v7557_v6 = vld [vmem:[#allocation21_spill] sm:$0xff] }
  0xad   :  { %v4305_v49 = vpop.f32.mrf.mxu2  ;;  %903 = vmatpush.msra.mxu1 %v3612_v7  ;;  %v7558_v7 = vld [vmem:[#allocation8_spill] sm:$0xff] }
  0xae   :  { %7541 = vst [vmem:[#allocation80_spill] sm:$0xff] %v4305_v49  ;;  %v4308_v50 = vpop.f32.mrf.mxu3  ;;  %984 = vmatpush.msrb.mxu0 %v3731_v27  ;;  %v7572_v27 = vld [vmem:[#allocation33_spill] sm:$0xff] }
  0xaf   :  { %7542 = vst [vmem:[#allocation81_spill] sm:$0xff] %v4308_v50  ;;  %1004 = vmatpush.msrb.mxu1 %v3738_v28  ;;  %v7573_v28 = vld [vmem:[#allocation19_spill] sm:$0xff]  ;;  %v7604_v50 = vld [vmem:[#allocation56_spill] sm:$0xff] }
  0xb0   :  { %985 = vmatpush.msrb.mxu0 %v3756_v36  ;;  %v7575_v36 = vld [vmem:[#allocation20_spill] sm:$0xff] }
  0xb1   :  { %1005 = vmatpush.msrb.mxu1 %v3764_v52  ;;  %v7576_v52 = vld [vmem:[#allocation36_spill] sm:$0xff] }
  0xb2   :  { %692 = vmatmul.f32.vlgmr.msrb.gmra.mxu2 %v7524_v26  ;;  %986 = vmatpush.msrb.mxu0 %v3781_v3  ;;  %v4386_v3 = vpop.f32.mrf.mxu0 }
  0xb3   :  { %712 = vmatmul.f32.vlgmr.msrb.gmra.mxu3 %v7524_v26  ;;  %908 = vmatpush.msrb.mxu2 %v3640_v11  ;;  %v4354_v63 = vpop.f32.mrf.mxu1  ;;  %v7560_v11 = vld [vmem:[#allocation9_spill] sm:$0xff]  ;;  %7577 = vst [vmem:[#allocation18_spill] sm:$0xff] %v4386_v3 }
  0xb4   :  { %928 = vmatpush.msrb.mxu3 %v3635_v10  ;;  %1006 = vmatpush.msrb.mxu1 %v3786_v18  ;;  %7552 = vst [vmem:[#allocation4_spill] sm:$0xff] %v4354_v63  ;;  %v7559_v10 = vld [vmem:[#allocation22_spill] sm:$0xff]  ;;  %v7567_v18 = vld [vmem:[#allocation12_spill] sm:$0xff]  ;;  %v7603_v3 = vld [vmem:[#allocation41_spill] sm:$0xff] }
  0xb5   :  { %v4320_v41 = vpop.f32.mrf.mxu2  ;;  %909 = vmatpush.msrb.mxu2 %v3652_v13  ;;  %987 = vmatpush.msrb.mxu0 %v7546_v57  ;;  %v7562_v13 = vld [vmem:[#allocation25_spill] sm:$0xff]  ;;  %v7578_v57 = vld [vmem:[#allocation23_spill] sm:$0xff] }
  0xb6   :  { %v4326_v54 = vpop.f32.mrf.mxu3  ;;  %929 = vmatpush.msrb.mxu3 %v3645_v12  ;;  %1007 = vmatpush.msrb.mxu1 %v7549_v60  ;;  %v7561_v12 = vld [vmem:[#allocation10_spill] sm:$0xff]  ;;  %v7580_v60 = vld [vmem:[#allocation24_spill] sm:$0xff]  ;;  %v7618_v63 = vld [vmem:[#allocation61_spill] sm:$0xff] }
  0xb7   :  { %910 = vmatpush.msrb.mxu2 %v3672_v15  ;;  %988 = vmatpush.msrb.mxu0 %v7551_v62  ;;  %v7564_v15 = vld [vmem:[#allocation11_spill] sm:$0xff] }
  0xb8   :  { %930 = vmatpush.msrb.mxu3 %v3667_v14  ;;  %1008 = vmatpush.msrb.mxu1 %v7554_v1 }
  0xb9   :  { %911 = vmatpush.msrb.mxu2 %v3684_v17  ;;  %989 = vmatpush.msrb.mxu0 %v7557_v6  ;;  %v7587_v6 = vld [vmem:[#allocation44_spill] sm:$0xff] }
  0xba   :  { %808 = vmatmul.f32.vlgmr.msra.gmra.mxu2 %v7524_v26  ;;  %931 = vmatpush.msrb.mxu3 %v3677_v16  ;;  %v7565_v16 = vld [vmem:[#allocation28_spill] sm:$0xff] }
  0xbb   :  { %828 = vmatmul.f32.vlgmr.msra.gmra.mxu3 %v7524_v26  ;;  %912 = vmatpush.msrb.mxu2 %v3702_v20  ;;  %v7569_v20 = vld [vmem:[#allocation15_spill] sm:$0xff]  ;;  %v7571_v26 = vld [vmem:[#allocation16_spill] sm:$0xff] }
  0xbc   :  { %932 = vmatpush.msrb.mxu3 %v3697_v19  ;;  %1009 = vmatpush.msrb.mxu1 %v7559_v10  ;;  %v7568_v19 = vld [vmem:[#allocation29_spill] sm:$0xff]  ;;  %v7589_v10 = vld [vmem:[#allocation47_spill] sm:$0xff] }
  0xbd   :  { %v4344_v56 = vpop.f32.mrf.mxu2  ;;  %913 = vmatpush.msrb.mxu2 %v3707_v21  ;;  %990 = vmatpush.msrb.mxu0 %v3881_v33  ;;  %v7570_v21 = vld [vmem:[#allocation32_spill] sm:$0xff]  ;;  %v4382_v33 = vpop.f32.mrf.mxu1 }
  0xbe   :  { %7545 = vst [vmem:[#allocation84_spill] sm:$0xff] %v4344_v56  ;;  %v4348_v58 = vpop.f32.mrf.mxu3  ;;  %933 = vmatpush.msrb.mxu3 %v7548_v59  ;;  %1010 = vmatpush.msrb.mxu1 %v7562_v13  ;;  %v7579_v59 = vld [vmem:[#allocation39_spill] sm:$0xff]  ;;  %v7592_v13 = vld [vmem:[#allocation34_spill] sm:$0xff]  ;;  %v7620_v56 = vld [vmem:[#allocation65_spill] sm:$0xff] }
  0xbf   :  { %7547 = vst [vmem:[#allocation13_spill] sm:$0xff] %v4348_v58  ;;  %914 = vmatpush.msrb.mxu2 %v7550_v61  ;;  %991 = vmatpush.msrb.mxu0 %v7565_v16  ;;  %v7581_v61 = vld [vmem:[#allocation40_spill] sm:$0xff]  ;;  %v7594_v16 = vld [vmem:[#allocation35_spill] sm:$0xff]  ;;  %v7625_v58 = vld [vmem:[#allocation69_spill] sm:$0xff] }
  0xc0   :  { %934 = vmatpush.msrb.mxu3 %v7553_v0  ;;  %1011 = vmatpush.msrb.mxu1 %v7568_v19  ;;  %7574 = vst [vmem:[#allocation6_spill] sm:$0xff] %v4382_v33  ;;  %v7583_v0 = vld [vmem:[#allocation26_spill] sm:$0xff] }
  0xc1   :  { %915 = vmatpush.msrb.mxu2 %v7556_v5  ;;  %992 = vmatpush.msrb.mxu0 %v7570_v21  ;;  %v7586_v5 = vld [vmem:[#allocation27_spill] sm:$0xff]  ;;  %v7596_v19 = vld [vmem:[#allocation38_spill] sm:$0xff]  ;;  %v7597_v21 = vld [vmem:[#allocation52_spill] sm:$0xff] }
  0xc2   :  { %935 = vmatpush.msrb.mxu3 %v7558_v7  ;;  %1012 = vmatpush.msrb.mxu1 %v7572_v27  ;;  %v7588_v7 = vld [vmem:[#allocation30_spill] sm:$0xff] }
  0xc3   :  { %916 = vmatpush.msrb.mxu2 %v7560_v11  ;;  %993 = vmatpush.msrb.mxu0 %v3957_v22  ;;  %v7584_v22 = vld [vmem:[#allocation43_spill] sm:$0xff] }
  0xc4   :  { %936 = vmatpush.msrb.mxu3 %v7561_v12  ;;  %1013 = vmatpush.msrb.mxu1 %v7576_v52  ;;  %v7590_v11 = vld [vmem:[#allocation31_spill] sm:$0xff]  ;;  %v7591_v12 = vld [vmem:[#allocation48_spill] sm:$0xff]  ;;  %v7599_v52 = vld [vmem:[#allocation42_spill] sm:$0xff] }
  0xc5   :  { %v4368_v14 = vpop.f32.mrf.mxu2  ;;  %917 = vmatpush.msrb.mxu2 %v7564_v15  ;;  %994 = vmatpush.msrb.mxu0 %v7579_v59  ;;  %v7593_v15 = vld [vmem:[#allocation51_spill] sm:$0xff]  ;;  %v4410_v27 = vpop.f32.mrf.mxu1 }
  0xc6   :  { %7563 = vst [vmem:[#allocation5_spill] sm:$0xff] %v4368_v14  ;;  %v4372_v17 = vpop.f32.mrf.mxu3  ;;  %937 = vmatpush.msrb.mxu3 %v7567_v18  ;;  %1014 = vmatpush.msrb.mxu1 %v7581_v61  ;;  %v7595_v18 = vld [vmem:[#allocation37_spill] sm:$0xff]  ;;  %v7600_v59 = vld [vmem:[#allocation55_spill] sm:$0xff]  ;;  %v4414_v61 = vpop.f32.mrf.mxu0 }
  0xc7   :  { %7566 = vst [vmem:[#allocation17_spill] sm:$0xff] %v4372_v17  ;;  %918 = vmatpush.msrb.mxu2 %v7569_v20  ;;  %995 = vmatpush.msrb.mxu0 %v7584_v22 }
  0xc8   :  { %938 = vmatpush.msrb.mxu3 %v7571_v26  ;;  %1015 = vmatpush.msrb.mxu1 %v7587_v6  ;;  %7598 = vst [vmem:[#allocation8_spill] sm:$0xff] %v4410_v27  ;;  %v7608_v27 = vld [vmem:[#allocation49_spill] sm:$0xff] }
  0xc9   :  { %919 = vmatpush.msrb.mxu2 %v7573_v28  ;;  %996 = vmatpush.msrb.mxu0 %v7589_v10  ;;  %7601 = vst [vmem:[#allocation22_spill] sm:$0xff] %v4414_v61  ;;  %v7610_v61 = vld [vmem:[#allocation53_spill] sm:$0xff] }
  0xca   :  { %939 = vmatpush.msrb.mxu3 %v7575_v36  ;;  %1016 = vmatpush.msrb.mxu1 %v7591_v12 }
  0xcb   :  { %920 = vmatpush.msrb.mxu2 %v7578_v57  ;;  %997 = vmatpush.msrb.mxu0 %v7593_v15 }
  0xcc   :  { %940 = vmatpush.msrb.mxu3 %v7580_v60  ;;  %1017 = vmatpush.msrb.mxu1 %v7597_v21 }
  0xcd   :  { %v4392_v62 = vpop.f32.mrf.mxu2  ;;  %921 = vmatpush.msrb.mxu2 %v7583_v0  ;;  %998 = vmatpush.msrb.mxu0 %v7600_v59 }
  0xce   :  { %7582 = vst [vmem:[#allocation7_spill] sm:$0xff] %v4392_v62  ;;  %v4396_v1 = vpop.f32.mrf.mxu3  ;;  %941 = vmatpush.msrb.mxu3 %v7586_v5  ;;  %1018 = vmatpush.msrb.mxu1 %v7604_v50  ;;  %v4439_v17 = vpop.f32.mrf.mxu0 }
  0xcf   :  { %7585 = vst [vmem:[#allocation21_spill] sm:$0xff] %v4396_v1  ;;  %922 = vmatpush.msrb.mxu2 %v7588_v7  ;;  %999 = vmatpush.msrb.mxu0 %v4108_v8  ;;  %v4434_v1 = vpop.f32.mrf.mxu1 }
  0xd0   :  { %942 = vmatpush.msrb.mxu3 %v7590_v11  ;;  %1019 = vmatpush.msrb.mxu1 %v4113_v2  ;;  %7615 = vst [vmem:[#allocation11_spill] sm:$0xff] %v4434_v1 }
  0xd1   :  { %923 = vmatpush.msrb.mxu2 %v7592_v13  ;;  %7617 = vst [vmem:[#allocation12_spill] sm:$0xff] %v4439_v17 }
  0xd2   :  { %943 = vmatpush.msrb.mxu3 %v7594_v16 }
  0xd3   :  { %1024 = vmatpush.msra.mxu2 %v7595_v18 }
  0xd4   :  { %1044 = vmatpush.msra.mxu3 %v7596_v19 }
  0xd5   :  { %1025 = vmatpush.msra.mxu2 %v7599_v52  ;;  %v4416_v33 = vpop.f32.mrf.mxu2 }
  0xd6   :  { %7602 = vst [vmem:[#allocation9_spill] sm:$0xff] %v4416_v33  ;;  %1045 = vmatpush.msra.mxu3 %v7603_v3  ;;  %v4420_v49 = vpop.f32.mrf.mxu3  ;;  %v7612_v33 = vld [vmem:[#allocation57_spill] sm:$0xff] }
  0xd7   :  { %7605 = vst [vmem:[#allocation10_spill] sm:$0xff] %v4420_v49  ;;  %1026 = vmatpush.msra.mxu2 %v7606_v47  ;;  %v7614_v49 = vld [vmem:[#allocation58_spill] sm:$0xff]  ;;  %v4454_v17 = vpop.f32.mrf.mxu1 }
  0xd8   :  { %1046 = vmatpush.msra.mxu3 %v7607_v46  ;;  %7623 = vst [vmem:[#allocation32_spill] sm:$0xff] %v4454_v17  ;;  %v4474_v17 = vld [vmem:[%s6987_s4] sm:$0xff] }
  0xd9   :  { %1027 = vmatpush.msra.mxu2 %v7608_v27  ;;  %v4539_v21 = vperm.slane %v4474_v17, 5 }
  0xda   :  { %1047 = vmatpush.msra.mxu3 %v7609_v37 }
  0xdb   :  { %1028 = vmatpush.msra.mxu2 %v7610_v61  ;;  %7647 = vst [vmem:[#allocation45_spill] sm:$0xff] %v4539_v21 }
  0xdc   :  { %1048 = vmatpush.msra.mxu3 %v7611_v9 }
  0xdd   :  { %1029 = vmatpush.msra.mxu2 %v7612_v33  ;;  %v4431_v62 = vpop.f32.mrf.mxu2 }
  0xde   :  { %7613 = vst [vmem:[#allocation25_spill] sm:$0xff] %v4431_v62  ;;  %1049 = vmatpush.msra.mxu3 %v7614_v49  ;;  %v4436_v14 = vpop.f32.mrf.mxu3 }
  0xdf   :  { %7616 = vst [vmem:[#allocation28_spill] sm:$0xff] %v4436_v14  ;;  %1030 = vmatpush.msra.mxu2 %v4123_v24  ;;  %v4457_v14 = vpop.f32.mrf.mxu0 }
  0xe0   :  { %1050 = vmatpush.msra.mxu3 %v7618_v63  ;;  %7624 = vst [vmem:[#allocation16_spill] sm:$0xff] %v4457_v14  ;;  %v4477_v14 = vpop.f32.mrf.mxu1 }
  0xe1   :  { %1031 = vmatpush.msra.mxu2 %v4141_v30  ;;  %7628 = vst [vmem:[#allocation20_spill] sm:$0xff] %v4477_v14 }
  0xe2   :  { %1051 = vmatpush.msra.mxu3 %v4146_v29 }
  0xe3   :  { %1032 = vmatpush.msra.mxu2 %v7619_v4 }
  0xe4   :  { %1052 = vmatpush.msra.mxu3 %v7620_v56 }
  0xe5   :  { %1033 = vmatpush.msra.mxu2 %v4169_v53  ;;  %v4447_v62 = vpop.f32.mrf.mxu2 }
  0xe6   :  { %7621 = vst [vmem:[#allocation29_spill] sm:$0xff] %v4447_v62  ;;  %1053 = vmatpush.msra.mxu3 %v4178_v34  ;;  %v4450_v1 = vpop.f32.mrf.mxu3 }
  0xe7   :  { %7622 = vst [vmem:[#allocation15_spill] sm:$0xff] %v4450_v1  ;;  %1034 = vmatpush.msra.mxu2 %v4184_v35  ;;  %v4482_v51 = vpop.f32.mrf.mxu0 }
  0xe8   :  { %1054 = vmatpush.msra.mxu3 %v4193_v23  ;;  %7629 = vst [vmem:[#allocation36_spill] sm:$0xff] %v4482_v51 }
  0xe9   :  { %1035 = vmatpush.msra.mxu2 %v4202_v25 }
  0xea   :  { %1055 = vmatpush.msra.mxu3 %v4209_v38 }
  0xeb   :  { %1036 = vmatpush.msra.mxu2 %v4216_v39 }
  0xec   :  { %1056 = vmatpush.msra.mxu3 %v7625_v58  ;;  %v4545_v58 = vperm.slane %v4474_v17, 4 }
  0xed   :  { %1037 = vmatpush.msra.mxu2 %v4232_v42  ;;  %v4463_v62 = vpop.f32.mrf.mxu2 }
  0xee   :  { %7626 = vst [vmem:[#allocation33_spill] sm:$0xff] %v4463_v62  ;;  %1057 = vmatpush.msra.mxu3 %v4240_v43  ;;  %v4466_v1 = vpop.f32.mrf.mxu3  ;;  %v4480_v62 = vperm.slane %v4474_v17, 6 }
  0xef   :  { %7627 = vst [vmem:[#allocation19_spill] sm:$0xff] %v4466_v1  ;;  %1038 = vmatpush.msra.mxu2 %v4246_v44  ;;  %v4485_v1 = vperm.slane %v4474_v17, 7 }
  0xf0   :  { %1058 = vmatpush.msra.mxu3 %v4255_v31  ;;  %v4493_v31 = vpop.f32.mrf.mxu1  ;;  %7649 = vst [vmem:[#allocation49_spill] sm:$0xff] %v4545_v58 }
  0xf1   :  { %1039 = vmatpush.msra.mxu2 %v4264_v40  ;;  %7632 = vst [vmem:[#allocation24_spill] sm:$0xff] %v4493_v31 }
  0xf2   :  { %1059 = vmatpush.msra.mxu3 %v4271_v45  ;;  %v4495_v45 = vpop.f32.mrf.mxu0 }
  0xf3   :  { %7633 = vst [vmem:[#allocation40_spill] sm:$0xff] %v4495_v45 }
  0xf5   :  { %v372_v55 = vpop.f32.mrf.mxu2 }
  0xf6   :  { %v4488_v40 = vadd.f32 %v372_v55, %v4480_v62  ;;  %v413_v2 = vpop.f32.mrf.mxu3 }
  0xf7   :  { %v4491_v8 = vadd.f32 %v413_v2, %v4485_v1 }
  0xf8   :  { %7630 = vst [vmem:[#allocation23_spill] sm:$0xff] %v4488_v40  ;;  %v4503_v43 = vpop.f32.mrf.mxu1 }
  0xf9   :  { %7631 = vst [vmem:[#allocation39_spill] sm:$0xff] %v4491_v8 }
  0xfa   :  { %7636 = vst [vmem:[#allocation27_spill] sm:$0xff] %v4503_v43  ;;  %v4508_v40 = vpop.f32.mrf.mxu0 }
  0xfb   :  { %7638 = vst [vmem:[#allocation30_spill] sm:$0xff] %v4508_v40 }
  0xfd   :  { %v375_v14 = vpop.f32.mrf.mxu2 }
  0xfe   :  { %v4498_v44 = vadd.f32 %v375_v14, %v4480_v62  ;;  %v416_v51 = vpop.f32.mrf.mxu3 }
  0xff   :  { %v4501_v50 = vadd.f32 %v416_v51, %v4485_v1 }
 0x100   :  { %7634 = vst [vmem:[#allocation26_spill] sm:$0xff] %v4498_v44 }
 0x101   :  { %7635 = vst [vmem:[#allocation43_spill] sm:$0xff] %v4501_v50  ;;  %v352_v50 = vpop.f32.mrf.mxu1 }
 0x102   :  { %v311_v45 = vpop.f32.mrf.mxu0 }
 0x105   :  { %v378_v59 = vpop.f32.mrf.mxu2 }
 0x106   :  { %v4506_v55 = vadd.f32 %v378_v59, %v4480_v62  ;;  %v419_v2 = vpop.f32.mrf.mxu3 }
 0x107   :  { %v4511_v8 = vadd.f32 %v419_v2, %v4485_v1  ;;  %v4526_v2 = vperm.slane %v4474_v17, 1 }
 0x108   :  { %7637 = vst [vmem:[#allocation44_spill] sm:$0xff] %v4506_v55 }
 0x109   :  { %7639 = vst [vmem:[#allocation47_spill] sm:$0xff] %v4511_v8  ;;  %v673_v8 = vpop.f32.mrf.mxu1 }
 0x10a   :  { %7644 = vst [vmem:[#allocation38_spill] sm:$0xff] %v4526_v2 }
 0x10d   :  { %v381_v31 = vpop.f32.mrf.mxu2 }
 0x10e   :  { %v4514_v14 = vadd.f32 %v381_v31, %v4480_v62  ;;  %v422_v44 = vpop.f32.mrf.mxu3  ;;  %v4529_v31 = vperm.slane %v4474_v17, 0 }
 0x10f   :  { %v4517_v51 = vadd.f32 %v422_v44, %v4485_v1  ;;  %v168_v44 = vadd.f32 %v4300_v32, %v4526_v2  ;;  %v353_v32 = vadd.f32 %v352_v50, %v4539_v21 }
 0x110   :  { %7640 = vst [vmem:[#allocation31_spill] sm:$0xff] %v4514_v14  ;;  %v653_v14 = vpop.f32.mrf.mxu0 }
 0x111   :  { %7641 = vst [vmem:[#allocation34_spill] sm:$0xff] %v4517_v51  ;;  %v127_v51 = vadd.f32 %v4303_v48, %v4529_v31 }
 0x112   :  { %7645 = vst [vmem:[#allocation42_spill] sm:$0xff] %v4529_v31 }
 0x113   :  { %v716_v42 = vadd.f32 %v653_v14, %v127_v51  ;;  %v789_v14 = vpop.f32.mrf.mxu1 }
 0x115   :  { %v384_v43 = vpop.f32.mrf.mxu2  ;;  %v720_v48 = vsub.f32 0.0, %v716_v42 }
 0x116   :  { %v4520_v59 = vadd.f32 %v384_v43, %v4480_v62  ;;  %v425_v55 = vpop.f32.mrf.mxu3  ;;  %v717_v43 = vadd.f32 %v673_v8, %v168_v44  ;;  %v312_v8 = vadd.f32 %v311_v45, %v4545_v58  ;;  %v833_v44 = vadd.f32 %v789_v14, %v353_v32 }
 0x117   :  { %v4523_v40 = vadd.f32 %v425_v55, %v4485_v1  ;;  %v721_v31 = vmul.f32 1.442695, %v720_v48  ;;  %v4556_v48 = vperm.slane %v4474_v17, 2 }
 0x118   :  { %7642 = vst [vmem:[#allocation35_spill] sm:$0xff] %v4520_v59  ;;  %v725_v2 = vsub.f32 0.0, %v717_v43  ;;  %v769_v51 = vpop.f32.mrf.mxu0  ;;  %v841_v50 = vsub.f32 0.0, %v833_v44 }
 0x119   :  { %7643 = vst [vmem:[#allocation37_spill] sm:$0xff] %v4523_v40  ;;  %v832_v39 = vadd.f32 %v769_v51, %v312_v8 }
 0x11a   :  { %v842_v45 = vmul.f32 1.442695, %v841_v50  ;;  %7652 = vst [vmem:[#allocation54_spill] sm:$0xff] %v4556_v48 }
 0x11b   :  { %v836_v43 = vsub.f32 0.0, %v832_v39 }
 0x11d   :  { %v387_v59 = vpop.f32.mrf.mxu2  ;;  %v837_v21 = vmul.f32 1.442695, %v836_v43 }
 0x11e   :  { %v4536_v55 = vadd.f32 %v387_v59, %v4480_v62  ;;  %v428_v40 = vpop.f32.mrf.mxu3  ;;  %v726_v59 = vmul.f32 1.442695, %v725_v2 }
 0x11f   :  { %v4542_v15 = vadd.f32 %v428_v40, %v4485_v1 }
 0x120   :  { %7646 = vst [vmem:[#allocation41_spill] sm:$0xff] %v4536_v55  ;;  %2671 = vpow2.f32 %v726_v59 }
 0x121   :  { %7648 = vst [vmem:[#allocation46_spill] sm:$0xff] %v4542_v15  ;;  %2673 = vpow2.f32 %v721_v31  ;;  %v209_v31 = vadd.f32 %v4320_v41, %v4556_v48 }
 0x122   :  { %2675 = vpow2.f32 %v842_v45 }
 0x123   :  { %2677 = vpow2.f32 %v837_v21 }
 0x125   :  { %v390_v55 = vpop.f32.mrf.mxu2 }
 0x126   :  { %v4550_v12 = vadd.f32 %v390_v55, %v4480_v62  ;;  %v431_v40 = vpop.f32.mrf.mxu3  ;;  %v2672_v2 = vpop.eup %2671  ;;  %v4559_v55 = vperm.slane %v4474_v17, 3 }
 0x127   :  { %v4553_v15 = vadd.f32 %v431_v40, %v4485_v1  ;;  %v2674_v32 = vpop.eup %2673  ;;  %v728_v8 = vadd.f32 1.0, %v2672_v2 }
 0x128   :  { %7650 = vst [vmem:[#allocation50_spill] sm:$0xff] %v4550_v12  ;;  %v723_v14 = vadd.f32 1.0, %v2674_v32  ;;  %v250_v39 = vadd.f32 %v4326_v54, %v4559_v55  ;;  %v2676_v40 = vpop.eup %2675 }
 0x129   :  { %7651 = vst [vmem:[#allocation53_spill] sm:$0xff] %v4553_v15  ;;  %2679 = vrcp.f32 %v728_v8  ;;  %v2678_v43 = vpop.eup %2677  ;;  %v844_v45 = vadd.f32 1.0, %v2676_v40 }
 0x12a   :  { %7653 = vst [vmem:[#allocation57_spill] sm:$0xff] %v4559_v55  ;;  %2681 = vrcp.f32 %v723_v14  ;;  %v839_v2 = vadd.f32 1.0, %v2678_v43 }
 0x12d   :  { %v393_v42 = vpop.f32.mrf.mxu2 }
 0x12e   :  { %v434_v58 = vpop.f32.mrf.mxu3  ;;  %v394_v12 = vadd.f32 %v393_v42, %v4480_v62 }
 0x12f   :  { %v2680_v32 = vpop.eup %2679  ;;  %v435_v15 = vadd.f32 %v434_v58, %v4485_v1 }
 0x130   :  { %v2682_v41 = vpop.eup %2681  ;;  %v736_v14 = vmul.f32 0.0, %v2680_v32 }
 0x135   :  { %v693_v51 = vpop.f32.mrf.mxu2 }
 0x136   :  { %v718_v59 = vadd.f32 %v693_v51, %v209_v31  ;;  %v713_v44 = vpop.f32.mrf.mxu3 }
 0x137   :  { %v719_v50 = vadd.f32 %v713_v44, %v250_v39 }
 0x138   :  { %2683 = vtanh.f32 %v718_v59 }
 0x139   :  { %v731_v17 = vsub.f32 0.0, %v719_v50 }
 0x13b   :  { %v732_v21 = vmul.f32 1.442695, %v731_v17 }
 0x13d   :  { %2685 = vpow2.f32 %v732_v21  ;;  %v809_v54 = vpop.f32.mrf.mxu2 }
 0x13e   :  { %v2684_v8 = vpop.eup %2683  ;;  %2687 = vrcp.f32 %v844_v45  ;;  %v834_v31 = vadd.f32 %v809_v54, %v394_v12  ;;  %v829_v51 = vpop.f32.mrf.mxu3  ;;  %v4582_v54 = vld [vmem:[%s6985_s2 + $0x1e0] sm:$0xff] }
 0x13f   :  { %2689 = vrcp.f32 %v839_v2  ;;  %v737_v39 = vmul.f32 %v2684_v8, %v2682_v41  ;;  %v835_v59 = vadd.f32 %v829_v51, %v435_v15  ;;  %v4588_v8 = vld [vmem:[%s6985_s2 + $0x1e8] sm:$0xff]  ;;  %v4600_v51 = vld [vmem:[%s6985_s2 + $0x1f8] sm:$0xff] }
 0x140   :  { %2691 = vtanh.f32 %v834_v31  ;;  %v4594_v31 = vld [vmem:[%s6985_s2 + $0x1f0] sm:$0xff] }
 0x141   :  { %v4567_v44 = vadd.f32 %v737_v39, %v736_v14  ;;  %v847_v40 = vsub.f32 0.0, %v835_v59  ;;  %v4606_v39 = vld [vmem:[%s6985_s2 + $0x1c0] sm:$0xff]  ;;  %v4612_v59 = vld [vmem:[%s6985_s2 + $0x1c8] sm:$0xff] }
 0x143   :  { %v2686_v50 = vpop.eup %2685  ;;  %v848_v43 = vmul.f32 1.442695, %v847_v40  ;;  %2693 = vtanh.f32 %v4567_v44 }
 0x144   :  { %v2688_v62 = vpop.eup %2687  ;;  %v734_v58 = vadd.f32 1.0, %v2686_v50  ;;  %v4618_v50 = vld [vmem:[%s6985_s2 + $0x1d0] sm:$0xff] }
 0x145   :  { %v2690_v1 = vpop.eup %2689  ;;  %2695 = vpow2.f32 %v848_v43  ;;  %v852_v12 = vmul.f32 0.0, %v2688_v62  ;;  %v4624_v43 = vld [vmem:[%s6985_s2 + $0x1d8] sm:$0xff] }
 0x146   :  { %v2692_v42 = vpop.eup %2691  ;;  %2697 = vrcp.f32 %v734_v58  ;;  %v4632_v58 = vld [vmem:[%s6985_s2 + $0x1a0] sm:$0xff] }
 0x147   :  { %v853_v17 = vmul.f32 %v2692_v42, %v2690_v1  ;;  %v4638_v1 = vld [vmem:[%s6985_s2 + $0x1a8] sm:$0xff]  ;;  %v4644_v42 = vld [vmem:[%s6985_s2 + $0x1b0] sm:$0xff] }
 0x149   :  { %v4570_v45 = vadd.f32 %v853_v17, %v852_v12  ;;  %v2694_v2 = vpop.eup %2693  ;;  %v4650_v12 = vld [vmem:[%s6985_s2 + $0x1b8] sm:$0xff]  ;;  %v4660_v17 = vld [vmem:[%s6985_s2 + $0x180] sm:$0xff] }
 0x14b   :  { %v2696_v15 = vpop.eup %2695  ;;  %2699 = vtanh.f32 %v4570_v45 }
 0x14c   :  { %v2698_v21 = vpop.eup %2697  ;;  %v850_v32 = vadd.f32 1.0, %v2696_v15  ;;  %v4672_v15 = vld [vmem:[%s6985_s2 + $0x190] sm:$0xff] }
 0x14d   :  { %v4572_v41 = vmul.f32 %v2698_v21, %v2694_v2  ;;  %v4666_v2 = vld [vmem:[%s6985_s2 + $0x188] sm:$0xff]  ;;  %v4678_v21 = vld [vmem:[%s6985_s2 + $0x198] sm:$0xff] }
 0x14e   :  { %2701 = vrcp.f32 %v850_v32  ;;  %v4684_v32 = vld [vmem:[%s6985_s2 + $0x160] sm:$0xff] }
 0x14f   :  { %7654 = vst [vmem:[#allocation58_spill] sm:$0xff] %v4572_v41  ;;  %884 = vmatmul.f32.vlgmr.msra.gmra.mxu0 %v4572_v41  ;;  %904 = vmatmul.f32.vlgmr.msra.gmra.mxu1 %v4572_v41 }
 0x150   :  { %924 = vmatmul.f32.vlgmr.msrb.gmra.mxu2 %v4572_v41  ;;  %944 = vmatmul.f32.vlgmr.msrb.gmra.mxu3 %v4572_v41  ;;  %v4708_v41 = vld [vmem:[%s6985_s2 + $0x140] sm:$0xff] }
 0x151   :  { %1100 = vmatpush.msra.mxu0 %v4582_v54  ;;  %1120 = vmatpush.msra.mxu1 %v4588_v8  ;;  %v2700_v14 = vpop.eup %2699  ;;  %7659 = vst [vmem:[#allocation86_spill] sm:$0xff] %v4708_v41 }
 0x152   :  { %1140 = vmatpush.msrb.mxu2 %v4594_v31  ;;  %1160 = vmatpush.msrb.mxu3 %v4600_v51 }
 0x153   :  { %1101 = vmatpush.msra.mxu0 %v4606_v39  ;;  %1121 = vmatpush.msra.mxu1 %v4612_v59 }
 0x154   :  { %v2702_v40 = vpop.eup %2701  ;;  %1141 = vmatpush.msrb.mxu2 %v4618_v50  ;;  %1161 = vmatpush.msrb.mxu3 %v4624_v43 }
 0x155   :  { %v4627_v62 = vmul.f32 %v2702_v40, %v2700_v14  ;;  %1102 = vmatpush.msra.mxu0 %v4632_v58  ;;  %1122 = vmatpush.msra.mxu1 %v4638_v1  ;;  %v4690_v14 = vld [vmem:[%s6985_s2 + $0x168] sm:$0xff]  ;;  %v4696_v40 = vld [vmem:[%s6985_s2 + $0x170] sm:$0xff] }
 0x156   :  { %1142 = vmatpush.msrb.mxu2 %v4644_v42  ;;  %1162 = vmatpush.msrb.mxu3 %v4650_v12  ;;  %7656 = vst [vmem:[#allocation64_spill] sm:$0xff] %v4690_v14 }
 0x157   :  { %7655 = vst [vmem:[#allocation61_spill] sm:$0xff] %v4627_v62  ;;  %1000 = vmatmul.f32.vlgmr.msrb.gmra.mxu0 %v4627_v62  ;;  %1020 = vmatmul.f32.vlgmr.msrb.gmra.mxu1 %v4627_v62 }
 0x158   :  { %1040 = vmatmul.f32.vlgmr.msra.gmra.mxu2 %v4627_v62  ;;  %1060 = vmatmul.f32.vlgmr.msra.gmra.mxu3 %v4627_v62  ;;  %7657 = vst [vmem:[#allocation65_spill] sm:$0xff] %v4696_v40  ;;  %v4702_v62 = vld [vmem:[%s6985_s2 + $0x178] sm:$0xff] }
 0x159   :  { %1103 = vmatpush.msra.mxu0 %v4660_v17  ;;  %1123 = vmatpush.msra.mxu1 %v4666_v2  ;;  %7658 = vst [vmem:[#allocation85_spill] sm:$0xff] %v4702_v62 }
 0x15a   :  { %1143 = vmatpush.msrb.mxu2 %v4672_v15  ;;  %1163 = vmatpush.msrb.mxu3 %v4678_v21 }
 0x15b   :  { %1104 = vmatpush.msra.mxu0 %v4684_v32  ;;  %1124 = vmatpush.msra.mxu1 %v4690_v14  ;;  %v4714_v14 = vld [vmem:[%s6985_s2 + $0x148] sm:$0xff] }
 0x15c   :  { %1144 = vmatpush.msrb.mxu2 %v4696_v40  ;;  %1164 = vmatpush.msrb.mxu3 %v4702_v62  ;;  %7660 = vst [vmem:[#allocation87_spill] sm:$0xff] %v4714_v14  ;;  %v4720_v40 = vld [vmem:[%s6985_s2 + $0x150] sm:$0xff]  ;;  %v4726_v62 = vld [vmem:[%s6985_s2 + $0x158] sm:$0xff] }
 0x15d   :  { %1105 = vmatpush.msra.mxu0 %v4708_v41  ;;  %1125 = vmatpush.msra.mxu1 %v4714_v14  ;;  %7661 = vst [vmem:[#allocation88_spill] sm:$0xff] %v4720_v40  ;;  %v4732_v41 = vld [vmem:[%s6985_s2 + $0x120] sm:$0xff]  ;;  %v4738_v14 = vld [vmem:[%s6985_s2 + $0x128] sm:$0xff] }
 0x15e   :  { %1145 = vmatpush.msrb.mxu2 %v4720_v40  ;;  %7662 = vst [vmem:[#allocation89_spill] sm:$0xff] %v4726_v62  ;;  %1165 = vmatpush.msrb.mxu3 %v4726_v62  ;;  %v4744_v40 = vld [vmem:[%s6985_s2 + $0x130] sm:$0xff]  ;;  %v4750_v62 = vld [vmem:[%s6985_s2 + $0x138] sm:$0xff] }
 0x15f   :  { %7663 = vst [vmem:[#allocation90_spill] sm:$0xff] %v4732_v41  ;;  %1106 = vmatpush.msra.mxu0 %v4732_v41  ;;  %1126 = vmatpush.msra.mxu1 %v4738_v14  ;;  %v4756_v41 = vld [vmem:[%s6985_s2 + $0x100] sm:$0xff] }
 0x160   :  { %7664 = vst [vmem:[#allocation91_spill] sm:$0xff] %v4738_v14  ;;  %1146 = vmatpush.msrb.mxu2 %v4744_v40  ;;  %1166 = vmatpush.msrb.mxu3 %v4750_v62  ;;  %v4762_v14 = vld [vmem:[%s6985_s2 + $0x108] sm:$0xff] }
 0x161   :  { %7665 = vst [vmem:[#allocation92_spill] sm:$0xff] %v4744_v40  ;;  %1107 = vmatpush.msra.mxu0 %v4756_v41  ;;  %1127 = vmatpush.msra.mxu1 %v4762_v14  ;;  %v4768_v40 = vld [vmem:[%s6985_s2 + $0x110] sm:$0xff] }
 0x162   :  { %7666 = vst [vmem:[#allocation93_spill] sm:$0xff] %v4750_v62  ;;  %1147 = vmatpush.msrb.mxu2 %v4768_v40  ;;  %v4774_v62 = vld [vmem:[%s6985_s2 + $0x118] sm:$0xff] }
 0x163   :  { %7667 = vst [vmem:[#allocation94_spill] sm:$0xff] %v4756_v41  ;;  %1167 = vmatpush.msrb.mxu3 %v4774_v62  ;;  %v4780_v41 = vld [vmem:[%s6985_s2 + $0xe0] sm:$0xff] }
 0x164   :  { %7668 = vst [vmem:[#allocation95_spill] sm:$0xff] %v4762_v14  ;;  %1108 = vmatpush.msra.mxu0 %v4780_v41  ;;  %v4786_v14 = vld [vmem:[%s6985_s2 + $0xe8] sm:$0xff] }
 0x165   :  { %7669 = vst [vmem:[#allocation96_spill] sm:$0xff] %v4768_v40  ;;  %1128 = vmatpush.msra.mxu1 %v4786_v14  ;;  %v4792_v40 = vld [vmem:[%s6985_s2 + $0xf0] sm:$0xff] }
 0x166   :  { %7670 = vst [vmem:[#allocation97_spill] sm:$0xff] %v4774_v62  ;;  %1148 = vmatpush.msrb.mxu2 %v4792_v40  ;;  %v4798_v62 = vld [vmem:[%s6985_s2 + $0xf8] sm:$0xff] }
 0x167   :  { %7671 = vst [vmem:[#allocation98_spill] sm:$0xff] %v4780_v41  ;;  %1168 = vmatpush.msrb.mxu3 %v4798_v62  ;;  %v4804_v41 = vld [vmem:[%s6985_s2 + $0xc0] sm:$0xff] }
 0x168   :  { %7672 = vst [vmem:[#allocation99_spill] sm:$0xff] %v4786_v14  ;;  %1109 = vmatpush.msra.mxu0 %v4804_v41  ;;  %v4810_v14 = vld [vmem:[%s6985_s2 + $0xc8] sm:$0xff] }
 0x169   :  { %7673 = vst [vmem:[#allocation100_spill] sm:$0xff] %v4792_v40  ;;  %1129 = vmatpush.msra.mxu1 %v4810_v14  ;;  %v4816_v40 = vld [vmem:[%s6985_s2 + $0xd0] sm:$0xff] }
 0x16a   :  { %7674 = vst [vmem:[#allocation101_spill] sm:$0xff] %v4798_v62  ;;  %1149 = vmatpush.msrb.mxu2 %v4816_v40  ;;  %v4822_v62 = vld [vmem:[%s6985_s2 + $0xd8] sm:$0xff] }
 0x16b   :  { %7675 = vst [vmem:[#allocation102_spill] sm:$0xff] %v4804_v41  ;;  %1169 = vmatpush.msrb.mxu3 %v4822_v62  ;;  %v4828_v41 = vld [vmem:[%s6985_s2 + $0xa0] sm:$0xff] }
 0x16c   :  { %7676 = vst [vmem:[#allocation103_spill] sm:$0xff] %v4810_v14  ;;  %1110 = vmatpush.msra.mxu0 %v4828_v41  ;;  %v4834_v14 = vld [vmem:[%s6985_s2 + $0xa8] sm:$0xff]  ;;  %1150 = vmatpush.msrb.mxu2 %v7569_v20  ;;  %v4856_v20 = vld [vmem:[%s6985_s2 + $0x60] sm:$0xff] }
 0x16d   :  { %7677 = vst [vmem:[#allocation104_spill] sm:$0xff] %v4822_v62  ;;  %1130 = vmatpush.msra.mxu1 %v4834_v14  ;;  %1170 = vmatpush.msrb.mxu3 %v7571_v26  ;;  %v4842_v62 = vld [vmem:[%s6985_s2 + $0x80] sm:$0xff]  ;;  %v4862_v26 = vld [vmem:[%s6985_s2 + $0x68] sm:$0xff] }
 0x16e   :  { %7678 = vst [vmem:[#allocation105_spill] sm:$0xff] %v4828_v41  ;;  %1111 = vmatpush.msra.mxu0 %v4842_v62  ;;  %v4848_v41 = vld [vmem:[%s6985_s2 + $0x88] sm:$0xff]  ;;  %1151 = vmatpush.msrb.mxu2 %v7573_v28  ;;  %v4870_v28 = vld [vmem:[%s6985_s2 + $0x40] sm:$0xff] }
 0x16f   :  { %7679 = vst [vmem:[#allocation106_spill] sm:$0xff] %v4834_v14  ;;  %1131 = vmatpush.msra.mxu1 %v4848_v41  ;;  %1171 = vmatpush.msrb.mxu3 %v7575_v36  ;;  %v4876_v36 = vld [vmem:[%s6985_s2 + $0x48] sm:$0xff] }
 0x170   :  { %7680 = vst [vmem:[#allocation107_spill] sm:$0xff] %v4842_v62  ;;  %1112 = vmatpush.msra.mxu0 %v4856_v20  ;;  %1152 = vmatpush.msrb.mxu2 %v7578_v57  ;;  %v4884_v57 = vld [vmem:[%s6985_s2 + $0x20] sm:$0xff] }
 0x171   :  { %7681 = vst [vmem:[#allocation108_spill] sm:$0xff] %v4848_v41  ;;  %1132 = vmatpush.msra.mxu1 %v4862_v26  ;;  %1172 = vmatpush.msrb.mxu3 %v7580_v60  ;;  %v4890_v60 = vld [vmem:[%s6985_s2 + $0x28] sm:$0xff] }
 0x172   :  { %7682 = vst [vmem:[#allocation109_spill] sm:$0xff] %v4856_v20  ;;  %1113 = vmatpush.msra.mxu0 %v4870_v28  ;;  %1153 = vmatpush.msrb.mxu2 %v7583_v0  ;;  %v4898_v0 = vld [vmem:[%s6985_s2] sm:$0xff] }
 0x173   :  { %7683 = vst [vmem:[#allocation110_spill] sm:$0xff] %v4862_v26  ;;  %1133 = vmatpush.msra.mxu1 %v4876_v36  ;;  %1173 = vmatpush.msrb.mxu3 %v7586_v5  ;;  %v4904_v5 = vld [vmem:[%s6985_s2 + $0x8] sm:$0xff] }
 0x174   :  { %7684 = vst [vmem:[#allocation111_spill] sm:$0xff] %v4870_v28  ;;  %1114 = vmatpush.msra.mxu0 %v4884_v57  ;;  %1154 = vmatpush.msrb.mxu2 %v7588_v7  ;;  %v4912_v7 = vld [vmem:[%s6986_s3 + $0x1e0] sm:$0xff] }
 0x175   :  { %7685 = vst [vmem:[#allocation112_spill] sm:$0xff] %v4876_v36  ;;  %1134 = vmatpush.msra.mxu1 %v4890_v60  ;;  %1174 = vmatpush.msrb.mxu3 %v7590_v11  ;;  %v4918_v11 = vld [vmem:[%s6986_s3 + $0x1e8] sm:$0xff] }
 0x176   :  { %7686 = vst [vmem:[#allocation113_spill] sm:$0xff] %v4884_v57  ;;  %1115 = vmatpush.msra.mxu0 %v4898_v0  ;;  %1155 = vmatpush.msrb.mxu2 %v7592_v13  ;;  %v4926_v13 = vld [vmem:[%s6986_s3 + $0x1c0] sm:$0xff] }
 0x177   :  { %7687 = vst [vmem:[#allocation114_spill] sm:$0xff] %v4890_v60  ;;  %1135 = vmatpush.msra.mxu1 %v4904_v5  ;;  %1175 = vmatpush.msrb.mxu3 %v7594_v16  ;;  %v4932_v16 = vld [vmem:[%s6986_s3 + $0x1c8] sm:$0xff] }
 0x178   :  { %7688 = vst [vmem:[#allocation115_spill] sm:$0xff] %v4898_v0  ;;  %1216 = vmatpush.msrb.mxu0 %v4912_v7  ;;  %1256 = vmatpush.msra.mxu2 %v7595_v18  ;;  %v4940_v18 = vld [vmem:[%s6986_s3 + $0x1a0] sm:$0xff] }
 0x179   :  { %7689 = vst [vmem:[#allocation116_spill] sm:$0xff] %v4904_v5  ;;  %1236 = vmatpush.msrb.mxu1 %v4918_v11  ;;  %1276 = vmatpush.msra.mxu3 %v7596_v19  ;;  %v4946_v19 = vld [vmem:[%s6986_s3 + $0x1a8] sm:$0xff] }
 0x17a   :  { %7690 = vst [vmem:[#allocation117_spill] sm:$0xff] %v4912_v7  ;;  %1217 = vmatpush.msrb.mxu0 %v4926_v13  ;;  %1257 = vmatpush.msra.mxu2 %v7599_v52  ;;  %v4960_v52 = vld [vmem:[%s6986_s3 + $0x188] sm:$0xff] }
 0x17b   :  { %7691 = vst [vmem:[#allocation118_spill] sm:$0xff] %v4918_v11  ;;  %1237 = vmatpush.msrb.mxu1 %v4932_v16  ;;  %1277 = vmatpush.msra.mxu3 %v7603_v3  ;;  %v4954_v3 = vld [vmem:[%s6986_s3 + $0x180] sm:$0xff] }
 0x17c   :  { %7692 = vst [vmem:[#allocation119_spill] sm:$0xff] %v4926_v13  ;;  %1218 = vmatpush.msrb.mxu0 %v4940_v18  ;;  %1258 = vmatpush.msra.mxu2 %v7606_v47  ;;  %v4974_v47 = vld [vmem:[%s6986_s3 + $0x168] sm:$0xff] }
 0x17d   :  { %7693 = vst [vmem:[#allocation120_spill] sm:$0xff] %v4932_v16  ;;  %1238 = vmatpush.msrb.mxu1 %v4946_v19  ;;  %1278 = vmatpush.msra.mxu3 %v7607_v46  ;;  %v4968_v46 = vld [vmem:[%s6986_s3 + $0x160] sm:$0xff] }
 0x17e   :  { %7694 = vst [vmem:[#allocation121_spill] sm:$0xff] %v4940_v18  ;;  %1219 = vmatpush.msrb.mxu0 %v4954_v3  ;;  %1259 = vmatpush.msra.mxu2 %v7608_v27  ;;  %v4988_v27 = vld [vmem:[%s6986_s3 + $0x148] sm:$0xff] }
 0x17f   :  { %7695 = vst [vmem:[#allocation122_spill] sm:$0xff] %v4946_v19  ;;  %1239 = vmatpush.msrb.mxu1 %v4960_v52  ;;  %1279 = vmatpush.msra.mxu3 %v7609_v37  ;;  %v4982_v37 = vld [vmem:[%s6986_s3 + $0x140] sm:$0xff] }
 0x180   :  { %7696 = vst [vmem:[#allocation123_spill] sm:$0xff] %v4954_v3  ;;  %1220 = vmatpush.msrb.mxu0 %v4968_v46  ;;  %1260 = vmatpush.msra.mxu2 %v7610_v61  ;;  %v5002_v61 = vld [vmem:[%s6986_s3 + $0x128] sm:$0xff] }
 0x181   :  { %7697 = vst [vmem:[#allocation124_spill] sm:$0xff] %v4960_v52  ;;  %1240 = vmatpush.msrb.mxu1 %v4974_v47  ;;  %1280 = vmatpush.msra.mxu3 %v7611_v9  ;;  %v4996_v9 = vld [vmem:[%s6986_s3 + $0x120] sm:$0xff] }
 0x182   :  { %7698 = vst [vmem:[#allocation125_spill] sm:$0xff] %v4968_v46  ;;  %1221 = vmatpush.msrb.mxu0 %v4982_v37  ;;  %1261 = vmatpush.msra.mxu2 %v7612_v33  ;;  %v5016_v33 = vld [vmem:[%s6986_s3 + $0x108] sm:$0xff] }
 0x183   :  { %7699 = vst [vmem:[#allocation126_spill] sm:$0xff] %v4974_v47  ;;  %1241 = vmatpush.msrb.mxu1 %v4988_v27  ;;  %1281 = vmatpush.msra.mxu3 %v7614_v49  ;;  %v5010_v49 = vld [vmem:[%s6986_s3 + $0x100] sm:$0xff] }
 0x184   :  { %7700 = vst [vmem:[#allocation127_spill] sm:$0xff] %v4982_v37  ;;  %1222 = vmatpush.msrb.mxu0 %v4996_v9  ;;  %1262 = vmatpush.msra.mxu2 %v4123_v24  ;;  %v5024_v24 = vld [vmem:[%s6986_s3 + $0xe0] sm:$0xff]  ;;  %v7736_v37 = vld [vmem:[#allocation27_spill] sm:$0xff] }
 0x185   :  { %7701 = vst [vmem:[#allocation128_spill] sm:$0xff] %v4988_v27  ;;  %1242 = vmatpush.msrb.mxu1 %v5002_v61  ;;  %1282 = vmatpush.msra.mxu3 %v7618_v63  ;;  %v5030_v63 = vld [vmem:[%s6986_s3 + $0xe8] sm:$0xff]  ;;  %v7734_v27 = vld [vmem:[#allocation30_spill] sm:$0xff] }
 0x186   :  { %7702 = vst [vmem:[#allocation129_spill] sm:$0xff] %v4996_v9  ;;  %1223 = vmatpush.msrb.mxu0 %v5010_v49  ;;  %1263 = vmatpush.msra.mxu2 %v4141_v30  ;;  %v5044_v30 = vld [vmem:[%s6986_s3 + $0xc8] sm:$0xff] }
 0x187   :  { %7703 = vst [vmem:[#allocation130_spill] sm:$0xff] %v5002_v61  ;;  %1243 = vmatpush.msrb.mxu1 %v5016_v33  ;;  %1283 = vmatpush.msra.mxu3 %v4146_v29  ;;  %v5038_v29 = vld [vmem:[%s6986_s3 + $0xc0] sm:$0xff]  ;;  %v7733_v9 = vld [vmem:[#allocation49_spill] sm:$0xff] }
 0x188   :  { %7704 = vst [vmem:[#allocation131_spill] sm:$0xff] %v5010_v49  ;;  %1224 = vmatpush.msrb.mxu0 %v5024_v24  ;;  %1264 = vmatpush.msra.mxu2 %v7619_v4  ;;  %v5058_v4 = vld [vmem:[%s6986_s3 + $0xa8] sm:$0xff] }
 0x189   :  { %7705 = vst [vmem:[#allocation132_spill] sm:$0xff] %v5016_v33  ;;  %1244 = vmatpush.msrb.mxu1 %v5030_v63  ;;  %1284 = vmatpush.msra.mxu3 %v7620_v56  ;;  %v5052_v56 = vld [vmem:[%s6986_s3 + $0xa0] sm:$0xff] }
 0x18a   :  { %7706 = vst [vmem:[#allocation133_spill] sm:$0xff] %v5024_v24  ;;  %1225 = vmatpush.msrb.mxu0 %v5038_v29  ;;  %1265 = vmatpush.msra.mxu2 %v4169_v53  ;;  %v7712_v53 = vld [vmem:[#allocation48_spill] sm:$0xff] }
 0x18b   :  { %7707 = vst [vmem:[#allocation134_spill] sm:$0xff] %v5030_v63  ;;  %1245 = vmatpush.msrb.mxu1 %v5044_v30  ;;  %1285 = vmatpush.msra.mxu3 %v4178_v34  ;;  %v7713_v34 = vld [vmem:[#allocation68_spill] sm:$0xff] }
 0x18c   :  { %7708 = vst [vmem:[#allocation135_spill] sm:$0xff] %v5038_v29  ;;  %1226 = vmatpush.msrb.mxu0 %v5052_v56  ;;  %1266 = vmatpush.msra.mxu2 %v4184_v35  ;;  %v7716_v35 = vld [vmem:[#allocation52_spill] sm:$0xff]  ;;  %v7730_v29 = vld [vmem:[#allocation82_spill] sm:$0xff] }
 0x18d   :  { %7709 = vst [vmem:[#allocation136_spill] sm:$0xff] %v5044_v30  ;;  %1246 = vmatpush.msrb.mxu1 %v5058_v4  ;;  %1286 = vmatpush.msra.mxu3 %v4193_v23  ;;  %v7717_v23 = vld [vmem:[#allocation70_spill] sm:$0xff] }
 0x18e   :  { %7710 = vst [vmem:[#allocation137_spill] sm:$0xff] %v5052_v56  ;;  %1227 = vmatpush.msrb.mxu0 %v7584_v22  ;;  %1267 = vmatpush.msra.mxu2 %v4202_v25  ;;  %v7714_v56 = vld [vmem:[#allocation69_spill] sm:$0xff]  ;;  %v7718_v22 = vld [vmem:[#allocation71_spill] sm:$0xff]  ;;  %v7720_v25 = vld [vmem:[#allocation56_spill] sm:$0xff] }
 0x18f   :  { %7711 = vst [vmem:[#allocation138_spill] sm:$0xff] %v5058_v4  ;;  %1247 = vmatpush.msrb.mxu1 %v7587_v6  ;;  %1287 = vmatpush.msra.mxu3 %v4209_v38  ;;  %v7715_v4 = vld [vmem:[#allocation51_spill] sm:$0xff]  ;;  %v7721_v38 = vld [vmem:[#allocation72_spill] sm:$0xff] }
 0x190   :  { %1228 = vmatpush.msrb.mxu0 %v7589_v10  ;;  %1268 = vmatpush.msra.mxu2 %v7713_v34  ;;  %v7719_v6 = vld [vmem:[#allocation55_spill] sm:$0xff]  ;;  %v7722_v10 = vld [vmem:[#allocation74_spill] sm:$0xff]  ;;  %v7724_v34 = vld [vmem:[#allocation60_spill] sm:$0xff] }
 0x191   :  { %1248 = vmatpush.msrb.mxu1 %v7712_v53  ;;  %1288 = vmatpush.msra.mxu3 %v7714_v56  ;;  %v7723_v53 = vld [vmem:[#allocation59_spill] sm:$0xff]  ;;  %v7725_v56 = vld [vmem:[#allocation76_spill] sm:$0xff] }
 0x192   :  { %1229 = vmatpush.msrb.mxu0 %v7715_v4  ;;  %1269 = vmatpush.msra.mxu2 %v7717_v23  ;;  %v7726_v4 = vld [vmem:[#allocation77_spill] sm:$0xff]  ;;  %v7728_v23 = vld [vmem:[#allocation83_spill] sm:$0xff] }
 0x193   :  { %1249 = vmatpush.msrb.mxu1 %v7716_v35  ;;  %1289 = vmatpush.msra.mxu3 %v7718_v22  ;;  %v7727_v35 = vld [vmem:[#allocation42_spill] sm:$0xff] }
 0x194   :  { %1230 = vmatpush.msrb.mxu0 %v7719_v6  ;;  %1270 = vmatpush.msra.mxu2 %v7721_v38  ;;  %v130_v30 = vadd.f32 %v7728_v23, %v7727_v35  ;;  %v7729_v22 = vld [vmem:[#allocation38_spill] sm:$0xff]  ;;  %v309_v23 = vadd.f32 %v7734_v27, %v7733_v9  ;;  %v7735_v35 = vld [vmem:[#allocation45_spill] sm:$0xff] }
 0x195   :  { %1250 = vmatpush.msrb.mxu1 %v7720_v25  ;;  %1290 = vmatpush.msra.mxu3 %v7722_v10  ;;  %v171_v6 = vadd.f32 %v7730_v29, %v7729_v22  ;;  %v350_v29 = vadd.f32 %v7736_v37, %v7735_v35 }
 0x196   :  { %1231 = vmatpush.msrb.mxu0 %v7723_v53  ;;  %1271 = vmatpush.msra.mxu2 %v7725_v56  ;;  %v7732_v56 = vld [vmem:[#allocation84_spill] sm:$0xff] }
 0x197   :  { %1251 = vmatpush.msrb.mxu1 %v7724_v34  ;;  %1291 = vmatpush.msra.mxu3 %v7726_v4  ;;  %v7731_v34 = vld [vmem:[#allocation13_spill] sm:$0xff]  ;;  %v212_v4 = vadd.f32 %v7732_v56, %v4556_v48 }
 0x198   :  { %v253_v61 = vadd.f32 %v7731_v34, %v4559_v55 }
 0x1cc   :  { %v885_v63 = vpop.f32.mrf.mxu0  ;;  %v905_v25 = vpop.f32.mrf.mxu1 }
 0x1cd   :  { %v948_v24 = vadd.f32 %v885_v63, %v130_v30  ;;  %v949_v38 = vadd.f32 %v905_v25, %v171_v6 }
 0x1cf   :  { %v952_v33 = vsub.f32 0.0, %v948_v24  ;;  %v957_v10 = vsub.f32 0.0, %v949_v38 }
 0x1d1   :  { %v953_v49 = vmul.f32 1.442695, %v952_v33  ;;  %v958_v53 = vmul.f32 1.442695, %v957_v10 }
 0x1d3   :  { %2703 = vpow2.f32 %v953_v49  ;;  %v925_v22 = vpop.f32.mrf.mxu2  ;;  %v945_v63 = vpop.f32.mrf.mxu3 }
 0x1d4   :  { %2705 = vpow2.f32 %v958_v53  ;;  %v951_v24 = vadd.f32 %v945_v63, %v253_v61  ;;  %v1001_v30 = vpop.f32.mrf.mxu0  ;;  %v1021_v33 = vpop.f32.mrf.mxu1  ;;  %v950_v6 = vadd.f32 %v925_v22, %v212_v4  ;;  %v7737_v63 = vld [vmem:[#allocation53_spill] sm:$0xff]  ;;  %v7738_v4 = vld [vmem:[#allocation50_spill] sm:$0xff] }
 0x1d5   :  { %v1064_v25 = vadd.f32 %v1001_v30, %v309_v23  ;;  %v1065_v38 = vadd.f32 %v1021_v33, %v350_v29 }
 0x1d6   :  { %v963_v10 = vsub.f32 0.0, %v951_v24  ;;  %2707 = vtanh.f32 %v950_v6 }
 0x1d7   :  { %v1068_v34 = vsub.f32 0.0, %v1064_v25  ;;  %v1073_v55 = vsub.f32 0.0, %v1065_v38 }
 0x1d8   :  { %v964_v56 = vmul.f32 1.442695, %v963_v10 }
 0x1d9   :  { %v2704_v48 = vpop.eup %2703  ;;  %v1069_v27 = vmul.f32 1.442695, %v1068_v34  ;;  %v1074_v37 = vmul.f32 1.442695, %v1073_v55 }
 0x1da   :  { %v2706_v9 = vpop.eup %2705  ;;  %v955_v47 = vadd.f32 1.0, %v2704_v48  ;;  %2709 = vpow2.f32 %v964_v56 }
 0x1db   :  { %v960_v49 = vadd.f32 1.0, %v2706_v9  ;;  %2711 = vpow2.f32 %v1069_v27  ;;  %v1041_v53 = vpop.f32.mrf.mxu2  ;;  %v1061_v61 = vpop.f32.mrf.mxu3 }
 0x1dc   :  { %2713 = vrcp.f32 %v955_v47  ;;  %v1067_v22 = vadd.f32 %v1061_v61, %v7737_v63  ;;  %v1066_v23 = vadd.f32 %v1041_v53, %v7738_v4  ;;  %v2708_v24 = vpop.eup %2707 }
 0x1dd   :  { %2715 = vrcp.f32 %v960_v49 }
 0x1de   :  { %2717 = vpow2.f32 %v1074_v37  ;;  %v1079_v29 = vsub.f32 0.0, %v1067_v22 }
 0x1df   :  { %2719 = vtanh.f32 %v1066_v23 }
 0x1e0   :  { %v2710_v30 = vpop.eup %2709  ;;  %v1080_v33 = vmul.f32 1.442695, %v1079_v29 }
 0x1e1   :  { %v2712_v6 = vpop.eup %2711  ;;  %v966_v48 = vadd.f32 1.0, %v2710_v30 }
 0x1e2   :  { %v2714_v25 = vpop.eup %2713  ;;  %v1071_v38 = vadd.f32 1.0, %v2712_v6  ;;  %2721 = vpow2.f32 %v1080_v33  ;;  %v7741_v33 = vld [vmem:[#allocation64_spill] sm:$0xff]  ;;  %v7742_v6 = vld [vmem:[#allocation65_spill] sm:$0xff] }
 0x1e3   :  { %v2716_v55 = vpop.eup %2715  ;;  %v969_v9 = vmul.f32 %v2714_v25, %v2708_v24  ;;  %v7743_v25 = vld [vmem:[#allocation85_spill] sm:$0xff] }
 0x1e4   :  { %v2718_v10 = vpop.eup %2717  ;;  %v968_v47 = vmul.f32 %v2716_v55, %v4567_v44  ;;  %2723 = vrcp.f32 %v1071_v38  ;;  %v7745_v38 = vld [vmem:[#allocation87_spill] sm:$0xff]  ;;  %v7746_v55 = vld [vmem:[#allocation88_spill] sm:$0xff] }
 0x1e5   :  { %v1076_v34 = vadd.f32 1.0, %v2718_v10  ;;  %2725 = vrcp.f32 %v966_v48  ;;  %v2720_v27 = vpop.eup %2719  ;;  %v7744_v48 = vld [vmem:[#allocation86_spill] sm:$0xff] }
 0x1e6   :  { %v5098_v56 = vadd.f32 %v969_v9, %v968_v47  ;;  %v7747_v9 = vld [vmem:[#allocation89_spill] sm:$0xff]  ;;  %v7748_v10 = vld [vmem:[#allocation90_spill] sm:$0xff]  ;;  %v7749_v47 = vld [vmem:[#allocation91_spill] sm:$0xff] }
 0x1e7   :  { %2727 = vrcp.f32 %v1076_v34  ;;  %v7750_v34 = vld [vmem:[#allocation92_spill] sm:$0xff] }
 0x1e8   :  { %2729 = vtanh.f32 %v5098_v56  ;;  %v2722_v37 = vpop.eup %2721 }
 0x1e9   :  { %v1082_v22 = vadd.f32 1.0, %v2722_v37  ;;  %v7752_v37 = vld [vmem:[#allocation94_spill] sm:$0xff] }
 0x1ea   :  { %v2724_v49 = vpop.eup %2723 }
 0x1eb   :  { %v1085_v53 = vmul.f32 %v2724_v49, %v2720_v27  ;;  %v2726_v61 = vpop.eup %2725  ;;  %2731 = vrcp.f32 %v1082_v22  ;;  %v7751_v27 = vld [vmem:[#allocation93_spill] sm:$0xff]  ;;  %v7753_v49 = vld [vmem:[#allocation95_spill] sm:$0xff] }
 0x1ec   :  { %v7757_v22 = vld [vmem:[#allocation99_spill] sm:$0xff] }
 0x1ed   :  { %v2728_v63 = vpop.eup %2727 }
 0x1ee   :  { %v2730_v4 = vpop.eup %2729  ;;  %v1084_v23 = vmul.f32 %v2728_v63, %v4570_v45  ;;  %v7756_v63 = vld [vmem:[#allocation98_spill] sm:$0xff] }
 0x1ef   :  { %v5102_v29 = vmul.f32 %v2730_v4, %v2726_v61  ;;  %v7755_v61 = vld [vmem:[#allocation97_spill] sm:$0xff]  ;;  %v7758_v4 = vld [vmem:[#allocation100_spill] sm:$0xff] }
 0x1f0   :  { %v5104_v44 = vadd.f32 %v1085_v53, %v1084_v23  ;;  %v7754_v53 = vld [vmem:[#allocation96_spill] sm:$0xff]  ;;  %v7759_v23 = vld [vmem:[#allocation101_spill] sm:$0xff] }
 0x1f1   :  { %7739 = vst [vmem:[#allocation48_spill] sm:$0xff] %v5102_v29  ;;  %1116 = vmatmul.f32.vlgmr.msra.gmra.mxu0 %v5102_v29  ;;  %1136 = vmatmul.f32.vlgmr.msra.gmra.mxu1 %v5102_v29  ;;  %v2732_v45 = vpop.eup %2731 }
 0x1f2   :  { %2733 = vtanh.f32 %v5104_v44  ;;  %1156 = vmatmul.f32.vlgmr.msrb.gmra.mxu2 %v5102_v29  ;;  %1176 = vmatmul.f32.vlgmr.msrb.gmra.mxu3 %v5102_v29  ;;  %v7763_v29 = vld [vmem:[#allocation105_spill] sm:$0xff] }
 0x1f3   :  { %1332 = vmatpush.msra.mxu0 %v4582_v54  ;;  %1352 = vmatpush.msra.mxu1 %v4588_v8 }
 0x1f4   :  { %1372 = vmatpush.msrb.mxu2 %v4594_v31  ;;  %1392 = vmatpush.msrb.mxu3 %v4600_v51 }
 0x1f5   :  { %1333 = vmatpush.msra.mxu0 %v4606_v39  ;;  %1353 = vmatpush.msra.mxu1 %v4612_v59 }
 0x1f6   :  { %1373 = vmatpush.msrb.mxu2 %v4618_v50  ;;  %1393 = vmatpush.msrb.mxu3 %v4624_v43 }
 0x1f7   :  { %1334 = vmatpush.msra.mxu0 %v4632_v58  ;;  %1354 = vmatpush.msra.mxu1 %v4638_v1 }
 0x1f8   :  { %v2734_v24 = vpop.eup %2733  ;;  %1374 = vmatpush.msrb.mxu2 %v4644_v42  ;;  %1394 = vmatpush.msrb.mxu3 %v4650_v12 }
 0x1f9   :  { %v5123_v30 = vmul.f32 %v2734_v24, %v2732_v45  ;;  %1335 = vmatpush.msra.mxu0 %v4660_v17  ;;  %1355 = vmatpush.msra.mxu1 %v4666_v2  ;;  %v7760_v45 = vld [vmem:[#allocation102_spill] sm:$0xff]  ;;  %v7761_v24 = vld [vmem:[#allocation103_spill] sm:$0xff] }
 0x1fa   :  { %1375 = vmatpush.msrb.mxu2 %v4672_v15  ;;  %1395 = vmatpush.msrb.mxu3 %v4678_v21 }
 0x1fb   :  { %7740 = vst [vmem:[#allocation68_spill] sm:$0xff] %v5123_v30  ;;  %1232 = vmatmul.f32.vlgmr.msrb.gmra.mxu0 %v5123_v30  ;;  %1252 = vmatmul.f32.vlgmr.msrb.gmra.mxu1 %v5123_v30 }
 0x1fc   :  { %1272 = vmatmul.f32.vlgmr.msra.gmra.mxu2 %v5123_v30  ;;  %1292 = vmatmul.f32.vlgmr.msra.gmra.mxu3 %v5123_v30  ;;  %v7762_v30 = vld [vmem:[#allocation104_spill] sm:$0xff] }
 0x1fd   :  { %1336 = vmatpush.msra.mxu0 %v4684_v32  ;;  %1356 = vmatpush.msra.mxu1 %v7741_v33 }
 0x1fe   :  { %1376 = vmatpush.msrb.mxu2 %v7742_v6  ;;  %1396 = vmatpush.msrb.mxu3 %v7743_v25 }
 0x1ff   :  { %1337 = vmatpush.msra.mxu0 %v7744_v48  ;;  %1357 = vmatpush.msra.mxu1 %v7745_v38 }
 0x200   :  { %1377 = vmatpush.msrb.mxu2 %v7746_v55  ;;  %1397 = vmatpush.msrb.mxu3 %v7747_v9 }
 0x201   :  { %1338 = vmatpush.msra.mxu0 %v7748_v10  ;;  %1358 = vmatpush.msra.mxu1 %v7749_v47 }
 0x202   :  { %1378 = vmatpush.msrb.mxu2 %v7750_v34  ;;  %1398 = vmatpush.msrb.mxu3 %v7751_v27 }
 0x203   :  { %1339 = vmatpush.msra.mxu0 %v7752_v37  ;;  %1359 = vmatpush.msra.mxu1 %v7753_v49 }
 0x204   :  { %1379 = vmatpush.msrb.mxu2 %v7754_v53  ;;  %1399 = vmatpush.msrb.mxu3 %v7755_v61 }
 0x205   :  { %1340 = vmatpush.msra.mxu0 %v7756_v63  ;;  %1360 = vmatpush.msra.mxu1 %v7757_v22  ;;  %v5162_v22 = vld [vmem:[%s6985_s2 + $0xb0] sm:$0xff] }
 0x206   :  { %1380 = vmatpush.msrb.mxu2 %v7758_v4  ;;  %1400 = vmatpush.msrb.mxu3 %v7759_v23  ;;  %7764 = vst [vmem:[#allocation69_spill] sm:$0xff] %v5162_v22 }
 0x207   :  { %1341 = vmatpush.msra.mxu0 %v7760_v45  ;;  %1361 = vmatpush.msra.mxu1 %v7761_v24  ;;  %v5168_v45 = vld [vmem:[%s6985_s2 + $0xb8] sm:$0xff] }
 0x208   :  { %1381 = vmatpush.msrb.mxu2 %v4816_v40  ;;  %1401 = vmatpush.msrb.mxu3 %v7762_v30  ;;  %7765 = vst [vmem:[#allocation51_spill] sm:$0xff] %v5168_v45 }
 0x209   :  { %1342 = vmatpush.msra.mxu0 %v7763_v29  ;;  %1362 = vmatpush.msra.mxu1 %v4834_v14  ;;  %v5176_v14 = vld [vmem:[%s6985_s2 + $0x90] sm:$0xff] }
 0x20a   :  { %1382 = vmatpush.msrb.mxu2 %v5162_v22  ;;  %1402 = vmatpush.msrb.mxu3 %v5168_v45  ;;  %7766 = vst [vmem:[#allocation52_spill] sm:$0xff] %v5176_v14  ;;  %v5182_v22 = vld [vmem:[%s6985_s2 + $0x98] sm:$0xff] }
 0x20b   :  { %1343 = vmatpush.msra.mxu0 %v4842_v62  ;;  %1363 = vmatpush.msra.mxu1 %v4848_v41  ;;  %7767 = vst [vmem:[#allocation70_spill] sm:$0xff] %v5182_v22  ;;  %v5190_v41 = vld [vmem:[%s6985_s2 + $0x70] sm:$0xff] }
 0x20c   :  { %1383 = vmatpush.msrb.mxu2 %v5176_v14  ;;  %1403 = vmatpush.msrb.mxu3 %v5182_v22  ;;  %7768 = vst [vmem:[#allocation71_spill] sm:$0xff] %v5190_v41  ;;  %v5196_v14 = vld [vmem:[%s6985_s2 + $0x78] sm:$0xff] }
 0x20d   :  { %1344 = vmatpush.msra.mxu0 %v4856_v20  ;;  %1364 = vmatpush.msra.mxu1 %v4862_v26  ;;  %7769 = vst [vmem:[#allocation55_spill] sm:$0xff] %v5196_v14  ;;  %v5204_v26 = vld [vmem:[%s6985_s2 + $0x50] sm:$0xff] }
 0x20e   :  { %1384 = vmatpush.msrb.mxu2 %v5190_v41  ;;  %1404 = vmatpush.msrb.mxu3 %v5196_v14  ;;  %7770 = vst [vmem:[#allocation56_spill] sm:$0xff] %v5204_v26  ;;  %v5210_v41 = vld [vmem:[%s6985_s2 + $0x58] sm:$0xff] }
 0x20f   :  { %1345 = vmatpush.msra.mxu0 %v4870_v28  ;;  %1365 = vmatpush.msra.mxu1 %v4876_v36  ;;  %7771 = vst [vmem:[#allocation72_spill] sm:$0xff] %v5210_v41  ;;  %v5218_v36 = vld [vmem:[%s6985_s2 + $0x30] sm:$0xff]  ;;  %v7836_v28 = vld [vmem:[#allocation17_spill] sm:$0xff] }
 0x210   :  { %1385 = vmatpush.msrb.mxu2 %v5204_v26  ;;  %1405 = vmatpush.msrb.mxu3 %v5210_v41  ;;  %7772 = vst [vmem:[#allocation74_spill] sm:$0xff] %v5218_v36  ;;  %v5224_v26 = vld [vmem:[%s6985_s2 + $0x38] sm:$0xff]  ;;  %v7835_v41 = vld [vmem:[#allocation57_spill] sm:$0xff] }
 0x211   :  { %1346 = vmatpush.msra.mxu0 %v4884_v57  ;;  %1366 = vmatpush.msra.mxu1 %v4890_v60  ;;  %7773 = vst [vmem:[#allocation59_spill] sm:$0xff] %v5224_v26  ;;  %v5232_v60 = vld [vmem:[%s6985_s2 + $0x10] sm:$0xff]  ;;  %v256_v14 = vadd.f32 %v7836_v28, %v7835_v41 }
 0x212   :  { %1386 = vmatpush.msrb.mxu2 %v5218_v36  ;;  %1406 = vmatpush.msrb.mxu3 %v5224_v26  ;;  %7774 = vst [vmem:[#allocation60_spill] sm:$0xff] %v5232_v60  ;;  %v5238_v36 = vld [vmem:[%s6985_s2 + $0x18] sm:$0xff] }
 0x213   :  { %1347 = vmatpush.msra.mxu0 %v4898_v0  ;;  %1367 = vmatpush.msra.mxu1 %v4904_v5  ;;  %7775 = vst [vmem:[#allocation76_spill] sm:$0xff] %v5238_v36  ;;  %v5246_v5 = vld [vmem:[%s6986_s3 + $0x1f0] sm:$0xff] }
 0x214   :  { %1387 = vmatpush.msrb.mxu2 %v5232_v60  ;;  %1407 = vmatpush.msrb.mxu3 %v5238_v36  ;;  %7776 = vst [vmem:[#allocation77_spill] sm:$0xff] %v5246_v5  ;;  %v5252_v60 = vld [vmem:[%s6986_s3 + $0x1f8] sm:$0xff] }
 0x215   :  { %1448 = vmatpush.msrb.mxu0 %v4912_v7  ;;  %1468 = vmatpush.msrb.mxu1 %v4918_v11  ;;  %7777 = vst [vmem:[#allocation83_spill] sm:$0xff] %v5252_v60  ;;  %v5260_v11 = vld [vmem:[%s6986_s3 + $0x1d0] sm:$0xff] }
 0x216   :  { %1488 = vmatpush.msra.mxu2 %v5246_v5  ;;  %1508 = vmatpush.msra.mxu3 %v5252_v60  ;;  %7778 = vst [vmem:[#allocation82_spill] sm:$0xff] %v5260_v11  ;;  %v5266_v5 = vld [vmem:[%s6986_s3 + $0x1d8] sm:$0xff] }
 0x217   :  { %1449 = vmatpush.msrb.mxu0 %v4926_v13  ;;  %1469 = vmatpush.msrb.mxu1 %v4932_v16  ;;  %7779 = vst [vmem:[#allocation13_spill] sm:$0xff] %v5266_v5  ;;  %v5274_v16 = vld [vmem:[%s6986_s3 + $0x1b0] sm:$0xff] }
 0x218   :  { %1489 = vmatpush.msra.mxu2 %v5260_v11  ;;  %1509 = vmatpush.msra.mxu3 %v5266_v5  ;;  %7780 = vst [vmem:[#allocation84_spill] sm:$0xff] %v5274_v16  ;;  %v5280_v11 = vld [vmem:[%s6986_s3 + $0x1b8] sm:$0xff]  ;;  %v7834_v5 = vld [vmem:[#allocation4_spill] sm:$0xff] }
 0x219   :  { %1450 = vmatpush.msrb.mxu0 %v4940_v18  ;;  %1470 = vmatpush.msrb.mxu1 %v4946_v19  ;;  %7781 = vst [vmem:[#allocation30_spill] sm:$0xff] %v5280_v11  ;;  %v5288_v19 = vld [vmem:[%s6986_s3 + $0x190] sm:$0xff] }
 0x21a   :  { %1490 = vmatpush.msra.mxu2 %v5274_v16  ;;  %1510 = vmatpush.msra.mxu3 %v5280_v11  ;;  %7782 = vst [vmem:[#allocation27_spill] sm:$0xff] %v5288_v19  ;;  %v5294_v16 = vld [vmem:[%s6986_s3 + $0x198] sm:$0xff]  ;;  %v7784_v11 = vld [vmem:[#allocation126_spill] sm:$0xff] }
 0x21b   :  { %1451 = vmatpush.msrb.mxu0 %v4954_v3  ;;  %1471 = vmatpush.msrb.mxu1 %v4960_v52  ;;  %7783 = vst [vmem:[#allocation53_spill] sm:$0xff] %v5294_v16  ;;  %v5302_v52 = vld [vmem:[%s6986_s3 + $0x170] sm:$0xff]  ;;  %v7787_v3 = vld [vmem:[#allocation127_spill] sm:$0xff] }
 0x21c   :  { %1491 = vmatpush.msra.mxu2 %v5288_v19  ;;  %1511 = vmatpush.msra.mxu3 %v5294_v16  ;;  %7785 = vst [vmem:[#allocation50_spill] sm:$0xff] %v5302_v52  ;;  %v5308_v19 = vld [vmem:[%s6986_s3 + $0x178] sm:$0xff]  ;;  %v7788_v16 = vld [vmem:[#allocation128_spill] sm:$0xff]  ;;  %v7833_v18 = vld [vmem:[#allocation38_spill] sm:$0xff] }
 0x21d   :  { %1452 = vmatpush.msrb.mxu0 %v4968_v46  ;;  %1472 = vmatpush.msrb.mxu1 %v7784_v11  ;;  %7786 = vst [vmem:[#allocation64_spill] sm:$0xff] %v5308_v19  ;;  %v5316_v11 = vld [vmem:[%s6986_s3 + $0x150] sm:$0xff]  ;;  %v7791_v46 = vld [vmem:[#allocation129_spill] sm:$0xff] }
 0x21e   :  { %1492 = vmatpush.msra.mxu2 %v5302_v52  ;;  %1512 = vmatpush.msra.mxu3 %v5308_v19  ;;  %7789 = vst [vmem:[#allocation65_spill] sm:$0xff] %v5316_v11  ;;  %v5322_v52 = vld [vmem:[%s6986_s3 + $0x158] sm:$0xff]  ;;  %v7792_v19 = vld [vmem:[#allocation130_spill] sm:$0xff] }
 0x21f   :  { %1453 = vmatpush.msrb.mxu0 %v7787_v3  ;;  %1473 = vmatpush.msrb.mxu1 %v7788_v16  ;;  %7790 = vst [vmem:[#allocation85_spill] sm:$0xff] %v5322_v52  ;;  %v5330_v16 = vld [vmem:[%s6986_s3 + $0x130] sm:$0xff]  ;;  %v7795_v3 = vld [vmem:[#allocation131_spill] sm:$0xff] }
 0x220   :  { %1493 = vmatpush.msra.mxu2 %v5316_v11  ;;  %1513 = vmatpush.msra.mxu3 %v5322_v52  ;;  %7793 = vst [vmem:[#allocation86_spill] sm:$0xff] %v5330_v16  ;;  %v5336_v11 = vld [vmem:[%s6986_s3 + $0x138] sm:$0xff]  ;;  %v7796_v52 = vld [vmem:[#allocation132_spill] sm:$0xff] }
 0x221   :  { %1454 = vmatpush.msrb.mxu0 %v7791_v46  ;;  %1474 = vmatpush.msrb.mxu1 %v7792_v19  ;;  %7794 = vst [vmem:[#allocation87_spill] sm:$0xff] %v5336_v11  ;;  %v5344_v19 = vld [vmem:[%s6986_s3 + $0x110] sm:$0xff]  ;;  %v7799_v46 = vld [vmem:[#allocation133_spill] sm:$0xff] }
 0x222   :  { %1494 = vmatpush.msra.mxu2 %v5330_v16  ;;  %1514 = vmatpush.msra.mxu3 %v5336_v11  ;;  %7797 = vst [vmem:[#allocation88_spill] sm:$0xff] %v5344_v19  ;;  %v5350_v16 = vld [vmem:[%s6986_s3 + $0x118] sm:$0xff]  ;;  %v7800_v11 = vld [vmem:[#allocation134_spill] sm:$0xff] }
 0x223   :  { %1455 = vmatpush.msrb.mxu0 %v7795_v3  ;;  %1475 = vmatpush.msrb.mxu1 %v7796_v52  ;;  %7798 = vst [vmem:[#allocation89_spill] sm:$0xff] %v5350_v16  ;;  %v5358_v52 = vld [vmem:[%s6986_s3 + $0xf0] sm:$0xff]  ;;  %v7803_v3 = vld [vmem:[#allocation135_spill] sm:$0xff] }
 0x224   :  { %1495 = vmatpush.msra.mxu2 %v5344_v19  ;;  %1515 = vmatpush.msra.mxu3 %v5350_v16  ;;  %7801 = vst [vmem:[#allocation90_spill] sm:$0xff] %v5358_v52  ;;  %v5364_v19 = vld [vmem:[%s6986_s3 + $0xf8] sm:$0xff]  ;;  %v7804_v16 = vld [vmem:[#allocation136_spill] sm:$0xff] }
 0x225   :  { %1456 = vmatpush.msrb.mxu0 %v7799_v46  ;;  %1476 = vmatpush.msrb.mxu1 %v7800_v11  ;;  %7802 = vst [vmem:[#allocation91_spill] sm:$0xff] %v5364_v19  ;;  %v5372_v11 = vld [vmem:[%s6986_s3 + $0xd0] sm:$0xff]  ;;  %v7807_v46 = vld [vmem:[#allocation137_spill] sm:$0xff] }
 0x226   :  { %1496 = vmatpush.msra.mxu2 %v5358_v52  ;;  %1516 = vmatpush.msra.mxu3 %v5364_v19  ;;  %7805 = vst [vmem:[#allocation92_spill] sm:$0xff] %v5372_v11  ;;  %v5378_v52 = vld [vmem:[%s6986_s3 + $0xd8] sm:$0xff]  ;;  %v7808_v19 = vld [vmem:[#allocation138_spill] sm:$0xff] }
 0x227   :  { %1457 = vmatpush.msrb.mxu0 %v7803_v3  ;;  %1477 = vmatpush.msrb.mxu1 %v7804_v16  ;;  %7806 = vst [vmem:[#allocation93_spill] sm:$0xff] %v5378_v52  ;;  %v5386_v16 = vld [vmem:[%s6986_s3 + $0xb0] sm:$0xff] }
 0x228   :  { %1497 = vmatpush.msra.mxu2 %v5372_v11  ;;  %1517 = vmatpush.msra.mxu3 %v5378_v52  ;;  %7809 = vst [vmem:[#allocation94_spill] sm:$0xff] %v5386_v16  ;;  %v5392_v11 = vld [vmem:[%s6986_s3 + $0xb8] sm:$0xff]  ;;  %v7832_v52 = vld [vmem:[#allocation14_spill] sm:$0xff] }
 0x229   :  { %1458 = vmatpush.msrb.mxu0 %v7807_v46  ;;  %1478 = vmatpush.msrb.mxu1 %v7808_v19  ;;  %7810 = vst [vmem:[#allocation95_spill] sm:$0xff] %v5392_v11  ;;  %v5398_v46 = vld [vmem:[%s6986_s3 + $0x80] sm:$0xff]  ;;  %v5404_v19 = vld [vmem:[%s6986_s3 + $0x88] sm:$0xff] }
 0x22a   :  { %1498 = vmatpush.msra.mxu2 %v5386_v16  ;;  %1518 = vmatpush.msra.mxu3 %v5392_v11  ;;  %7811 = vst [vmem:[#allocation96_spill] sm:$0xff] %v5398_v46  ;;  %v5410_v16 = vld [vmem:[%s6986_s3 + $0x90] sm:$0xff]  ;;  %v5416_v11 = vld [vmem:[%s6986_s3 + $0x98] sm:$0xff] }
 0x22b   :  { %1459 = vmatpush.msrb.mxu0 %v5398_v46  ;;  %7812 = vst [vmem:[#allocation97_spill] sm:$0xff] %v5404_v19  ;;  %1479 = vmatpush.msrb.mxu1 %v5404_v19  ;;  %v5422_v46 = vld [vmem:[%s6986_s3 + $0x60] sm:$0xff]  ;;  %v5428_v19 = vld [vmem:[%s6986_s3 + $0x68] sm:$0xff] }
 0x22c   :  { %7813 = vst [vmem:[#allocation98_spill] sm:$0xff] %v5410_v16  ;;  %1499 = vmatpush.msra.mxu2 %v5410_v16  ;;  %1519 = vmatpush.msra.mxu3 %v5416_v11  ;;  %v5434_v16 = vld [vmem:[%s6986_s3 + $0x70] sm:$0xff] }
 0x22d   :  { %7814 = vst [vmem:[#allocation100_spill] sm:$0xff] %v5416_v11  ;;  %1460 = vmatpush.msrb.mxu0 %v5422_v46  ;;  %1480 = vmatpush.msrb.mxu1 %v5428_v19  ;;  %v5440_v11 = vld [vmem:[%s6986_s3 + $0x78] sm:$0xff] }
 0x22e   :  { %7815 = vst [vmem:[#allocation101_spill] sm:$0xff] %v5422_v46  ;;  %1500 = vmatpush.msra.mxu2 %v5434_v16  ;;  %1520 = vmatpush.msra.mxu3 %v5440_v11  ;;  %v5446_v46 = vld [vmem:[%s6986_s3 + $0x40] sm:$0xff] }
 0x22f   :  { %7816 = vst [vmem:[#allocation103_spill] sm:$0xff] %v5428_v19  ;;  %1461 = vmatpush.msrb.mxu0 %v5446_v46  ;;  %v5452_v19 = vld [vmem:[%s6986_s3 + $0x48] sm:$0xff] }
 0x230   :  { %7817 = vst [vmem:[#allocation104_spill] sm:$0xff] %v5434_v16  ;;  %1481 = vmatpush.msrb.mxu1 %v5452_v19  ;;  %v5458_v16 = vld [vmem:[%s6986_s3 + $0x50] sm:$0xff] }
 0x231   :  { %7818 = vst [vmem:[#allocation105_spill] sm:$0xff] %v5440_v11  ;;  %1501 = vmatpush.msra.mxu2 %v5458_v16  ;;  %v5464_v11 = vld [vmem:[%s6986_s3 + $0x58] sm:$0xff] }
 0x232   :  { %7819 = vst [vmem:[#allocation139_spill] sm:$0xff] %v5446_v46  ;;  %1521 = vmatpush.msra.mxu3 %v5464_v11  ;;  %v5470_v46 = vld [vmem:[%s6986_s3 + $0x20] sm:$0xff] }
 0x233   :  { %7820 = vst [vmem:[#allocation140_spill] sm:$0xff] %v5452_v19  ;;  %1462 = vmatpush.msrb.mxu0 %v5470_v46  ;;  %v5476_v19 = vld [vmem:[%s6986_s3 + $0x28] sm:$0xff] }
 0x234   :  { %7821 = vst [vmem:[#allocation141_spill] sm:$0xff] %v5458_v16  ;;  %1482 = vmatpush.msrb.mxu1 %v5476_v19  ;;  %v5482_v16 = vld [vmem:[%s6986_s3 + $0x30] sm:$0xff] }
 0x235   :  { %7822 = vst [vmem:[#allocation142_spill] sm:$0xff] %v5464_v11  ;;  %1502 = vmatpush.msra.mxu2 %v5482_v16  ;;  %v5488_v11 = vld [vmem:[%s6986_s3 + $0x38] sm:$0xff] }
 0x236   :  { %7823 = vst [vmem:[#allocation143_spill] sm:$0xff] %v5470_v46  ;;  %1522 = vmatpush.msra.mxu3 %v5488_v11  ;;  %v5494_v46 = vld [vmem:[%s6986_s3] sm:$0xff] }
 0x237   :  { %7824 = vst [vmem:[#allocation144_spill] sm:$0xff] %v5476_v19  ;;  %1463 = vmatpush.msrb.mxu0 %v5494_v46  ;;  %v5500_v19 = vld [vmem:[%s6986_s3 + $0x8] sm:$0xff] }
 0x238   :  { %7825 = vst [vmem:[#allocation145_spill] sm:$0xff] %v5482_v16  ;;  %1483 = vmatpush.msrb.mxu1 %v5500_v19  ;;  %v5506_v16 = vld [vmem:[%s6986_s3 + $0x10] sm:$0xff] }
 0x239   :  { %7826 = vst [vmem:[#allocation146_spill] sm:$0xff] %v5488_v11  ;;  %1503 = vmatpush.msra.mxu2 %v5506_v16  ;;  %v5512_v11 = vld [vmem:[%s6986_s3 + $0x18] sm:$0xff] }
 0x23a   :  { %7827 = vst [vmem:[#allocation147_spill] sm:$0xff] %v5494_v46  ;;  %1523 = vmatpush.msra.mxu3 %v5512_v11  ;;  %v7831_v46 = vld [vmem:[#allocation42_spill] sm:$0xff] }
 0x23b   :  { %7828 = vst [vmem:[#allocation148_spill] sm:$0xff] %v5500_v19  ;;  %v133_v3 = vadd.f32 %v7832_v52, %v7831_v46  ;;  %v174_v19 = vadd.f32 %v7834_v5, %v7833_v18  ;;  %v7837_v52 = vld [vmem:[#allocation54_spill] sm:$0xff]  ;;  %v7838_v46 = vld [vmem:[#allocation5_spill] sm:$0xff]  ;;  %v7840_v18 = vld [vmem:[#allocation40_spill] sm:$0xff] }
 0x23c   :  { %7829 = vst [vmem:[#allocation149_spill] sm:$0xff] %v5506_v16  ;;  %v215_v62 = vadd.f32 %v7838_v46, %v7837_v52  ;;  %v7839_v5 = vld [vmem:[#allocation49_spill] sm:$0xff] }
 0x23d   :  { %7830 = vst [vmem:[#allocation150_spill] sm:$0xff] %v5512_v11  ;;  %v306_v45 = vadd.f32 %v7840_v18, %v7839_v5 }
 0x26e   :  { %v1117_v13 = vpop.f32.mrf.mxu0  ;;  %v1137_v60 = vpop.f32.mrf.mxu1 }
 0x26f   :  { %v1180_v7 = vadd.f32 %v1117_v13, %v133_v3  ;;  %v1181_v36 = vadd.f32 %v1137_v60, %v174_v19  ;;  %v7841_v60 = vld [vmem:[#allocation24_spill] sm:$0xff] }
 0x271   :  { %v1184_v0 = vsub.f32 0.0, %v1180_v7  ;;  %v1189_v26 = vsub.f32 0.0, %v1181_v36  ;;  %v347_v7 = vadd.f32 %v7841_v60, %v7735_v35  ;;  %v7842_v35 = vld [vmem:[#allocation46_spill] sm:$0xff] }
 0x273   :  { %v1185_v16 = vmul.f32 1.442695, %v1184_v0  ;;  %v1190_v57 = vmul.f32 1.442695, %v1189_v26 }
 0x275   :  { %2735 = vpow2.f32 %v1185_v16  ;;  %v1157_v20 = vpop.f32.mrf.mxu2  ;;  %v1177_v11 = vpop.f32.mrf.mxu3 }
 0x276   :  { %2737 = vpow2.f32 %v1190_v57  ;;  %v1183_v22 = vadd.f32 %v1177_v11, %v256_v14  ;;  %v1182_v13 = vadd.f32 %v1157_v20, %v215_v62 }
 0x278   :  { %v1195_v36 = vsub.f32 0.0, %v1183_v22  ;;  %v1233_v0 = vpop.f32.mrf.mxu0  ;;  %v1253_v26 = vpop.f32.mrf.mxu1 }
 0x279   :  { %v1296_v19 = vadd.f32 %v1233_v0, %v306_v45  ;;  %v1297_v28 = vadd.f32 %v1253_v26, %v347_v7  ;;  %v7843_v45 = vld [vmem:[#allocation41_spill] sm:$0xff] }
 0x27a   :  { %v1196_v16 = vmul.f32 1.442695, %v1195_v36 }
 0x27b   :  { %v2736_v3 = vpop.eup %2735  ;;  %v1300_v41 = vsub.f32 0.0, %v1296_v19  ;;  %v1305_v57 = vsub.f32 0.0, %v1297_v28 }
 0x27c   :  { %v2738_v14 = vpop.eup %2737  ;;  %v1187_v11 = vadd.f32 1.0, %v2736_v3  ;;  %2739 = vpow2.f32 %v1196_v16 }
 0x27d   :  { %v1192_v46 = vadd.f32 1.0, %v2738_v14  ;;  %2741 = vtanh.f32 %v1182_v13  ;;  %v1301_v52 = vmul.f32 1.442695, %v1300_v41  ;;  %v1306_v18 = vmul.f32 1.442695, %v1305_v57 }
 0x27e   :  { %2743 = vrcp.f32 %v1187_v11 }
 0x27f   :  { %2745 = vrcp.f32 %v1192_v46  ;;  %v1273_v60 = vpop.f32.mrf.mxu2  ;;  %v1293_v22 = vpop.f32.mrf.mxu3 }
 0x280   :  { %2747 = vpow2.f32 %v1301_v52  ;;  %v1299_v62 = vadd.f32 %v1293_v22, %v7842_v35  ;;  %v1298_v7 = vadd.f32 %v1273_v60, %v7843_v45 }
 0x281   :  { %2749 = vpow2.f32 %v1306_v18 }
 0x282   :  { %v2740_v20 = vpop.eup %2739  ;;  %v1311_v36 = vsub.f32 0.0, %v1299_v62  ;;  %2751 = vtanh.f32 %v1298_v7 }
 0x283   :  { %v2742_v0 = vpop.eup %2741  ;;  %v1198_v26 = vadd.f32 1.0, %v2740_v20 }
 0x284   :  { %v2744_v19 = vpop.eup %2743  ;;  %v1312_v28 = vmul.f32 1.442695, %v1311_v36 }
 0x285   :  { %v2746_v16 = vpop.eup %2745  ;;  %v1201_v13 = vmul.f32 %v2744_v19, %v2742_v0  ;;  %2753 = vrcp.f32 %v1198_v26  ;;  %v7883_v0 = vld [vmem:[#allocation123_spill] sm:$0xff]  ;;  %v7884_v26 = vld [vmem:[#allocation124_spill] sm:$0xff] }
 0x286   :  { %v2748_v41 = vpop.eup %2747  ;;  %v1200_v3 = vmul.f32 %v2746_v16, %v5098_v56  ;;  %2755 = vpow2.f32 %v1312_v28  ;;  %v7885_v19 = vld [vmem:[#allocation27_spill] sm:$0xff]  ;;  %v7886_v28 = vld [vmem:[#allocation53_spill] sm:$0xff] }
 0x287   :  { %v2750_v57 = vpop.eup %2749  ;;  %v1303_v52 = vadd.f32 1.0, %v2748_v41  ;;  %v7887_v16 = vld [vmem:[#allocation125_spill] sm:$0xff]  ;;  %v7889_v41 = vld [vmem:[#allocation50_spill] sm:$0xff] }
 0x288   :  { %v5530_v14 = vadd.f32 %v1201_v13, %v1200_v3  ;;  %v1308_v35 = vadd.f32 1.0, %v2750_v57  ;;  %v2752_v11 = vpop.eup %2751  ;;  %v7888_v13 = vld [vmem:[#allocation126_spill] sm:$0xff]  ;;  %v7890_v3 = vld [vmem:[#allocation64_spill] sm:$0xff]  ;;  %v7891_v57 = vld [vmem:[#allocation127_spill] sm:$0xff] }
 0x289   :  { %2757 = vrcp.f32 %v1303_v52  ;;  %v7892_v52 = vld [vmem:[#allocation128_spill] sm:$0xff] }
 0x28a   :  { %2759 = vtanh.f32 %v5530_v14 }
 0x28b   :  { %2761 = vrcp.f32 %v1308_v35  ;;  %v2754_v46 = vpop.eup %2753  ;;  %v7893_v35 = vld [vmem:[#allocation65_spill] sm:$0xff] }
 0x28c   :  { %v2756_v18 = vpop.eup %2755 }
 0x28d   :  { %v1314_v45 = vadd.f32 1.0, %v2756_v18  ;;  %v7896_v18 = vld [vmem:[#allocation130_spill] sm:$0xff] }
 0x28f   :  { %v2758_v60 = vpop.eup %2757  ;;  %2763 = vrcp.f32 %v1314_v45  ;;  %v7901_v45 = vld [vmem:[#allocation88_spill] sm:$0xff] }
 0x290   :  { %v2760_v22 = vpop.eup %2759  ;;  %v1317_v62 = vmul.f32 %v2758_v60, %v2752_v11  ;;  %v7894_v11 = vld [vmem:[#allocation85_spill] sm:$0xff]  ;;  %v7897_v60 = vld [vmem:[#allocation86_spill] sm:$0xff] }
 0x291   :  { %v2762_v20 = vpop.eup %2761  ;;  %v5533_v56 = vmul.f32 %v2760_v22, %v2754_v46  ;;  %v7895_v46 = vld [vmem:[#allocation129_spill] sm:$0xff]  ;;  %v7898_v22 = vld [vmem:[#allocation87_spill] sm:$0xff] }
 0x292   :  { %v1316_v7 = vmul.f32 %v2762_v20, %v5104_v44  ;;  %v7862_v44 = vld [vmem:[#allocation72_spill] sm:$0xff] }
 0x293   :  { %7844 = vst [vmem:[#allocation14_spill] sm:$0xff] %v5533_v56  ;;  %1348 = vmatmul.f32.vlgmr.msra.gmra.mxu0 %v5533_v56  ;;  %1368 = vmatmul.f32.vlgmr.msra.gmra.mxu1 %v5533_v56  ;;  %v7900_v20 = vld [vmem:[#allocation132_spill] sm:$0xff] }
 0x294   :  { %v5538_v36 = vadd.f32 %v1317_v62, %v1316_v7  ;;  %1388 = vmatmul.f32.vlgmr.msrb.gmra.mxu2 %v5533_v56  ;;  %1408 = vmatmul.f32.vlgmr.msrb.gmra.mxu3 %v5533_v56  ;;  %v7899_v62 = vld [vmem:[#allocation131_spill] sm:$0xff]  ;;  %v7902_v7 = vld [vmem:[#allocation89_spill] sm:$0xff] }
 0x295   :  { %1561 = vmatpush.msra.mxu0 %v4582_v54  ;;  %1581 = vmatpush.msra.mxu1 %v4588_v8  ;;  %v2764_v54 = vpop.eup %2763 }
 0x296   :  { %2765 = vtanh.f32 %v5538_v36  ;;  %1601 = vmatpush.msrb.mxu2 %v4594_v31  ;;  %1621 = vmatpush.msrb.mxu3 %v4600_v51  ;;  %v7846_v51 = vld [vmem:[#allocation99_spill] sm:$0xff] }
 0x297   :  { %1562 = vmatpush.msra.mxu0 %v4606_v39  ;;  %1582 = vmatpush.msra.mxu1 %v4612_v59  ;;  %v7847_v39 = vld [vmem:[#allocation102_spill] sm:$0xff] }
 0x298   :  { %1602 = vmatpush.msrb.mxu2 %v4618_v50  ;;  %1622 = vmatpush.msrb.mxu3 %v4624_v43  ;;  %v7848_v59 = vld [vmem:[#allocation106_spill] sm:$0xff]  ;;  %v7849_v50 = vld [vmem:[#allocation69_spill] sm:$0xff]  ;;  %v7850_v43 = vld [vmem:[#allocation51_spill] sm:$0xff] }
 0x299   :  { %1563 = vmatpush.msra.mxu0 %v4632_v58  ;;  %1583 = vmatpush.msra.mxu1 %v4638_v1  ;;  %v7851_v58 = vld [vmem:[#allocation107_spill] sm:$0xff]  ;;  %v7852_v1 = vld [vmem:[#allocation108_spill] sm:$0xff] }
 0x29a   :  { %1603 = vmatpush.msrb.mxu2 %v4644_v42  ;;  %1623 = vmatpush.msrb.mxu3 %v4650_v12  ;;  %v7853_v42 = vld [vmem:[#allocation52_spill] sm:$0xff]  ;;  %v7854_v12 = vld [vmem:[#allocation70_spill] sm:$0xff] }
 0x29b   :  { %1564 = vmatpush.msra.mxu0 %v4660_v17  ;;  %1584 = vmatpush.msra.mxu1 %v4666_v2  ;;  %v7855_v17 = vld [vmem:[#allocation109_spill] sm:$0xff]  ;;  %v7856_v2 = vld [vmem:[#allocation110_spill] sm:$0xff] }
 0x29c   :  { %v2766_v8 = vpop.eup %2765  ;;  %1604 = vmatpush.msrb.mxu2 %v4672_v15  ;;  %1624 = vmatpush.msrb.mxu3 %v4678_v21  ;;  %v7857_v15 = vld [vmem:[#allocation71_spill] sm:$0xff] }
 0x29d   :  { %v5559_v31 = vmul.f32 %v2766_v8, %v2764_v54  ;;  %1565 = vmatpush.msra.mxu0 %v4684_v32  ;;  %1585 = vmatpush.msra.mxu1 %v7741_v33  ;;  %v7858_v21 = vld [vmem:[#allocation55_spill] sm:$0xff]  ;;  %v7864_v33 = vld [vmem:[#allocation114_spill] sm:$0xff]  ;;  %v7903_v54 = vld [vmem:[#allocation133_spill] sm:$0xff] }
 0x29e   :  { %1605 = vmatpush.msrb.mxu2 %v7742_v6  ;;  %1625 = vmatpush.msrb.mxu3 %v7743_v25  ;;  %v7859_v32 = vld [vmem:[#allocation111_spill] sm:$0xff]  ;;  %v7865_v6 = vld [vmem:[#allocation74_spill] sm:$0xff] }
 0x29f   :  { %7845 = vst [vmem:[#allocation4_spill] sm:$0xff] %v5559_v31  ;;  %1464 = vmatmul.f32.vlgmr.msrb.gmra.mxu0 %v5559_v31  ;;  %1484 = vmatmul.f32.vlgmr.msrb.gmra.mxu1 %v5559_v31  ;;  %v7866_v25 = vld [vmem:[#allocation59_spill] sm:$0xff]  ;;  %v7904_v8 = vld [vmem:[#allocation134_spill] sm:$0xff] }
 0x2a0   :  { %1504 = vmatmul.f32.vlgmr.msra.gmra.mxu2 %v5559_v31  ;;  %1524 = vmatmul.f32.vlgmr.msra.gmra.mxu3 %v5559_v31 }
 0x2a1   :  { %1566 = vmatpush.msra.mxu0 %v7744_v48  ;;  %1586 = vmatpush.msra.mxu1 %v7745_v38  ;;  %v7867_v48 = vld [vmem:[#allocation115_spill] sm:$0xff]  ;;  %v7868_v38 = vld [vmem:[#allocation116_spill] sm:$0xff] }
 0x2a2   :  { %1606 = vmatpush.msrb.mxu2 %v7746_v55  ;;  %1626 = vmatpush.msrb.mxu3 %v7747_v9  ;;  %v7869_v55 = vld [vmem:[#allocation60_spill] sm:$0xff] }
 0x2a3   :  { %1567 = vmatpush.msra.mxu0 %v7748_v10  ;;  %1587 = vmatpush.msra.mxu1 %v7749_v47  ;;  %v7870_v9 = vld [vmem:[#allocation76_spill] sm:$0xff]  ;;  %v7871_v10 = vld [vmem:[#allocation117_spill] sm:$0xff]  ;;  %v7872_v47 = vld [vmem:[#allocation118_spill] sm:$0xff] }
 0x2a4   :  { %1607 = vmatpush.msrb.mxu2 %v7750_v34  ;;  %1627 = vmatpush.msrb.mxu3 %v7751_v27  ;;  %v7873_v34 = vld [vmem:[#allocation77_spill] sm:$0xff]  ;;  %v7874_v27 = vld [vmem:[#allocation83_spill] sm:$0xff] }
 0x2a5   :  { %1568 = vmatpush.msra.mxu0 %v7752_v37  ;;  %1588 = vmatpush.msra.mxu1 %v7753_v49  ;;  %v7875_v37 = vld [vmem:[#allocation119_spill] sm:$0xff]  ;;  %v7876_v49 = vld [vmem:[#allocation120_spill] sm:$0xff] }
 0x2a6   :  { %1608 = vmatpush.msrb.mxu2 %v7754_v53  ;;  %1628 = vmatpush.msrb.mxu3 %v7755_v61  ;;  %v7877_v53 = vld [vmem:[#allocation82_spill] sm:$0xff]  ;;  %v7878_v61 = vld [vmem:[#allocation13_spill] sm:$0xff] }
 0x2a7   :  { %1569 = vmatpush.msra.mxu0 %v7756_v63  ;;  %1589 = vmatpush.msra.mxu1 %v7846_v51  ;;  %v7879_v63 = vld [vmem:[#allocation121_spill] sm:$0xff]  ;;  %v7905_v51 = vld [vmem:[#allocation90_spill] sm:$0xff] }
 0x2a8   :  { %1609 = vmatpush.msrb.mxu2 %v7758_v4  ;;  %1629 = vmatpush.msrb.mxu3 %v7759_v23  ;;  %v7880_v4 = vld [vmem:[#allocation122_spill] sm:$0xff]  ;;  %v7881_v23 = vld [vmem:[#allocation84_spill] sm:$0xff] }
 0x2a9   :  { %1570 = vmatpush.msra.mxu0 %v7847_v39  ;;  %1590 = vmatpush.msra.mxu1 %v7761_v24  ;;  %v7882_v24 = vld [vmem:[#allocation30_spill] sm:$0xff]  ;;  %v7906_v39 = vld [vmem:[#allocation91_spill] sm:$0xff] }
 0x2aa   :  { %1610 = vmatpush.msrb.mxu2 %v4816_v40  ;;  %1630 = vmatpush.msrb.mxu3 %v7762_v30  ;;  %v7860_v40 = vld [vmem:[#allocation112_spill] sm:$0xff]  ;;  %v7863_v30 = vld [vmem:[#allocation113_spill] sm:$0xff] }
 0x2ab   :  { %1571 = vmatpush.msra.mxu0 %v7763_v29  ;;  %1591 = vmatpush.msra.mxu1 %v7848_v59  ;;  %v7861_v29 = vld [vmem:[#allocation56_spill] sm:$0xff]  ;;  %v7907_v59 = vld [vmem:[#allocation135_spill] sm:$0xff] }
 0x2ac   :  { %1611 = vmatpush.msrb.mxu2 %v7849_v50  ;;  %1631 = vmatpush.msrb.mxu3 %v7850_v43 }
 0x2ad   :  { %1572 = vmatpush.msra.mxu0 %v7851_v58  ;;  %1592 = vmatpush.msra.mxu1 %v7852_v1  ;;  %v7908_v58 = vld [vmem:[#allocation136_spill] sm:$0xff] }
 0x2ae   :  { %1612 = vmatpush.msrb.mxu2 %v7853_v42  ;;  %1632 = vmatpush.msrb.mxu3 %v7854_v12  ;;  %v7909_v1 = vld [vmem:[#allocation92_spill] sm:$0xff] }
 0x2af   :  { %1573 = vmatpush.msra.mxu0 %v7855_v17  ;;  %1593 = vmatpush.msra.mxu1 %v7856_v2  ;;  %v7910_v17 = vld [vmem:[#allocation93_spill] sm:$0xff] }
 0x2b0   :  { %1613 = vmatpush.msrb.mxu2 %v7857_v15  ;;  %1633 = vmatpush.msrb.mxu3 %v7858_v21  ;;  %v7911_v2 = vld [vmem:[#allocation137_spill] sm:$0xff] }
 0x2b1   :  { %1574 = vmatpush.msra.mxu0 %v7859_v32  ;;  %1594 = vmatpush.msra.mxu1 %v7860_v40  ;;  %v7912_v32 = vld [vmem:[#allocation138_spill] sm:$0xff] }
 0x2b2   :  { %1614 = vmatpush.msrb.mxu2 %v7861_v29  ;;  %1634 = vmatpush.msrb.mxu3 %v7862_v44  ;;  %v7913_v40 = vld [vmem:[#allocation94_spill] sm:$0xff] }
 0x2b3   :  { %1575 = vmatpush.msra.mxu0 %v7863_v30  ;;  %1595 = vmatpush.msra.mxu1 %v7864_v33  ;;  %v7914_v30 = vld [vmem:[#allocation95_spill] sm:$0xff]  ;;  %v7915_v33 = vld [vmem:[#allocation96_spill] sm:$0xff] }
 0x2b4   :  { %1615 = vmatpush.msrb.mxu2 %v7865_v6  ;;  %1635 = vmatpush.msrb.mxu3 %v7866_v25 }
 0x2b5   :  { %1576 = vmatpush.msra.mxu0 %v7867_v48  ;;  %1596 = vmatpush.msra.mxu1 %v7868_v38  ;;  %v7916_v48 = vld [vmem:[#allocation97_spill] sm:$0xff]  ;;  %v7917_v38 = vld [vmem:[#allocation98_spill] sm:$0xff] }
 0x2b6   :  { %1616 = vmatpush.msrb.mxu2 %v7869_v55  ;;  %1636 = vmatpush.msrb.mxu3 %v7870_v9 }
 0x2b7   :  { %1671 = vmatpush.msrb.mxu0 %v7871_v10  ;;  %1691 = vmatpush.msrb.mxu1 %v7872_v47  ;;  %v7918_v10 = vld [vmem:[#allocation100_spill] sm:$0xff]  ;;  %v7919_v47 = vld [vmem:[#allocation101_spill] sm:$0xff] }
 0x2b8   :  { %1711 = vmatpush.msra.mxu2 %v7873_v34  ;;  %1731 = vmatpush.msra.mxu3 %v7874_v27 }
 0x2b9   :  { %1672 = vmatpush.msrb.mxu0 %v7875_v37  ;;  %1692 = vmatpush.msrb.mxu1 %v7876_v49  ;;  %v7920_v37 = vld [vmem:[#allocation103_spill] sm:$0xff]  ;;  %v7921_v49 = vld [vmem:[#allocation104_spill] sm:$0xff] }
 0x2ba   :  { %1712 = vmatpush.msra.mxu2 %v7877_v53  ;;  %1732 = vmatpush.msra.mxu3 %v7878_v61 }
 0x2bb   :  { %1673 = vmatpush.msrb.mxu0 %v7879_v63  ;;  %1693 = vmatpush.msrb.mxu1 %v7880_v4  ;;  %v7922_v63 = vld [vmem:[#allocation105_spill] sm:$0xff]  ;;  %v7923_v4 = vld [vmem:[#allocation139_spill] sm:$0xff] }
 0x2bc   :  { %1713 = vmatpush.msra.mxu2 %v7881_v23  ;;  %1733 = vmatpush.msra.mxu3 %v7882_v24 }
 0x2bd   :  { %1674 = vmatpush.msrb.mxu0 %v7883_v0  ;;  %1694 = vmatpush.msrb.mxu1 %v7884_v26  ;;  %v7924_v0 = vld [vmem:[#allocation140_spill] sm:$0xff]  ;;  %v7925_v26 = vld [vmem:[#allocation141_spill] sm:$0xff] }
 0x2be   :  { %1714 = vmatpush.msra.mxu2 %v7885_v19  ;;  %1734 = vmatpush.msra.mxu3 %v7886_v28 }
 0x2bf   :  { %1675 = vmatpush.msrb.mxu0 %v7887_v16  ;;  %1695 = vmatpush.msrb.mxu1 %v7888_v13  ;;  %v7926_v16 = vld [vmem:[#allocation142_spill] sm:$0xff]  ;;  %v7927_v13 = vld [vmem:[#allocation143_spill] sm:$0xff] }
 0x2c0   :  { %1715 = vmatpush.msra.mxu2 %v7889_v41  ;;  %1735 = vmatpush.msra.mxu3 %v7890_v3 }
 0x2c1   :  { %1676 = vmatpush.msrb.mxu0 %v7891_v57  ;;  %1696 = vmatpush.msrb.mxu1 %v7892_v52  ;;  %v7928_v57 = vld [vmem:[#allocation144_spill] sm:$0xff]  ;;  %v7929_v52 = vld [vmem:[#allocation145_spill] sm:$0xff] }
 0x2c2   :  { %1716 = vmatpush.msra.mxu2 %v7893_v35  ;;  %1736 = vmatpush.msra.mxu3 %v7894_v11 }
 0x2c3   :  { %1677 = vmatpush.msrb.mxu0 %v7895_v46  ;;  %1697 = vmatpush.msrb.mxu1 %v7896_v18  ;;  %v7930_v46 = vld [vmem:[#allocation146_spill] sm:$0xff]  ;;  %v7931_v18 = vld [vmem:[#allocation147_spill] sm:$0xff] }
 0x2c4   :  { %1717 = vmatpush.msra.mxu2 %v7897_v60  ;;  %1737 = vmatpush.msra.mxu3 %v7898_v22 }
 0x2c5   :  { %1678 = vmatpush.msrb.mxu0 %v7899_v62  ;;  %1698 = vmatpush.msrb.mxu1 %v7900_v20  ;;  %v7932_v62 = vld [vmem:[#allocation148_spill] sm:$0xff]  ;;  %v7933_v20 = vld [vmem:[#allocation149_spill] sm:$0xff] }
 0x2c6   :  { %1718 = vmatpush.msra.mxu2 %v7901_v45  ;;  %1738 = vmatpush.msra.mxu3 %v7902_v7 }
 0x2c7   :  { %1679 = vmatpush.msrb.mxu0 %v7903_v54  ;;  %1699 = vmatpush.msrb.mxu1 %v7904_v8  ;;  %v7934_v54 = vld [vmem:[#allocation150_spill] sm:$0xff] }
 0x2c8   :  { %1719 = vmatpush.msra.mxu2 %v7905_v51  ;;  %1739 = vmatpush.msra.mxu3 %v7906_v39  ;;  %v7935_v8 = vld [vmem:[#allocation42_spill] sm:$0xff] }
 0x2c9   :  { %1680 = vmatpush.msrb.mxu0 %v7907_v59  ;;  %1700 = vmatpush.msrb.mxu1 %v7908_v58  ;;  %v7936_v59 = vld [vmem:[#allocation62_spill] sm:$0xff] }
 0x2ca   :  { %1720 = vmatpush.msra.mxu2 %v7909_v1  ;;  %1740 = vmatpush.msra.mxu3 %v7910_v17  ;;  %v136_v58 = vadd.f32 %v7936_v59, %v7935_v8  ;;  %v7941_v59 = vld [vmem:[#allocation54_spill] sm:$0xff]  ;;  %v7942_v8 = vld [vmem:[#allocation7_spill] sm:$0xff] }
 0x2cb   :  { %1681 = vmatpush.msrb.mxu0 %v7911_v2  ;;  %1701 = vmatpush.msrb.mxu1 %v7912_v32  ;;  %v7937_v2 = vld [vmem:[#allocation38_spill] sm:$0xff]  ;;  %v7938_v32 = vld [vmem:[#allocation63_spill] sm:$0xff] }
 0x2cc   :  { %1721 = vmatpush.msra.mxu2 %v7913_v40  ;;  %1741 = vmatpush.msra.mxu3 %v7914_v30  ;;  %v177_v31 = vadd.f32 %v7938_v32, %v7937_v2  ;;  %v7943_v2 = vld [vmem:[#allocation36_spill] sm:$0xff] }
 0x2cd   :  { %1682 = vmatpush.msrb.mxu0 %v7915_v33  ;;  %1702 = vmatpush.msrb.mxu1 %v7916_v48 }
 0x2ce   :  { %1722 = vmatpush.msra.mxu2 %v7917_v38  ;;  %1742 = vmatpush.msra.mxu3 %v7918_v10 }
 0x2cf   :  { %1683 = vmatpush.msrb.mxu0 %v7919_v47  ;;  %1703 = vmatpush.msrb.mxu1 %v7920_v37 }
 0x2d0   :  { %1723 = vmatpush.msra.mxu2 %v7921_v49  ;;  %1743 = vmatpush.msra.mxu3 %v7922_v63  ;;  %v218_v49 = vadd.f32 %v7942_v8, %v7941_v59 }
 0x2d1   :  { %1684 = vmatpush.msrb.mxu0 %v7923_v4  ;;  %1704 = vmatpush.msrb.mxu1 %v7924_v0  ;;  %v7939_v0 = vld [vmem:[#allocation57_spill] sm:$0xff] }
 0x2d2   :  { %1724 = vmatpush.msra.mxu2 %v7925_v26  ;;  %1744 = vmatpush.msra.mxu3 %v7926_v16 }
 0x2d3   :  { %1685 = vmatpush.msrb.mxu0 %v7927_v13  ;;  %1705 = vmatpush.msrb.mxu1 %v7928_v57 }
 0x2d4   :  { %1725 = vmatpush.msra.mxu2 %v7929_v52  ;;  %1745 = vmatpush.msra.mxu3 %v7930_v46 }
 0x2d5   :  { %1686 = vmatpush.msrb.mxu0 %v7931_v18  ;;  %1706 = vmatpush.msrb.mxu1 %v7932_v62  ;;  %v7940_v62 = vld [vmem:[#allocation21_spill] sm:$0xff] }
 0x2d6   :  { %1726 = vmatpush.msra.mxu2 %v7933_v20  ;;  %1746 = vmatpush.msra.mxu3 %v7934_v54  ;;  %v259_v4 = vadd.f32 %v7940_v62, %v7939_v0 }
 0x310   :  { %v1349_v56 = vpop.f32.mrf.mxu0  ;;  %v1369_v57 = vpop.f32.mrf.mxu1 }
 0x311   :  { %v1412_v13 = vadd.f32 %v1349_v56, %v136_v58  ;;  %v1413_v52 = vadd.f32 %v1369_v57, %v177_v31  ;;  %v303_v56 = vadd.f32 %v7943_v2, %v7839_v5  ;;  %v7944_v31 = vld [vmem:[#allocation45_spill] sm:$0xff] }
 0x313   :  { %v1416_v16 = vsub.f32 0.0, %v1412_v13  ;;  %v1421_v46 = vsub.f32 0.0, %v1413_v52  ;;  %v7945_v13 = vld [vmem:[#allocation20_spill] sm:$0xff] }
 0x314   :  { %v344_v57 = vadd.f32 %v7945_v13, %v7944_v31 }
 0x315   :  { %v1417_v26 = vmul.f32 1.442695, %v1416_v16  ;;  %v1422_v18 = vmul.f32 1.442695, %v1421_v46 }
 0x317   :  { %2767 = vpow2.f32 %v1417_v26  ;;  %v1409_v20 = vpop.f32.mrf.mxu3  ;;  %v1389_v54 = vpop.f32.mrf.mxu2 }
 0x318   :  { %2769 = vpow2.f32 %v1422_v18  ;;  %v1415_v63 = vadd.f32 %v1409_v20, %v259_v4  ;;  %v1414_v16 = vadd.f32 %v1389_v54, %v218_v49 }
 0x31a   :  { %v1427_v32 = vsub.f32 0.0, %v1415_v63 }
 0x31c   :  { %v1428_v52 = vmul.f32 1.442695, %v1427_v32  ;;  %v1465_v46 = vpop.f32.mrf.mxu0  ;;  %v1485_v58 = vpop.f32.mrf.mxu1  ;;  %v7946_v32 = vld [vmem:[#allocation37_spill] sm:$0xff] }
 0x31d   :  { %v2768_v62 = vpop.eup %2767  ;;  %v1528_v26 = vadd.f32 %v1465_v46, %v303_v56  ;;  %v1529_v0 = vadd.f32 %v1485_v58, %v344_v57  ;;  %v7947_v57 = vld [vmem:[#allocation35_spill] sm:$0xff] }
 0x31e   :  { %v2770_v18 = vpop.eup %2769  ;;  %v1419_v37 = vadd.f32 1.0, %v2768_v62  ;;  %2771 = vpow2.f32 %v1428_v52 }
 0x31f   :  { %v1424_v4 = vadd.f32 1.0, %v2770_v18  ;;  %2773 = vtanh.f32 %v1414_v16  ;;  %v1532_v20 = vsub.f32 0.0, %v1528_v26  ;;  %v1537_v63 = vsub.f32 0.0, %v1529_v0 }
 0x320   :  { %2775 = vrcp.f32 %v1419_v37 }
 0x321   :  { %2777 = vrcp.f32 %v1424_v4  ;;  %v1533_v8 = vmul.f32 1.442695, %v1532_v20  ;;  %v1538_v2 = vmul.f32 1.442695, %v1537_v63 }
 0x323   :  { %2779 = vpow2.f32 %v1533_v8  ;;  %v1505_v13 = vpop.f32.mrf.mxu2  ;;  %v1525_v49 = vpop.f32.mrf.mxu3 }
 0x324   :  { %v2772_v54 = vpop.eup %2771  ;;  %2781 = vpow2.f32 %v1538_v2  ;;  %v1531_v31 = vadd.f32 %v1525_v49, %v7946_v32  ;;  %v1530_v46 = vadd.f32 %v1505_v13, %v7947_v57 }
 0x325   :  { %v2774_v56 = vpop.eup %2773  ;;  %v1430_v52 = vadd.f32 1.0, %v2772_v54 }
 0x326   :  { %v2776_v58 = vpop.eup %2775  ;;  %v1543_v62 = vsub.f32 0.0, %v1531_v31  ;;  %2783 = vtanh.f32 %v1530_v46 }
 0x327   :  { %v2778_v16 = vpop.eup %2777  ;;  %v1433_v26 = vmul.f32 %v2776_v58, %v2774_v56  ;;  %2785 = vrcp.f32 %v1430_v52  ;;  %v5707_v52 = vld [vmem:[%s6985_s2 + $0x1e0] sm:$0xff] }
 0x328   :  { %v1432_v37 = vmul.f32 %v2778_v16, %v5530_v14  ;;  %v1544_v0 = vmul.f32 1.442695, %v1543_v62  ;;  %v5719_v62 = vld [vmem:[%s6985_s2 + $0x1f0] sm:$0xff]  ;;  %v5725_v16 = vld [vmem:[%s6985_s2 + $0x1f8] sm:$0xff] }
 0x329   :  { %v2780_v18 = vpop.eup %2779 }
 0x32a   :  { %v2782_v4 = vpop.eup %2781  ;;  %v5692_v20 = vadd.f32 %v1433_v26, %v1432_v37  ;;  %v1535_v63 = vadd.f32 1.0, %v2780_v18  ;;  %2787 = vpow2.f32 %v1544_v0  ;;  %v5732_v26 = vld [vmem:[%s6985_s2 + $0x1c0] sm:$0xff]  ;;  %v5738_v37 = vld [vmem:[%s6985_s2 + $0x1c8] sm:$0xff]  ;;  %v5744_v0 = vld [vmem:[%s6985_s2 + $0x1d0] sm:$0xff] }
 0x32b   :  { %v1540_v8 = vadd.f32 1.0, %v2782_v4  ;;  %v5750_v18 = vld [vmem:[%s6985_s2 + $0x1d8] sm:$0xff]  ;;  %v5756_v4 = vld [vmem:[%s6985_s2 + $0x1a0] sm:$0xff] }
 0x32c   :  { %2789 = vtanh.f32 %v5692_v20  ;;  %v2784_v2 = vpop.eup %2783 }
 0x32d   :  { %2791 = vrcp.f32 %v1535_v63  ;;  %v2786_v31 = vpop.eup %2785  ;;  %v5762_v63 = vld [vmem:[%s6985_s2 + $0x1a8] sm:$0xff] }
 0x32e   :  { %2793 = vrcp.f32 %v1540_v8  ;;  %v5768_v8 = vld [vmem:[%s6985_s2 + $0x1b0] sm:$0xff] }
 0x330   :  { %v2788_v13 = vpop.eup %2787 }
 0x331   :  { %v1546_v57 = vadd.f32 1.0, %v2788_v13  ;;  %v5786_v13 = vld [vmem:[%s6985_s2 + $0x188] sm:$0xff] }
 0x332   :  { %v2790_v49 = vpop.eup %2789 }
 0x333   :  { %v2792_v54 = vpop.eup %2791  ;;  %v5695_v14 = vmul.f32 %v2790_v49, %v2786_v31  ;;  %2795 = vrcp.f32 %v1546_v57  ;;  %v5780_v31 = vld [vmem:[%s6985_s2 + $0x180] sm:$0xff] }
 0x334   :  { %v2794_v32 = vpop.eup %2793  ;;  %v1549_v56 = vmul.f32 %v2792_v54, %v2784_v2  ;;  %v5774_v2 = vld [vmem:[%s6985_s2 + $0x1b8] sm:$0xff]  ;;  %v5792_v54 = vld [vmem:[%s6985_s2 + $0x190] sm:$0xff]  ;;  %v5804_v57 = vld [vmem:[%s6985_s2 + $0x160] sm:$0xff] }
 0x335   :  { %7948 = vst [vmem:[#allocation17_spill] sm:$0xff] %v5695_v14  ;;  %v1548_v46 = vmul.f32 %v2794_v32, %v5538_v36  ;;  %1577 = vmatmul.f32.vlgmr.msra.gmra.mxu0 %v5695_v14  ;;  %1597 = vmatmul.f32.vlgmr.msra.gmra.mxu1 %v5695_v14  ;;  %v5713_v36 = vld [vmem:[%s6985_s2 + $0x1e8] sm:$0xff]  ;;  %v5798_v32 = vld [vmem:[%s6985_s2 + $0x198] sm:$0xff] }
 0x336   :  { %1617 = vmatmul.f32.vlgmr.msrb.gmra.mxu2 %v5695_v14  ;;  %1637 = vmatmul.f32.vlgmr.msrb.gmra.mxu3 %v5695_v14  ;;  %7949 = vst [vmem:[#allocation5_spill] sm:$0xff] %v5798_v32 }
 0x337   :  { %v5702_v58 = vadd.f32 %v1549_v56, %v1548_v46  ;;  %1781 = vmatpush.msra.mxu0 %v5707_v52  ;;  %1801 = vmatpush.msra.mxu1 %v5713_v36  ;;  %7950 = vst [vmem:[#allocation40_spill] sm:$0xff] %v5804_v57  ;;  %v5810_v46 = vld [vmem:[%s6985_s2 + $0x168] sm:$0xff] }
 0x338   :  { %1821 = vmatpush.msrb.mxu2 %v5719_v62  ;;  %1841 = vmatpush.msrb.mxu3 %v5725_v16  ;;  %7951 = vst [vmem:[#allocation24_spill] sm:$0xff] %v5810_v46 }
 0x339   :  { %2797 = vtanh.f32 %v5702_v58  ;;  %1782 = vmatpush.msra.mxu0 %v5732_v26  ;;  %1802 = vmatpush.msra.mxu1 %v5738_v37  ;;  %v2796_v49 = vpop.eup %2795 }
 0x33a   :  { %1822 = vmatpush.msrb.mxu2 %v5744_v0  ;;  %1842 = vmatpush.msrb.mxu3 %v5750_v18 }
 0x33b   :  { %1783 = vmatpush.msra.mxu0 %v5756_v4  ;;  %1803 = vmatpush.msra.mxu1 %v5762_v63 }
 0x33c   :  { %1823 = vmatpush.msrb.mxu2 %v5768_v8  ;;  %1843 = vmatpush.msrb.mxu3 %v5774_v2 }
 0x33d   :  { %1784 = vmatpush.msra.mxu0 %v5780_v31  ;;  %1804 = vmatpush.msra.mxu1 %v5786_v13 }
 0x33e   :  { %1824 = vmatpush.msrb.mxu2 %v5792_v54  ;;  %1844 = vmatpush.msrb.mxu3 %v5798_v32  ;;  %v5818_v32 = vld [vmem:[%s6985_s2 + $0x170] sm:$0xff] }
 0x33f   :  { %v2798_v56 = vpop.eup %2797  ;;  %1785 = vmatpush.msra.mxu0 %v5804_v57  ;;  %1805 = vmatpush.msra.mxu1 %v5810_v46  ;;  %v5824_v57 = vld [vmem:[%s6985_s2 + $0x178] sm:$0xff]  ;;  %v5830_v46 = vld [vmem:[%s6985_s2 + $0x140] sm:$0xff] }
 0x340   :  { %v5813_v14 = vmul.f32 %v2798_v56, %v2796_v49  ;;  %1825 = vmatpush.msrb.mxu2 %v5818_v32  ;;  %1845 = vmatpush.msrb.mxu3 %v5824_v57  ;;  %7953 = vst [vmem:[#allocation41_spill] sm:$0xff] %v5830_v46  ;;  %v5836_v49 = vld [vmem:[%s6985_s2 + $0x148] sm:$0xff]  ;;  %v5846_v56 = vld [vmem:[%s6985_s2 + $0x150] sm:$0xff] }
 0x341   :  { %1786 = vmatpush.msra.mxu0 %v5830_v46  ;;  %7954 = vst [vmem:[#allocation99_spill] sm:$0xff] %v5836_v49  ;;  %1806 = vmatpush.msra.mxu1 %v5836_v49  ;;  %v5852_v46 = vld [vmem:[%s6985_s2 + $0x158] sm:$0xff]  ;;  %v5858_v49 = vld [vmem:[%s6985_s2 + $0x120] sm:$0xff] }
 0x342   :  { %7952 = vst [vmem:[#allocation46_spill] sm:$0xff] %v5813_v14  ;;  %1687 = vmatmul.f32.vlgmr.msrb.gmra.mxu0 %v5813_v14  ;;  %1707 = vmatmul.f32.vlgmr.msrb.gmra.mxu1 %v5813_v14 }
 0x343   :  { %1727 = vmatmul.f32.vlgmr.msra.gmra.mxu2 %v5813_v14  ;;  %1747 = vmatmul.f32.vlgmr.msra.gmra.mxu3 %v5813_v14  ;;  %7955 = vst [vmem:[#allocation102_spill] sm:$0xff] %v5846_v56  ;;  %v5864_v14 = vld [vmem:[%s6985_s2 + $0x128] sm:$0xff] }
 0x344   :  { %1826 = vmatpush.msrb.mxu2 %v5846_v56  ;;  %7956 = vst [vmem:[#allocation106_spill] sm:$0xff] %v5852_v46  ;;  %1846 = vmatpush.msrb.mxu3 %v5852_v46  ;;  %v5870_v56 = vld [vmem:[%s6985_s2 + $0x130] sm:$0xff]  ;;  %v5876_v46 = vld [vmem:[%s6985_s2 + $0x138] sm:$0xff] }
 0x345   :  { %7957 = vst [vmem:[#allocation69_spill] sm:$0xff] %v5858_v49  ;;  %1787 = vmatpush.msra.mxu0 %v5858_v49  ;;  %1807 = vmatpush.msra.mxu1 %v5864_v14  ;;  %v5882_v49 = vld [vmem:[%s6985_s2 + $0x100] sm:$0xff] }
 0x346   :  { %7958 = vst [vmem:[#allocation51_spill] sm:$0xff] %v5864_v14  ;;  %1827 = vmatpush.msrb.mxu2 %v5870_v56  ;;  %1847 = vmatpush.msrb.mxu3 %v5876_v46  ;;  %v5888_v14 = vld [vmem:[%s6985_s2 + $0x108] sm:$0xff] }
 0x347   :  { %7959 = vst [vmem:[#allocation107_spill] sm:$0xff] %v5870_v56  ;;  %1788 = vmatpush.msra.mxu0 %v5882_v49  ;;  %1808 = vmatpush.msra.mxu1 %v5888_v14  ;;  %v5894_v56 = vld [vmem:[%s6985_s2 + $0x110] sm:$0xff] }
 0x348   :  { %7960 = vst [vmem:[#allocation108_spill] sm:$0xff] %v5876_v46  ;;  %1828 = vmatpush.msrb.mxu2 %v5894_v56  ;;  %v5900_v46 = vld [vmem:[%s6985_s2 + $0x118] sm:$0xff] }
 0x349   :  { %7961 = vst [vmem:[#allocation52_spill] sm:$0xff] %v5882_v49  ;;  %1848 = vmatpush.msrb.mxu3 %v5900_v46  ;;  %v5906_v49 = vld [vmem:[%s6985_s2 + $0xe0] sm:$0xff] }
 0x34a   :  { %7962 = vst [vmem:[#allocation70_spill] sm:$0xff] %v5888_v14  ;;  %1789 = vmatpush.msra.mxu0 %v5906_v49  ;;  %v5912_v14 = vld [vmem:[%s6985_s2 + $0xe8] sm:$0xff] }
 0x34b   :  { %7963 = vst [vmem:[#allocation109_spill] sm:$0xff] %v5894_v56  ;;  %1809 = vmatpush.msra.mxu1 %v5912_v14  ;;  %v5918_v56 = vld [vmem:[%s6985_s2 + $0xf0] sm:$0xff] }
 0x34c   :  { %7964 = vst [vmem:[#allocation110_spill] sm:$0xff] %v5900_v46  ;;  %1829 = vmatpush.msrb.mxu2 %v5918_v56  ;;  %v5924_v46 = vld [vmem:[%s6985_s2 + $0xf8] sm:$0xff] }
 0x34d   :  { %7965 = vst [vmem:[#allocation71_spill] sm:$0xff] %v5906_v49  ;;  %1849 = vmatpush.msrb.mxu3 %v5924_v46  ;;  %v5930_v49 = vld [vmem:[%s6985_s2 + $0xc0] sm:$0xff] }
 0x34e   :  { %7966 = vst [vmem:[#allocation55_spill] sm:$0xff] %v5912_v14  ;;  %1790 = vmatpush.msra.mxu0 %v5930_v49  ;;  %v5936_v14 = vld [vmem:[%s6985_s2 + $0xc8] sm:$0xff] }
 0x34f   :  { %7967 = vst [vmem:[#allocation111_spill] sm:$0xff] %v5918_v56  ;;  %1810 = vmatpush.msra.mxu1 %v5936_v14  ;;  %v5942_v56 = vld [vmem:[%s6985_s2 + $0xd0] sm:$0xff] }
 0x350   :  { %7968 = vst [vmem:[#allocation112_spill] sm:$0xff] %v5924_v46  ;;  %1830 = vmatpush.msrb.mxu2 %v5942_v56  ;;  %v5948_v46 = vld [vmem:[%s6985_s2 + $0xd8] sm:$0xff] }
 0x351   :  { %7969 = vst [vmem:[#allocation56_spill] sm:$0xff] %v5930_v49  ;;  %1850 = vmatpush.msrb.mxu3 %v5948_v46  ;;  %v5954_v49 = vld [vmem:[%s6985_s2 + $0xa0] sm:$0xff] }
 0x352   :  { %7970 = vst [vmem:[#allocation72_spill] sm:$0xff] %v5936_v14  ;;  %1791 = vmatpush.msra.mxu0 %v5954_v49  ;;  %v5960_v14 = vld [vmem:[%s6985_s2 + $0xa8] sm:$0xff]  ;;  %1831 = vmatpush.msrb.mxu2 %v7849_v50  ;;  %v5982_v50 = vld [vmem:[%s6985_s2 + $0x60] sm:$0xff] }
 0x353   :  { %7971 = vst [vmem:[#allocation113_spill] sm:$0xff] %v5948_v46  ;;  %1811 = vmatpush.msra.mxu1 %v5960_v14  ;;  %1851 = vmatpush.msrb.mxu3 %v7850_v43  ;;  %v5968_v46 = vld [vmem:[%s6985_s2 + $0x80] sm:$0xff]  ;;  %v5988_v43 = vld [vmem:[%s6985_s2 + $0x68] sm:$0xff] }
 0x354   :  { %7972 = vst [vmem:[#allocation114_spill] sm:$0xff] %v5954_v49  ;;  %1792 = vmatpush.msra.mxu0 %v5968_v46  ;;  %v5974_v49 = vld [vmem:[%s6985_s2 + $0x88] sm:$0xff]  ;;  %1832 = vmatpush.msrb.mxu2 %v7853_v42  ;;  %v5996_v42 = vld [vmem:[%s6985_s2 + $0x40] sm:$0xff] }
 0x355   :  { %7973 = vst [vmem:[#allocation74_spill] sm:$0xff] %v5960_v14  ;;  %1812 = vmatpush.msra.mxu1 %v5974_v49  ;;  %1852 = vmatpush.msrb.mxu3 %v7854_v12  ;;  %v6002_v12 = vld [vmem:[%s6985_s2 + $0x48] sm:$0xff] }
 0x356   :  { %7974 = vst [vmem:[#allocation59_spill] sm:$0xff] %v5974_v49  ;;  %1793 = vmatpush.msra.mxu0 %v5982_v50  ;;  %1833 = vmatpush.msrb.mxu2 %v7857_v15  ;;  %v6010_v15 = vld [vmem:[%s6985_s2 + $0x20] sm:$0xff] }
 0x357   :  { %7975 = vst [vmem:[#allocation115_spill] sm:$0xff] %v5982_v50  ;;  %1813 = vmatpush.msra.mxu1 %v5988_v43  ;;  %1853 = vmatpush.msrb.mxu3 %v7858_v21  ;;  %v6016_v21 = vld [vmem:[%s6985_s2 + $0x28] sm:$0xff] }
 0x358   :  { %7976 = vst [vmem:[#allocation116_spill] sm:$0xff] %v5988_v43  ;;  %1794 = vmatpush.msra.mxu0 %v5996_v42  ;;  %1834 = vmatpush.msrb.mxu2 %v7861_v29  ;;  %v6024_v29 = vld [vmem:[%s6985_s2] sm:$0xff] }
 0x359   :  { %7977 = vst [vmem:[#allocation60_spill] sm:$0xff] %v5996_v42  ;;  %1814 = vmatpush.msra.mxu1 %v6002_v12  ;;  %1854 = vmatpush.msrb.mxu3 %v7862_v44  ;;  %v6030_v44 = vld [vmem:[%s6985_s2 + $0x8] sm:$0xff] }
 0x35a   :  { %7978 = vst [vmem:[#allocation76_spill] sm:$0xff] %v6002_v12  ;;  %1795 = vmatpush.msra.mxu0 %v6010_v15  ;;  %1835 = vmatpush.msrb.mxu2 %v7865_v6  ;;  %v6038_v6 = vld [vmem:[%s6986_s3 + $0x1e0] sm:$0xff] }
 0x35b   :  { %7979 = vst [vmem:[#allocation117_spill] sm:$0xff] %v6010_v15  ;;  %1815 = vmatpush.msra.mxu1 %v6016_v21  ;;  %1855 = vmatpush.msrb.mxu3 %v7866_v25  ;;  %v6044_v25 = vld [vmem:[%s6986_s3 + $0x1e8] sm:$0xff] }
 0x35c   :  { %7980 = vst [vmem:[#allocation118_spill] sm:$0xff] %v6016_v21  ;;  %1796 = vmatpush.msra.mxu0 %v6024_v29  ;;  %1836 = vmatpush.msrb.mxu2 %v7869_v55  ;;  %v6052_v55 = vld [vmem:[%s6986_s3 + $0x1c0] sm:$0xff] }
 0x35d   :  { %7981 = vst [vmem:[#allocation77_spill] sm:$0xff] %v6024_v29  ;;  %1816 = vmatpush.msra.mxu1 %v6030_v44  ;;  %1856 = vmatpush.msrb.mxu3 %v7870_v9  ;;  %v6058_v9 = vld [vmem:[%s6986_s3 + $0x1c8] sm:$0xff] }
 0x35e   :  { %7982 = vst [vmem:[#allocation83_spill] sm:$0xff] %v6030_v44  ;;  %1891 = vmatpush.msrb.mxu0 %v6038_v6  ;;  %1931 = vmatpush.msra.mxu2 %v7873_v34  ;;  %v6066_v34 = vld [vmem:[%s6986_s3 + $0x1a0] sm:$0xff] }
 0x35f   :  { %7983 = vst [vmem:[#allocation119_spill] sm:$0xff] %v6038_v6  ;;  %1911 = vmatpush.msrb.mxu1 %v6044_v25  ;;  %1951 = vmatpush.msra.mxu3 %v7874_v27  ;;  %v6072_v27 = vld [vmem:[%s6986_s3 + $0x1a8] sm:$0xff] }
 0x360   :  { %7984 = vst [vmem:[#allocation120_spill] sm:$0xff] %v6044_v25  ;;  %1892 = vmatpush.msrb.mxu0 %v6052_v55  ;;  %1932 = vmatpush.msra.mxu2 %v7877_v53  ;;  %v6080_v53 = vld [vmem:[%s6986_s3 + $0x180] sm:$0xff] }
 0x361   :  { %7985 = vst [vmem:[#allocation82_spill] sm:$0xff] %v6052_v55  ;;  %1912 = vmatpush.msrb.mxu1 %v6058_v9  ;;  %1952 = vmatpush.msra.mxu3 %v7878_v61  ;;  %v6086_v61 = vld [vmem:[%s6986_s3 + $0x188] sm:$0xff] }
 0x362   :  { %7986 = vst [vmem:[#allocation13_spill] sm:$0xff] %v6058_v9  ;;  %1893 = vmatpush.msrb.mxu0 %v6066_v34  ;;  %1933 = vmatpush.msra.mxu2 %v7881_v23  ;;  %v6094_v23 = vld [vmem:[%s6986_s3 + $0x160] sm:$0xff] }
 0x363   :  { %7987 = vst [vmem:[#allocation121_spill] sm:$0xff] %v6066_v34  ;;  %1913 = vmatpush.msrb.mxu1 %v6072_v27  ;;  %1953 = vmatpush.msra.mxu3 %v7882_v24  ;;  %v6100_v24 = vld [vmem:[%s6986_s3 + $0x168] sm:$0xff] }
 0x364   :  { %7988 = vst [vmem:[#allocation122_spill] sm:$0xff] %v6072_v27  ;;  %1894 = vmatpush.msrb.mxu0 %v6080_v53  ;;  %1934 = vmatpush.msra.mxu2 %v7885_v19  ;;  %v6108_v19 = vld [vmem:[%s6986_s3 + $0x140] sm:$0xff] }
 0x365   :  { %7989 = vst [vmem:[#allocation84_spill] sm:$0xff] %v6080_v53  ;;  %1914 = vmatpush.msrb.mxu1 %v6086_v61  ;;  %1954 = vmatpush.msra.mxu3 %v7886_v28  ;;  %v6114_v28 = vld [vmem:[%s6986_s3 + $0x148] sm:$0xff] }
 0x366   :  { %7990 = vst [vmem:[#allocation30_spill] sm:$0xff] %v6086_v61  ;;  %1895 = vmatpush.msrb.mxu0 %v6094_v23  ;;  %1935 = vmatpush.msra.mxu2 %v7889_v41  ;;  %v6122_v41 = vld [vmem:[%s6986_s3 + $0x120] sm:$0xff] }
 0x367   :  { %7991 = vst [vmem:[#allocation123_spill] sm:$0xff] %v6094_v23  ;;  %1915 = vmatpush.msrb.mxu1 %v6100_v24  ;;  %1955 = vmatpush.msra.mxu3 %v7890_v3  ;;  %v6128_v3 = vld [vmem:[%s6986_s3 + $0x128] sm:$0xff] }
 0x368   :  { %7992 = vst [vmem:[#allocation124_spill] sm:$0xff] %v6100_v24  ;;  %1896 = vmatpush.msrb.mxu0 %v6108_v19  ;;  %1936 = vmatpush.msra.mxu2 %v7893_v35  ;;  %v6136_v35 = vld [vmem:[%s6986_s3 + $0x100] sm:$0xff] }
 0x369   :  { %7993 = vst [vmem:[#allocation27_spill] sm:$0xff] %v6108_v19  ;;  %1916 = vmatpush.msrb.mxu1 %v6114_v28  ;;  %1956 = vmatpush.msra.mxu3 %v7894_v11  ;;  %v6142_v11 = vld [vmem:[%s6986_s3 + $0x108] sm:$0xff] }
 0x36a   :  { %7994 = vst [vmem:[#allocation53_spill] sm:$0xff] %v6114_v28  ;;  %1897 = vmatpush.msrb.mxu0 %v6122_v41  ;;  %1937 = vmatpush.msra.mxu2 %v7897_v60  ;;  %v6150_v60 = vld [vmem:[%s6986_s3 + $0xe0] sm:$0xff] }
 0x36b   :  { %7995 = vst [vmem:[#allocation125_spill] sm:$0xff] %v6122_v41  ;;  %1917 = vmatpush.msrb.mxu1 %v6128_v3  ;;  %1957 = vmatpush.msra.mxu3 %v7898_v22  ;;  %v6156_v22 = vld [vmem:[%s6986_s3 + $0xe8] sm:$0xff] }
 0x36c   :  { %7996 = vst [vmem:[#allocation126_spill] sm:$0xff] %v6128_v3  ;;  %1898 = vmatpush.msrb.mxu0 %v6136_v35  ;;  %1938 = vmatpush.msra.mxu2 %v7901_v45  ;;  %v6164_v45 = vld [vmem:[%s6986_s3 + $0xc0] sm:$0xff]  ;;  %v8024_v3 = vld [vmem:[#allocation57_spill] sm:$0xff] }
 0x36d   :  { %7997 = vst [vmem:[#allocation50_spill] sm:$0xff] %v6136_v35  ;;  %1918 = vmatpush.msrb.mxu1 %v6142_v11  ;;  %1958 = vmatpush.msra.mxu3 %v7902_v7  ;;  %v6170_v7 = vld [vmem:[%s6986_s3 + $0xc8] sm:$0xff] }
 0x36e   :  { %7998 = vst [vmem:[#allocation64_spill] sm:$0xff] %v6142_v11  ;;  %1899 = vmatpush.msrb.mxu0 %v6150_v60  ;;  %1939 = vmatpush.msra.mxu2 %v7905_v51  ;;  %v6178_v51 = vld [vmem:[%s6986_s3 + $0xa0] sm:$0xff] }
 0x36f   :  { %7999 = vst [vmem:[#allocation127_spill] sm:$0xff] %v6150_v60  ;;  %1919 = vmatpush.msrb.mxu1 %v6156_v22  ;;  %1959 = vmatpush.msra.mxu3 %v7906_v39  ;;  %v6184_v39 = vld [vmem:[%s6986_s3 + $0xa8] sm:$0xff] }
 0x370   :  { %8000 = vst [vmem:[#allocation128_spill] sm:$0xff] %v6156_v22  ;;  %1900 = vmatpush.msrb.mxu0 %v6164_v45  ;;  %1940 = vmatpush.msra.mxu2 %v7909_v1  ;;  %v8005_v1 = vld [vmem:[#allocation103_spill] sm:$0xff] }
 0x371   :  { %8001 = vst [vmem:[#allocation65_spill] sm:$0xff] %v6164_v45  ;;  %1920 = vmatpush.msrb.mxu1 %v6170_v7  ;;  %1960 = vmatpush.msra.mxu3 %v7910_v17  ;;  %v8006_v17 = vld [vmem:[#allocation104_spill] sm:$0xff]  ;;  %v8023_v45 = vld [vmem:[#allocation67_spill] sm:$0xff] }
 0x372   :  { %8002 = vst [vmem:[#allocation85_spill] sm:$0xff] %v6170_v7  ;;  %1901 = vmatpush.msrb.mxu0 %v6178_v51  ;;  %1941 = vmatpush.msra.mxu2 %v7913_v40  ;;  %v8009_v40 = vld [vmem:[#allocation140_spill] sm:$0xff] }
 0x373   :  { %8003 = vst [vmem:[#allocation129_spill] sm:$0xff] %v6178_v51  ;;  %1921 = vmatpush.msrb.mxu1 %v6184_v39  ;;  %1961 = vmatpush.msra.mxu3 %v7914_v30  ;;  %v8007_v51 = vld [vmem:[#allocation105_spill] sm:$0xff] }
 0x374   :  { %8004 = vst [vmem:[#allocation130_spill] sm:$0xff] %v6184_v39  ;;  %1902 = vmatpush.msrb.mxu0 %v7915_v33  ;;  %1942 = vmatpush.msra.mxu2 %v7917_v38  ;;  %v8008_v39 = vld [vmem:[#allocation139_spill] sm:$0xff]  ;;  %v8010_v30 = vld [vmem:[#allocation141_spill] sm:$0xff]  ;;  %v8011_v33 = vld [vmem:[#allocation142_spill] sm:$0xff] }
 0x375   :  { %1922 = vmatpush.msrb.mxu1 %v7916_v48  ;;  %1962 = vmatpush.msra.mxu3 %v7918_v10  ;;  %v8012_v48 = vld [vmem:[#allocation143_spill] sm:$0xff]  ;;  %v8013_v38 = vld [vmem:[#allocation144_spill] sm:$0xff]  ;;  %v8014_v10 = vld [vmem:[#allocation145_spill] sm:$0xff] }
 0x376   :  { %1903 = vmatpush.msrb.mxu0 %v7919_v47  ;;  %1943 = vmatpush.msra.mxu2 %v8006_v17  ;;  %v8015_v47 = vld [vmem:[#allocation146_spill] sm:$0xff]  ;;  %v8017_v17 = vld [vmem:[#allocation148_spill] sm:$0xff] }
 0x377   :  { %1923 = vmatpush.msrb.mxu1 %v8005_v1  ;;  %1963 = vmatpush.msra.mxu3 %v8007_v51  ;;  %v8016_v1 = vld [vmem:[#allocation147_spill] sm:$0xff]  ;;  %v8018_v51 = vld [vmem:[#allocation149_spill] sm:$0xff] }
 0x378   :  { %1904 = vmatpush.msrb.mxu0 %v8008_v39  ;;  %1944 = vmatpush.msra.mxu2 %v8010_v30  ;;  %v8019_v39 = vld [vmem:[#allocation150_spill] sm:$0xff] }
 0x379   :  { %1924 = vmatpush.msrb.mxu1 %v8009_v40  ;;  %1964 = vmatpush.msra.mxu3 %v8011_v33  ;;  %v8020_v40 = vld [vmem:[#allocation42_spill] sm:$0xff] }
 0x37a   :  { %1905 = vmatpush.msrb.mxu0 %v8012_v48  ;;  %1945 = vmatpush.msra.mxu2 %v8014_v10  ;;  %v8021_v30 = vld [vmem:[#allocation66_spill] sm:$0xff] }
 0x37b   :  { %1925 = vmatpush.msrb.mxu1 %v8013_v38  ;;  %1965 = vmatpush.msra.mxu3 %v8015_v47  ;;  %v139_v7 = vadd.f32 %v8021_v30, %v8020_v40  ;;  %v8022_v33 = vld [vmem:[#allocation38_spill] sm:$0xff]  ;;  %v8026_v30 = vld [vmem:[#allocation9_spill] sm:$0xff] }
 0x37c   :  { %1906 = vmatpush.msrb.mxu0 %v8016_v1  ;;  %1946 = vmatpush.msra.mxu2 %v8018_v51  ;;  %v180_v48 = vadd.f32 %v8023_v45, %v8022_v33  ;;  %v221_v40 = vadd.f32 %v8026_v30, %v7941_v59  ;;  %v8030_v59 = vld [vmem:[#allocation34_spill] sm:$0xff] }
 0x37d   :  { %1926 = vmatpush.msrb.mxu1 %v8017_v17  ;;  %1966 = vmatpush.msra.mxu3 %v8019_v39  ;;  %v8025_v17 = vld [vmem:[#allocation10_spill] sm:$0xff] }
 0x37e   :  { %v262_v41 = vadd.f32 %v8025_v17, %v8024_v3 }
 0x3b2   :  { %v1578_v22 = vpop.f32.mrf.mxu0  ;;  %v1598_v38 = vpop.f32.mrf.mxu1 }
 0x3b3   :  { %v1641_v60 = vadd.f32 %v1578_v22, %v139_v7  ;;  %v1642_v10 = vadd.f32 %v1598_v38, %v180_v48  ;;  %v8027_v22 = vld [vmem:[#allocation16_spill] sm:$0xff] }
 0x3b4   :  { %v300_v7 = vadd.f32 %v8027_v22, %v7839_v5  ;;  %v8029_v48 = vld [vmem:[#allocation32_spill] sm:$0xff] }
 0x3b5   :  { %v1645_v11 = vsub.f32 0.0, %v1641_v60  ;;  %v1650_v47 = vsub.f32 0.0, %v1642_v10  ;;  %v8028_v60 = vld [vmem:[#allocation45_spill] sm:$0xff] }
 0x3b7   :  { %v1646_v35 = vmul.f32 1.442695, %v1645_v11  ;;  %v1651_v1 = vmul.f32 1.442695, %v1650_v47  ;;  %v341_v11 = vadd.f32 %v8029_v48, %v8028_v60 }
 0x3b9   :  { %2799 = vpow2.f32 %v1646_v35  ;;  %v1638_v51 = vpop.f32.mrf.mxu3  ;;  %v1618_v39 = vpop.f32.mrf.mxu2 }
 0x3ba   :  { %2801 = vpow2.f32 %v1651_v1  ;;  %v1644_v28 = vadd.f32 %v1638_v51, %v262_v41  ;;  %v1643_v33 = vadd.f32 %v1618_v39, %v221_v40 }
 0x3bc   :  { %v1656_v45 = vsub.f32 0.0, %v1644_v28 }
 0x3be   :  { %v1657_v38 = vmul.f32 1.442695, %v1656_v45 }
 0x3bf   :  { %v2800_v10 = vpop.eup %2799  ;;  %v1688_v47 = vpop.f32.mrf.mxu0 }
 0x3c0   :  { %v1708_v17 = vpop.f32.mrf.mxu1  ;;  %v2802_v35 = vpop.eup %2801  ;;  %v1648_v3 = vadd.f32 1.0, %v2800_v10  ;;  %2803 = vpow2.f32 %v1657_v38  ;;  %v1751_v1 = vadd.f32 %v1688_v47, %v300_v7  ;;  %v8031_v7 = vld [vmem:[#allocation31_spill] sm:$0xff] }
 0x3c1   :  { %v1752_v41 = vadd.f32 %v1708_v17, %v341_v11  ;;  %v1653_v51 = vadd.f32 1.0, %v2802_v35  ;;  %2805 = vtanh.f32 %v1643_v33 }
 0x3c2   :  { %2807 = vrcp.f32 %v1648_v3  ;;  %v1755_v28 = vsub.f32 0.0, %v1751_v1 }
 0x3c3   :  { %v1760_v40 = vsub.f32 0.0, %v1752_v41  ;;  %2809 = vrcp.f32 %v1653_v51 }
 0x3c4   :  { %v1756_v39 = vmul.f32 1.442695, %v1755_v28 }
 0x3c5   :  { %v1761_v30 = vmul.f32 1.442695, %v1760_v40 }
 0x3c6   :  { %v2804_v22 = vpop.eup %2803  ;;  %2811 = vpow2.f32 %v1756_v39  ;;  %v1728_v48 = vpop.f32.mrf.mxu2 }
 0x3c7   :  { %v1748_v45 = vpop.f32.mrf.mxu3  ;;  %v2806_v60 = vpop.eup %2805  ;;  %v1659_v5 = vadd.f32 1.0, %v2804_v22  ;;  %2813 = vpow2.f32 %v1761_v30  ;;  %v1753_v11 = vadd.f32 %v1728_v48, %v8031_v7  ;;  %v8033_v7 = vld [vmem:[#allocation5_spill] sm:$0xff] }
 0x3c8   :  { %v1754_v10 = vadd.f32 %v1748_v45, %v8030_v59  ;;  %v2808_v38 = vpop.eup %2807 }
 0x3c9   :  { %v2810_v47 = vpop.eup %2809  ;;  %v1662_v33 = vmul.f32 %v2808_v38, %v2806_v60  ;;  %2815 = vrcp.f32 %v1659_v5 }
 0x3ca   :  { %v1766_v3 = vsub.f32 0.0, %v1754_v10  ;;  %v1661_v17 = vmul.f32 %v2810_v47, %v5692_v20  ;;  %2817 = vtanh.f32 %v1753_v11  ;;  %v8034_v47 = vld [vmem:[#allocation40_spill] sm:$0xff] }
 0x3cc   :  { %v1767_v35 = vmul.f32 1.442695, %v1766_v3  ;;  %v2812_v1 = vpop.eup %2811  ;;  %v6224_v41 = vadd.f32 %v1662_v33, %v1661_v17  ;;  %v8035_v33 = vld [vmem:[#allocation24_spill] sm:$0xff]  ;;  %v8037_v17 = vld [vmem:[#allocation41_spill] sm:$0xff] }
 0x3cd   :  { %v2814_v51 = vpop.eup %2813  ;;  %v1758_v28 = vadd.f32 1.0, %v2812_v1  ;;  %v8039_v1 = vld [vmem:[#allocation102_spill] sm:$0xff] }
 0x3ce   :  { %2819 = vpow2.f32 %v1767_v35  ;;  %v1763_v59 = vadd.f32 1.0, %v2814_v51  ;;  %v8038_v35 = vld [vmem:[#allocation99_spill] sm:$0xff]  ;;  %v8040_v51 = vld [vmem:[#allocation106_spill] sm:$0xff] }
 0x3cf   :  { %2821 = vtanh.f32 %v6224_v41  ;;  %v2816_v40 = vpop.eup %2815 }
 0x3d0   :  { %2823 = vrcp.f32 %v1758_v28  ;;  %v2818_v39 = vpop.eup %2817  ;;  %v8041_v28 = vld [vmem:[#allocation69_spill] sm:$0xff] }
 0x3d1   :  { %2825 = vrcp.f32 %v1763_v59  ;;  %v8042_v59 = vld [vmem:[#allocation51_spill] sm:$0xff] }
 0x3d4   :  { %v2820_v60 = vpop.eup %2819 }
 0x3d5   :  { %v2822_v30 = vpop.eup %2821  ;;  %v1769_v45 = vadd.f32 1.0, %v2820_v60  ;;  %v8045_v60 = vld [vmem:[#allocation52_spill] sm:$0xff] }
 0x3d6   :  { %v2824_v22 = vpop.eup %2823  ;;  %v6227_v20 = vmul.f32 %v2822_v30, %v2816_v40  ;;  %v8043_v40 = vld [vmem:[#allocation107_spill] sm:$0xff]  ;;  %v8046_v30 = vld [vmem:[#allocation70_spill] sm:$0xff] }
 0x3d7   :  { %v2826_v5 = vpop.eup %2825  ;;  %v1772_v48 = vmul.f32 %v2824_v22, %v2818_v39  ;;  %2827 = vrcp.f32 %v1769_v45  ;;  %v8044_v39 = vld [vmem:[#allocation108_spill] sm:$0xff]  ;;  %v8047_v22 = vld [vmem:[#allocation109_spill] sm:$0xff]  ;;  %v8050_v45 = vld [vmem:[#allocation55_spill] sm:$0xff] }
 0x3d8   :  { %8032 = vst [vmem:[#allocation86_spill] sm:$0xff] %v6227_v20  ;;  %v1771_v10 = vmul.f32 %v2826_v5, %v5702_v58  ;;  %1797 = vmatmul.f32.vlgmr.msra.gmra.mxu0 %v6227_v20  ;;  %1817 = vmatmul.f32.vlgmr.msra.gmra.mxu1 %v6227_v20  ;;  %v8048_v5 = vld [vmem:[#allocation110_spill] sm:$0xff] }
 0x3d9   :  { %1837 = vmatmul.f32.vlgmr.msrb.gmra.mxu2 %v6227_v20  ;;  %1857 = vmatmul.f32.vlgmr.msrb.gmra.mxu3 %v6227_v20  ;;  %v8055_v20 = vld [vmem:[#allocation113_spill] sm:$0xff] }
 0x3da   :  { %v6234_v38 = vadd.f32 %v1772_v48, %v1771_v10  ;;  %2001 = vmatpush.msra.mxu0 %v5707_v52  ;;  %2021 = vmatpush.msra.mxu1 %v5713_v36  ;;  %v8049_v48 = vld [vmem:[#allocation71_spill] sm:$0xff] }
 0x3db   :  { %2041 = vmatpush.msrb.mxu2 %v5719_v62  ;;  %2061 = vmatpush.msrb.mxu3 %v5725_v16  ;;  %v8051_v10 = vld [vmem:[#allocation111_spill] sm:$0xff] }
 0x3dc   :  { %2829 = vtanh.f32 %v6234_v38  ;;  %2002 = vmatpush.msra.mxu0 %v5732_v26  ;;  %2022 = vmatpush.msra.mxu1 %v5738_v37 }
 0x3dd   :  { %2042 = vmatpush.msrb.mxu2 %v5744_v0  ;;  %2062 = vmatpush.msrb.mxu3 %v5750_v18  ;;  %v2828_v58 = vpop.eup %2827 }
 0x3de   :  { %2003 = vmatpush.msra.mxu0 %v5756_v4  ;;  %2023 = vmatpush.msra.mxu1 %v5762_v63 }
 0x3df   :  { %2043 = vmatpush.msrb.mxu2 %v5768_v8  ;;  %2063 = vmatpush.msrb.mxu3 %v5774_v2 }
 0x3e0   :  { %2004 = vmatpush.msra.mxu0 %v5780_v31  ;;  %2024 = vmatpush.msra.mxu1 %v5786_v13 }
 0x3e1   :  { %2044 = vmatpush.msrb.mxu2 %v5792_v54  ;;  %2064 = vmatpush.msrb.mxu3 %v8033_v7 }
 0x3e2   :  { %v2830_v11 = vpop.eup %2829  ;;  %2005 = vmatpush.msra.mxu0 %v8034_v47  ;;  %2025 = vmatpush.msra.mxu1 %v8035_v33 }
 0x3e3   :  { %v6255_v3 = vmul.f32 %v2830_v11, %v2828_v58  ;;  %2045 = vmatpush.msrb.mxu2 %v5818_v32  ;;  %2065 = vmatpush.msrb.mxu3 %v5824_v57  ;;  %v8052_v58 = vld [vmem:[#allocation112_spill] sm:$0xff] }
 0x3e4   :  { %2006 = vmatpush.msra.mxu0 %v8037_v17  ;;  %2026 = vmatpush.msra.mxu1 %v8038_v35  ;;  %v8053_v11 = vld [vmem:[#allocation56_spill] sm:$0xff] }
 0x3e5   :  { %8036 = vst [vmem:[#allocation87_spill] sm:$0xff] %v6255_v3  ;;  %1907 = vmatmul.f32.vlgmr.msrb.gmra.mxu0 %v6255_v3  ;;  %1927 = vmatmul.f32.vlgmr.msrb.gmra.mxu1 %v6255_v3 }
 0x3e6   :  { %1947 = vmatmul.f32.vlgmr.msra.gmra.mxu2 %v6255_v3  ;;  %1967 = vmatmul.f32.vlgmr.msra.gmra.mxu3 %v6255_v3  ;;  %v8054_v3 = vld [vmem:[#allocation72_spill] sm:$0xff] }
 0x3e7   :  { %2046 = vmatpush.msrb.mxu2 %v8039_v1  ;;  %2066 = vmatpush.msrb.mxu3 %v8040_v51 }
 0x3e8   :  { %2007 = vmatpush.msra.mxu0 %v8041_v28  ;;  %2027 = vmatpush.msra.mxu1 %v8042_v59 }
 0x3e9   :  { %2047 = vmatpush.msrb.mxu2 %v8043_v40  ;;  %2067 = vmatpush.msrb.mxu3 %v8044_v39 }
 0x3ea   :  { %2008 = vmatpush.msra.mxu0 %v8045_v60  ;;  %2028 = vmatpush.msra.mxu1 %v8046_v30  ;;  %v8056_v30 = vld [vmem:[#allocation114_spill] sm:$0xff] }
 0x3eb   :  { %2048 = vmatpush.msrb.mxu2 %v8047_v22  ;;  %2068 = vmatpush.msrb.mxu3 %v8048_v5 }
 0x3ec   :  { %2009 = vmatpush.msra.mxu0 %v8049_v48  ;;  %2029 = vmatpush.msra.mxu1 %v8050_v45  ;;  %v6288_v45 = vld [vmem:[%s6985_s2 + $0xb0] sm:$0xff] }
 0x3ed   :  { %2049 = vmatpush.msrb.mxu2 %v8051_v10  ;;  %2069 = vmatpush.msrb.mxu3 %v8052_v58  ;;  %8057 = vst [vmem:[#allocation131_spill] sm:$0xff] %v6288_v45  ;;  %v6294_v58 = vld [vmem:[%s6985_s2 + $0xb8] sm:$0xff] }
 0x3ee   :  { %2010 = vmatpush.msra.mxu0 %v8053_v11  ;;  %2030 = vmatpush.msra.mxu1 %v8054_v3 }
 0x3ef   :  { %2050 = vmatpush.msrb.mxu2 %v5942_v56  ;;  %2070 = vmatpush.msrb.mxu3 %v8055_v20 }
 0x3f0   :  { %2011 = vmatpush.msra.mxu0 %v8056_v30  ;;  %2031 = vmatpush.msra.mxu1 %v5960_v14  ;;  %v6302_v14 = vld [vmem:[%s6985_s2 + $0x90] sm:$0xff] }
 0x3f1   :  { %2051 = vmatpush.msrb.mxu2 %v6288_v45  ;;  %2071 = vmatpush.msrb.mxu3 %v6294_v58  ;;  %8058 = vst [vmem:[#allocation132_spill] sm:$0xff] %v6302_v14  ;;  %v6308_v45 = vld [vmem:[%s6985_s2 + $0x98] sm:$0xff] }
 0x3f2   :  { %2012 = vmatpush.msra.mxu0 %v5968_v46  ;;  %2032 = vmatpush.msra.mxu1 %v5974_v49  ;;  %8059 = vst [vmem:[#allocation88_spill] sm:$0xff] %v6308_v45  ;;  %v6316_v49 = vld [vmem:[%s6985_s2 + $0x70] sm:$0xff] }
 0x3f3   :  { %2052 = vmatpush.msrb.mxu2 %v6302_v14  ;;  %2072 = vmatpush.msrb.mxu3 %v6308_v45  ;;  %8060 = vst [vmem:[#allocation89_spill] sm:$0xff] %v6316_v49  ;;  %v6322_v14 = vld [vmem:[%s6985_s2 + $0x78] sm:$0xff] }
 0x3f4   :  { %2013 = vmatpush.msra.mxu0 %v5982_v50  ;;  %2033 = vmatpush.msra.mxu1 %v5988_v43  ;;  %8061 = vst [vmem:[#allocation133_spill] sm:$0xff] %v6322_v14  ;;  %v6330_v43 = vld [vmem:[%s6985_s2 + $0x50] sm:$0xff]  ;;  %v8129_v50 = vld [vmem:[#allocation49_spill] sm:$0xff] }
 0x3f5   :  { %2053 = vmatpush.msrb.mxu2 %v6316_v49  ;;  %2073 = vmatpush.msrb.mxu3 %v6322_v14  ;;  %8062 = vst [vmem:[#allocation134_spill] sm:$0xff] %v6330_v43  ;;  %v6336_v49 = vld [vmem:[%s6985_s2 + $0x58] sm:$0xff] }
 0x3f6   :  { %2014 = vmatpush.msra.mxu0 %v5996_v42  ;;  %2034 = vmatpush.msra.mxu1 %v6002_v12  ;;  %8063 = vst [vmem:[#allocation90_spill] sm:$0xff] %v6336_v49  ;;  %v6344_v12 = vld [vmem:[%s6985_s2 + $0x30] sm:$0xff] }
 0x3f7   :  { %2054 = vmatpush.msrb.mxu2 %v6330_v43  ;;  %2074 = vmatpush.msrb.mxu3 %v6336_v49  ;;  %8064 = vst [vmem:[#allocation91_spill] sm:$0xff] %v6344_v12  ;;  %v6350_v43 = vld [vmem:[%s6985_s2 + $0x38] sm:$0xff]  ;;  %v8126_v49 = vld [vmem:[#allocation28_spill] sm:$0xff] }
 0x3f8   :  { %2015 = vmatpush.msra.mxu0 %v6010_v15  ;;  %2035 = vmatpush.msra.mxu1 %v6016_v21  ;;  %8065 = vst [vmem:[#allocation135_spill] sm:$0xff] %v6350_v43  ;;  %v6358_v21 = vld [vmem:[%s6985_s2 + $0x10] sm:$0xff] }
 0x3f9   :  { %2055 = vmatpush.msrb.mxu2 %v6344_v12  ;;  %2075 = vmatpush.msrb.mxu3 %v6350_v43  ;;  %8066 = vst [vmem:[#allocation136_spill] sm:$0xff] %v6358_v21  ;;  %v6364_v12 = vld [vmem:[%s6985_s2 + $0x18] sm:$0xff] }
 0x3fa   :  { %2016 = vmatpush.msra.mxu0 %v6024_v29  ;;  %2036 = vmatpush.msra.mxu1 %v6030_v44  ;;  %8067 = vst [vmem:[#allocation92_spill] sm:$0xff] %v6364_v12  ;;  %v6372_v44 = vld [vmem:[%s6986_s3 + $0x1f0] sm:$0xff]  ;;  %v8125_v29 = vld [vmem:[#allocation57_spill] sm:$0xff] }
 0x3fb   :  { %2056 = vmatpush.msrb.mxu2 %v6358_v21  ;;  %2076 = vmatpush.msrb.mxu3 %v6364_v12  ;;  %8068 = vst [vmem:[#allocation93_spill] sm:$0xff] %v6372_v44  ;;  %v6378_v21 = vld [vmem:[%s6986_s3 + $0x1f8] sm:$0xff]  ;;  %v265_v15 = vadd.f32 %v8126_v49, %v8125_v29 }
 0x3fc   :  { %2111 = vmatpush.msrb.mxu0 %v6038_v6  ;;  %2131 = vmatpush.msrb.mxu1 %v6044_v25  ;;  %8069 = vst [vmem:[#allocation137_spill] sm:$0xff] %v6378_v21  ;;  %v6386_v25 = vld [vmem:[%s6986_s3 + $0x1d0] sm:$0xff] }
 0x3fd   :  { %2151 = vmatpush.msra.mxu2 %v6372_v44  ;;  %2171 = vmatpush.msra.mxu3 %v6378_v21  ;;  %8070 = vst [vmem:[#allocation138_spill] sm:$0xff] %v6386_v25  ;;  %v6392_v44 = vld [vmem:[%s6986_s3 + $0x1d8] sm:$0xff] }
 0x3fe   :  { %2112 = vmatpush.msrb.mxu0 %v6052_v55  ;;  %2132 = vmatpush.msrb.mxu1 %v6058_v9  ;;  %8071 = vst [vmem:[#allocation94_spill] sm:$0xff] %v6392_v44  ;;  %v6400_v9 = vld [vmem:[%s6986_s3 + $0x1b0] sm:$0xff] }
 0x3ff   :  { %2152 = vmatpush.msra.mxu2 %v6386_v25  ;;  %2172 = vmatpush.msra.mxu3 %v6392_v44  ;;  %8072 = vst [vmem:[#allocation95_spill] sm:$0xff] %v6400_v9  ;;  %v6406_v25 = vld [vmem:[%s6986_s3 + $0x1b8] sm:$0xff] }
 0x400   :  { %2113 = vmatpush.msrb.mxu0 %v6066_v34  ;;  %2133 = vmatpush.msrb.mxu1 %v6072_v27  ;;  %8073 = vst [vmem:[#allocation96_spill] sm:$0xff] %v6406_v25  ;;  %v6414_v27 = vld [vmem:[%s6986_s3 + $0x190] sm:$0xff]  ;;  %v8124_v44 = vld [vmem:[#allocation75_spill] sm:$0xff] }
 0x401   :  { %2153 = vmatpush.msra.mxu2 %v6400_v9  ;;  %2173 = vmatpush.msra.mxu3 %v6406_v25  ;;  %8074 = vst [vmem:[#allocation97_spill] sm:$0xff] %v6414_v27  ;;  %v6420_v9 = vld [vmem:[%s6986_s3 + $0x198] sm:$0xff]  ;;  %v8081_v25 = vld [vmem:[#allocation125_spill] sm:$0xff] }
 0x402   :  { %2114 = vmatpush.msrb.mxu0 %v6080_v53  ;;  %2134 = vmatpush.msrb.mxu1 %v6086_v61  ;;  %8075 = vst [vmem:[#allocation98_spill] sm:$0xff] %v6420_v9  ;;  %v6428_v61 = vld [vmem:[%s6986_s3 + $0x170] sm:$0xff] }
 0x403   :  { %2154 = vmatpush.msra.mxu2 %v6414_v27  ;;  %2174 = vmatpush.msra.mxu3 %v6420_v9  ;;  %8076 = vst [vmem:[#allocation100_spill] sm:$0xff] %v6428_v61  ;;  %v6434_v27 = vld [vmem:[%s6986_s3 + $0x178] sm:$0xff]  ;;  %v8078_v9 = vld [vmem:[#allocation53_spill] sm:$0xff] }
 0x404   :  { %2115 = vmatpush.msrb.mxu0 %v6094_v23  ;;  %2135 = vmatpush.msrb.mxu1 %v6100_v24  ;;  %8077 = vst [vmem:[#allocation101_spill] sm:$0xff] %v6434_v27  ;;  %v6442_v24 = vld [vmem:[%s6986_s3 + $0x150] sm:$0xff] }
 0x405   :  { %2155 = vmatpush.msra.mxu2 %v6428_v61  ;;  %2175 = vmatpush.msra.mxu3 %v6434_v27  ;;  %8079 = vst [vmem:[#allocation62_spill] sm:$0xff] %v6442_v24  ;;  %v6448_v61 = vld [vmem:[%s6986_s3 + $0x158] sm:$0xff]  ;;  %v8082_v27 = vld [vmem:[#allocation126_spill] sm:$0xff] }
 0x406   :  { %2116 = vmatpush.msrb.mxu0 %v6108_v19  ;;  %2136 = vmatpush.msrb.mxu1 %v8078_v9  ;;  %8080 = vst [vmem:[#allocation63_spill] sm:$0xff] %v6448_v61  ;;  %v6456_v9 = vld [vmem:[%s6986_s3 + $0x130] sm:$0xff] }
 0x407   :  { %2156 = vmatpush.msra.mxu2 %v6442_v24  ;;  %2176 = vmatpush.msra.mxu3 %v6448_v61  ;;  %8083 = vst [vmem:[#allocation21_spill] sm:$0xff] %v6456_v9  ;;  %v6462_v24 = vld [vmem:[%s6986_s3 + $0x138] sm:$0xff]  ;;  %v8085_v19 = vld [vmem:[#allocation50_spill] sm:$0xff]  ;;  %v8086_v61 = vld [vmem:[#allocation64_spill] sm:$0xff] }
 0x408   :  { %2117 = vmatpush.msrb.mxu0 %v8081_v25  ;;  %2137 = vmatpush.msrb.mxu1 %v8082_v27  ;;  %8084 = vst [vmem:[#allocation7_spill] sm:$0xff] %v6462_v24  ;;  %v6470_v27 = vld [vmem:[%s6986_s3 + $0x110] sm:$0xff]  ;;  %v8089_v25 = vld [vmem:[#allocation127_spill] sm:$0xff] }
 0x409   :  { %2157 = vmatpush.msra.mxu2 %v6456_v9  ;;  %2177 = vmatpush.msra.mxu3 %v6462_v24  ;;  %8087 = vst [vmem:[#allocation36_spill] sm:$0xff] %v6470_v27  ;;  %v6476_v9 = vld [vmem:[%s6986_s3 + $0x118] sm:$0xff]  ;;  %v8090_v24 = vld [vmem:[#allocation128_spill] sm:$0xff]  ;;  %v8123_v23 = vld [vmem:[#allocation38_spill] sm:$0xff] }
 0x40a   :  { %2118 = vmatpush.msrb.mxu0 %v8085_v19  ;;  %2138 = vmatpush.msrb.mxu1 %v8086_v61  ;;  %8088 = vst [vmem:[#allocation20_spill] sm:$0xff] %v6476_v9  ;;  %v6484_v61 = vld [vmem:[%s6986_s3 + $0xf0] sm:$0xff]  ;;  %v8093_v19 = vld [vmem:[#allocation65_spill] sm:$0xff] }
 0x40b   :  { %2158 = vmatpush.msra.mxu2 %v6470_v27  ;;  %2178 = vmatpush.msra.mxu3 %v6476_v9  ;;  %8091 = vst [vmem:[#allocation37_spill] sm:$0xff] %v6484_v61  ;;  %v6490_v27 = vld [vmem:[%s6986_s3 + $0xf8] sm:$0xff]  ;;  %v8094_v9 = vld [vmem:[#allocation85_spill] sm:$0xff] }
 0x40c   :  { %2119 = vmatpush.msrb.mxu0 %v8089_v25  ;;  %2139 = vmatpush.msrb.mxu1 %v8090_v24  ;;  %8092 = vst [vmem:[#allocation35_spill] sm:$0xff] %v6490_v27  ;;  %v6498_v24 = vld [vmem:[%s6986_s3 + $0xd0] sm:$0xff]  ;;  %v8097_v25 = vld [vmem:[#allocation129_spill] sm:$0xff] }
 0x40d   :  { %2159 = vmatpush.msra.mxu2 %v6484_v61  ;;  %2179 = vmatpush.msra.mxu3 %v6490_v27  ;;  %8095 = vst [vmem:[#allocation103_spill] sm:$0xff] %v6498_v24  ;;  %v6504_v61 = vld [vmem:[%s6986_s3 + $0xd8] sm:$0xff]  ;;  %v8098_v27 = vld [vmem:[#allocation130_spill] sm:$0xff] }
 0x40e   :  { %2120 = vmatpush.msrb.mxu0 %v8093_v19  ;;  %2140 = vmatpush.msrb.mxu1 %v8094_v9  ;;  %8096 = vst [vmem:[#allocation104_spill] sm:$0xff] %v6504_v61  ;;  %v6512_v9 = vld [vmem:[%s6986_s3 + $0xb0] sm:$0xff] }
 0x40f   :  { %2160 = vmatpush.msra.mxu2 %v6498_v24  ;;  %2180 = vmatpush.msra.mxu3 %v6504_v61  ;;  %8099 = vst [vmem:[#allocation105_spill] sm:$0xff] %v6512_v9  ;;  %v6518_v24 = vld [vmem:[%s6986_s3 + $0xb8] sm:$0xff]  ;;  %v6524_v61 = vld [vmem:[%s6986_s3 + $0x80] sm:$0xff] }
 0x410   :  { %2121 = vmatpush.msrb.mxu0 %v8097_v25  ;;  %2141 = vmatpush.msrb.mxu1 %v8098_v27  ;;  %8100 = vst [vmem:[#allocation139_spill] sm:$0xff] %v6518_v24  ;;  %v6530_v27 = vld [vmem:[%s6986_s3 + $0x88] sm:$0xff] }
 0x411   :  { %2161 = vmatpush.msra.mxu2 %v6512_v9  ;;  %2181 = vmatpush.msra.mxu3 %v6518_v24  ;;  %8101 = vst [vmem:[#allocation140_spill] sm:$0xff] %v6524_v61  ;;  %v6536_v9 = vld [vmem:[%s6986_s3 + $0x90] sm:$0xff]  ;;  %v6542_v24 = vld [vmem:[%s6986_s3 + $0x98] sm:$0xff]  ;;  %v8122_v25 = vld [vmem:[#allocation73_spill] sm:$0xff] }
 0x412   :  { %2122 = vmatpush.msrb.mxu0 %v6524_v61  ;;  %8102 = vst [vmem:[#allocation141_spill] sm:$0xff] %v6530_v27  ;;  %2142 = vmatpush.msrb.mxu1 %v6530_v27  ;;  %v6548_v61 = vld [vmem:[%s6986_s3 + $0x60] sm:$0xff]  ;;  %v6554_v27 = vld [vmem:[%s6986_s3 + $0x68] sm:$0xff] }
 0x413   :  { %8103 = vst [vmem:[#allocation142_spill] sm:$0xff] %v6536_v9  ;;  %2162 = vmatpush.msra.mxu2 %v6536_v9  ;;  %2182 = vmatpush.msra.mxu3 %v6542_v24  ;;  %v6560_v9 = vld [vmem:[%s6986_s3 + $0x70] sm:$0xff] }
 0x414   :  { %8104 = vst [vmem:[#allocation143_spill] sm:$0xff] %v6542_v24  ;;  %2123 = vmatpush.msrb.mxu0 %v6548_v61  ;;  %2143 = vmatpush.msrb.mxu1 %v6554_v27  ;;  %v6566_v24 = vld [vmem:[%s6986_s3 + $0x78] sm:$0xff] }
 0x415   :  { %8105 = vst [vmem:[#allocation144_spill] sm:$0xff] %v6548_v61  ;;  %2163 = vmatpush.msra.mxu2 %v6560_v9  ;;  %2183 = vmatpush.msra.mxu3 %v6566_v24  ;;  %v6572_v61 = vld [vmem:[%s6986_s3 + $0x40] sm:$0xff] }
 0x416   :  { %8106 = vst [vmem:[#allocation145_spill] sm:$0xff] %v6554_v27  ;;  %2124 = vmatpush.msrb.mxu0 %v6572_v61  ;;  %v6578_v27 = vld [vmem:[%s6986_s3 + $0x48] sm:$0xff] }
 0x417   :  { %8107 = vst [vmem:[#allocation146_spill] sm:$0xff] %v6560_v9  ;;  %2144 = vmatpush.msrb.mxu1 %v6578_v27  ;;  %v6584_v9 = vld [vmem:[%s6986_s3 + $0x50] sm:$0xff] }
 0x418   :  { %8108 = vst [vmem:[#allocation147_spill] sm:$0xff] %v6566_v24  ;;  %2164 = vmatpush.msra.mxu2 %v6584_v9  ;;  %v6590_v24 = vld [vmem:[%s6986_s3 + $0x58] sm:$0xff] }
 0x419   :  { %8109 = vst [vmem:[#allocation148_spill] sm:$0xff] %v6572_v61  ;;  %2184 = vmatpush.msra.mxu3 %v6590_v24  ;;  %v6596_v61 = vld [vmem:[%s6986_s3 + $0x20] sm:$0xff] }
 0x41a   :  { %8110 = vst [vmem:[#allocation149_spill] sm:$0xff] %v6578_v27  ;;  %2125 = vmatpush.msrb.mxu0 %v6596_v61  ;;  %v6602_v27 = vld [vmem:[%s6986_s3 + $0x28] sm:$0xff] }
 0x41b   :  { %8111 = vst [vmem:[#allocation150_spill] sm:$0xff] %v6584_v9  ;;  %2145 = vmatpush.msrb.mxu1 %v6602_v27  ;;  %v6608_v9 = vld [vmem:[%s6986_s3 + $0x30] sm:$0xff] }
 0x41c   :  { %8112 = vst [vmem:[#allocation66_spill] sm:$0xff] %v6590_v24  ;;  %2165 = vmatpush.msra.mxu2 %v6608_v9  ;;  %v6614_v24 = vld [vmem:[%s6986_s3 + $0x38] sm:$0xff] }
 0x41d   :  { %8113 = vst [vmem:[#allocation67_spill] sm:$0xff] %v6596_v61  ;;  %2185 = vmatpush.msra.mxu3 %v6614_v24  ;;  %v6620_v61 = vld [vmem:[%s6986_s3] sm:$0xff] }
 0x41e   :  { %8114 = vst [vmem:[#allocation10_spill] sm:$0xff] %v6602_v27  ;;  %2126 = vmatpush.msrb.mxu0 %v6620_v61  ;;  %v6626_v27 = vld [vmem:[%s6986_s3 + $0x8] sm:$0xff] }
 0x41f   :  { %8115 = vst [vmem:[#allocation9_spill] sm:$0xff] %v6608_v9  ;;  %2146 = vmatpush.msrb.mxu1 %v6626_v27  ;;  %v6632_v9 = vld [vmem:[%s6986_s3 + $0x10] sm:$0xff] }
 0x420   :  { %8116 = vst [vmem:[#allocation16_spill] sm:$0xff] %v6614_v24  ;;  %2166 = vmatpush.msra.mxu2 %v6632_v9  ;;  %v6638_v24 = vld [vmem:[%s6986_s3 + $0x18] sm:$0xff] }
 0x421   :  { %8117 = vst [vmem:[#allocation32_spill] sm:$0xff] %v6620_v61  ;;  %2186 = vmatpush.msra.mxu3 %v6638_v24  ;;  %v8121_v61 = vld [vmem:[#allocation42_spill] sm:$0xff] }
 0x422   :  { %8118 = vst [vmem:[#allocation34_spill] sm:$0xff] %v6626_v27  ;;  %v142_v19 = vadd.f32 %v8122_v25, %v8121_v61  ;;  %v183_v27 = vadd.f32 %v8124_v44, %v8123_v23  ;;  %v8127_v25 = vld [vmem:[#allocation54_spill] sm:$0xff]  ;;  %v8128_v61 = vld [vmem:[#allocation25_spill] sm:$0xff] }
 0x423   :  { %8119 = vst [vmem:[#allocation31_spill] sm:$0xff] %v6632_v9  ;;  %v224_v45 = vadd.f32 %v8128_v61, %v8127_v25  ;;  %v8133_v25 = vld [vmem:[#allocation47_spill] sm:$0xff] }
 0x424   :  { %8120 = vst [vmem:[#allocation5_spill] sm:$0xff] %v6638_v24 }
 0x455   :  { %v1798_v53 = vpop.f32.mrf.mxu0  ;;  %v1818_v21 = vpop.f32.mrf.mxu1 }
 0x456   :  { %v1861_v34 = vadd.f32 %v1798_v53, %v142_v19  ;;  %v1862_v12 = vadd.f32 %v1818_v21, %v183_v27  ;;  %v8130_v53 = vld [vmem:[#allocation12_spill] sm:$0xff] }
 0x457   :  { %v297_v21 = vadd.f32 %v8130_v53, %v8129_v50 }
 0x458   :  { %v1865_v55 = vsub.f32 0.0, %v1861_v34  ;;  %v1870_v43 = vsub.f32 0.0, %v1862_v12  ;;  %v8131_v34 = vld [vmem:[#allocation45_spill] sm:$0xff]  ;;  %v8132_v12 = vld [vmem:[#allocation11_spill] sm:$0xff] }
 0x45a   :  { %v1866_v9 = vmul.f32 1.442695, %v1865_v55  ;;  %v1871_v6 = vmul.f32 1.442695, %v1870_v43  ;;  %v338_v55 = vadd.f32 %v8132_v12, %v8131_v34 }
 0x45c   :  { %2831 = vpow2.f32 %v1866_v9  ;;  %v1858_v14 = vpop.f32.mrf.mxu3  ;;  %v1838_v24 = vpop.f32.mrf.mxu2 }
 0x45d   :  { %2833 = vpow2.f32 %v1871_v6  ;;  %v1864_v42 = vadd.f32 %v1858_v14, %v265_v15  ;;  %v1863_v23 = vadd.f32 %v1838_v24, %v224_v45 }
 0x45f   :  { %v1876_v44 = vsub.f32 0.0, %v1864_v42 }
 0x461   :  { %v1877_v43 = vmul.f32 1.442695, %v1876_v44 }
 0x462   :  { %v2832_v27 = vpop.eup %2831  ;;  %v1908_v19 = vpop.f32.mrf.mxu0 }
 0x463   :  { %v1928_v49 = vpop.f32.mrf.mxu1  ;;  %v2834_v9 = vpop.eup %2833  ;;  %v1868_v29 = vadd.f32 1.0, %v2832_v27  ;;  %2835 = vpow2.f32 %v1877_v43  ;;  %v1971_v6 = vadd.f32 %v1908_v19, %v297_v21  ;;  %v8134_v21 = vld [vmem:[#allocation44_spill] sm:$0xff] }
 0x464   :  { %v1972_v14 = vadd.f32 %v1928_v49, %v338_v55  ;;  %v1873_v15 = vadd.f32 1.0, %v2834_v9  ;;  %2837 = vtanh.f32 %v1863_v23 }
 0x465   :  { %2839 = vrcp.f32 %v1868_v29  ;;  %v1975_v42 = vsub.f32 0.0, %v1971_v6 }
 0x466   :  { %v1980_v61 = vsub.f32 0.0, %v1972_v14  ;;  %2841 = vrcp.f32 %v1873_v15 }
 0x467   :  { %v1976_v24 = vmul.f32 1.442695, %v1975_v42 }
 0x468   :  { %v1981_v45 = vmul.f32 1.442695, %v1980_v61 }
 0x469   :  { %v2836_v53 = vpop.eup %2835  ;;  %2843 = vpow2.f32 %v1976_v24  ;;  %v1948_v12 = vpop.f32.mrf.mxu2 }
 0x46a   :  { %v1968_v44 = vpop.f32.mrf.mxu3  ;;  %v2838_v34 = vpop.eup %2837  ;;  %v1879_v50 = vadd.f32 1.0, %v2836_v53  ;;  %2845 = vpow2.f32 %v1981_v45  ;;  %v1973_v55 = vadd.f32 %v1948_v12, %v8134_v21  ;;  %v8173_v21 = vld [vmem:[#allocation30_spill] sm:$0xff] }
 0x46b   :  { %v1974_v27 = vadd.f32 %v1968_v44, %v8133_v25  ;;  %v2840_v43 = vpop.eup %2839 }
 0x46c   :  { %v2842_v19 = vpop.eup %2841  ;;  %v1882_v23 = vmul.f32 %v2840_v43, %v2838_v34  ;;  %2847 = vrcp.f32 %v1879_v50 }
 0x46d   :  { %v1986_v29 = vsub.f32 0.0, %v1974_v27  ;;  %v1881_v49 = vmul.f32 %v2842_v19, %v6224_v41  ;;  %2849 = vtanh.f32 %v1973_v55  ;;  %v8174_v55 = vld [vmem:[#allocation97_spill] sm:$0xff]  ;;  %v8175_v19 = vld [vmem:[#allocation27_spill] sm:$0xff] }
 0x46f   :  { %v1987_v9 = vmul.f32 1.442695, %v1986_v29  ;;  %v2844_v6 = vpop.eup %2843  ;;  %v6656_v14 = vadd.f32 %v1882_v23, %v1881_v49  ;;  %v8176_v23 = vld [vmem:[#allocation98_spill] sm:$0xff]  ;;  %v8177_v29 = vld [vmem:[#allocation124_spill] sm:$0xff] }
 0x470   :  { %v2846_v15 = vpop.eup %2845  ;;  %v1978_v42 = vadd.f32 1.0, %v2844_v6  ;;  %v8178_v49 = vld [vmem:[#allocation100_spill] sm:$0xff]  ;;  %v8180_v6 = vld [vmem:[#allocation101_spill] sm:$0xff] }
 0x471   :  { %2851 = vpow2.f32 %v1987_v9  ;;  %v1983_v25 = vadd.f32 1.0, %v2846_v15  ;;  %v8179_v9 = vld [vmem:[#allocation125_spill] sm:$0xff] }
 0x472   :  { %2853 = vtanh.f32 %v6656_v14  ;;  %v2848_v61 = vpop.eup %2847  ;;  %v8181_v15 = vld [vmem:[#allocation53_spill] sm:$0xff] }
 0x473   :  { %2855 = vrcp.f32 %v1978_v42  ;;  %v2850_v24 = vpop.eup %2849  ;;  %v8182_v42 = vld [vmem:[#allocation62_spill] sm:$0xff] }
 0x474   :  { %2857 = vrcp.f32 %v1983_v25  ;;  %v8183_v25 = vld [vmem:[#allocation50_spill] sm:$0xff] }
 0x477   :  { %v2852_v34 = vpop.eup %2851 }
 0x478   :  { %v2854_v45 = vpop.eup %2853  ;;  %v1989_v44 = vadd.f32 1.0, %v2852_v34  ;;  %v8186_v34 = vld [vmem:[#allocation21_spill] sm:$0xff] }
 0x479   :  { %v2856_v53 = vpop.eup %2855  ;;  %v6659_v41 = vmul.f32 %v2854_v45, %v2848_v61  ;;  %v8184_v61 = vld [vmem:[#allocation63_spill] sm:$0xff] }
 0x47a   :  { %v2858_v50 = vpop.eup %2857  ;;  %v1992_v12 = vmul.f32 %v2856_v53, %v2850_v24  ;;  %2859 = vrcp.f32 %v1989_v44  ;;  %v8185_v24 = vld [vmem:[#allocation126_spill] sm:$0xff]  ;;  %v8187_v45 = vld [vmem:[#allocation127_spill] sm:$0xff]  ;;  %v8191_v44 = vld [vmem:[#allocation65_spill] sm:$0xff] }
 0x47b   :  { %v1991_v27 = vmul.f32 %v2858_v50, %v6234_v38  ;;  %2017 = vmatmul.f32.vlgmr.msra.gmra.mxu0 %v6659_v41  ;;  %2037 = vmatmul.f32.vlgmr.msra.gmra.mxu1 %v6659_v41  ;;  %v8152_v38 = vld [vmem:[#allocation118_spill] sm:$0xff]  ;;  %v8188_v53 = vld [vmem:[#allocation7_spill] sm:$0xff]  ;;  %v8189_v50 = vld [vmem:[#allocation64_spill] sm:$0xff] }
 0x47c   :  { %2057 = vmatmul.f32.vlgmr.msrb.gmra.mxu2 %v6659_v41  ;;  %2077 = vmatmul.f32.vlgmr.msrb.gmra.mxu3 %v6659_v41 }
 0x47d   :  { %v6666_v43 = vadd.f32 %v1992_v12, %v1991_v27  ;;  %2221 = vmatpush.msra.mxu0 %v5707_v52  ;;  %2241 = vmatpush.msra.mxu1 %v5713_v36  ;;  %v8190_v12 = vld [vmem:[#allocation36_spill] sm:$0xff] }
 0x47e   :  { %2261 = vmatpush.msrb.mxu2 %v5719_v62  ;;  %2281 = vmatpush.msrb.mxu3 %v5725_v16  ;;  %v8135_v16 = vld [vmem:[#allocation70_spill] sm:$0xff]  ;;  %v8192_v27 = vld [vmem:[#allocation20_spill] sm:$0xff] }
 0x47f   :  { %2861 = vtanh.f32 %v6666_v43  ;;  %2222 = vmatpush.msra.mxu0 %v5732_v26  ;;  %2242 = vmatpush.msra.mxu1 %v5738_v37  ;;  %v8136_v26 = vld [vmem:[#allocation55_spill] sm:$0xff]  ;;  %v8137_v37 = vld [vmem:[#allocation112_spill] sm:$0xff] }
 0x480   :  { %2262 = vmatpush.msrb.mxu2 %v5744_v0  ;;  %2282 = vmatpush.msrb.mxu3 %v5750_v18  ;;  %v2860_v52 = vpop.eup %2859  ;;  %v8138_v0 = vld [vmem:[#allocation74_spill] sm:$0xff]  ;;  %v8139_v18 = vld [vmem:[#allocation131_spill] sm:$0xff] }
 0x481   :  { %2223 = vmatpush.msra.mxu0 %v5756_v4  ;;  %2243 = vmatpush.msra.mxu1 %v5762_v63  ;;  %v8140_v4 = vld [vmem:[#allocation59_spill] sm:$0xff] }
 0x482   :  { %2263 = vmatpush.msrb.mxu2 %v5768_v8  ;;  %2283 = vmatpush.msrb.mxu3 %v5774_v2  ;;  %v8141_v63 = vld [vmem:[#allocation115_spill] sm:$0xff]  ;;  %v8142_v8 = vld [vmem:[#allocation132_spill] sm:$0xff] }
 0x483   :  { %2224 = vmatpush.msra.mxu0 %v5780_v31  ;;  %2244 = vmatpush.msra.mxu1 %v5786_v13  ;;  %v8143_v2 = vld [vmem:[#allocation88_spill] sm:$0xff] }
 0x484   :  { %2264 = vmatpush.msrb.mxu2 %v5792_v54  ;;  %2284 = vmatpush.msrb.mxu3 %v8033_v7  ;;  %v8144_v31 = vld [vmem:[#allocation116_spill] sm:$0xff]  ;;  %v8146_v54 = vld [vmem:[#allocation89_spill] sm:$0xff] }
 0x485   :  { %v2862_v36 = vpop.eup %2861  ;;  %2225 = vmatpush.msra.mxu0 %v8034_v47  ;;  %2245 = vmatpush.msra.mxu1 %v8035_v33  ;;  %v8145_v13 = vld [vmem:[#allocation60_spill] sm:$0xff]  ;;  %v8153_v7 = vld [vmem:[#allocation77_spill] sm:$0xff]  ;;  %v8154_v47 = vld [vmem:[#allocation91_spill] sm:$0xff] }
 0x486   :  { %v6687_v62 = vmul.f32 %v2862_v36, %v2860_v52  ;;  %2265 = vmatpush.msrb.mxu2 %v5818_v32  ;;  %2285 = vmatpush.msrb.mxu3 %v5824_v57  ;;  %v8147_v32 = vld [vmem:[#allocation133_spill] sm:$0xff]  ;;  %v8148_v57 = vld [vmem:[#allocation76_spill] sm:$0xff]  ;;  %v8155_v33 = vld [vmem:[#allocation119_spill] sm:$0xff] }
 0x487   :  { %2226 = vmatpush.msra.mxu0 %v8037_v17  ;;  %2246 = vmatpush.msra.mxu1 %v8038_v35  ;;  %v8157_v17 = vld [vmem:[#allocation83_spill] sm:$0xff]  ;;  %v8158_v35 = vld [vmem:[#allocation136_spill] sm:$0xff]  ;;  %v8194_v36 = vld [vmem:[#allocation37_spill] sm:$0xff] }
 0x488   :  { %2127 = vmatmul.f32.vlgmr.msrb.gmra.mxu0 %v6687_v62  ;;  %2147 = vmatmul.f32.vlgmr.msrb.gmra.mxu1 %v6687_v62  ;;  %v8193_v52 = vld [vmem:[#allocation128_spill] sm:$0xff] }
 0x489   :  { %2167 = vmatmul.f32.vlgmr.msra.gmra.mxu2 %v6687_v62  ;;  %2187 = vmatmul.f32.vlgmr.msra.gmra.mxu3 %v6687_v62 }
 0x48a   :  { %2227 = vmatpush.msra.mxu0 %v8041_v28  ;;  %2266 = vmatpush.msrb.mxu2 %v8039_v1  ;;  %v8159_v1 = vld [vmem:[#allocation82_spill] sm:$0xff]  ;;  %v8161_v28 = vld [vmem:[#allocation120_spill] sm:$0xff] }
 0x48b   :  { %2286 = vmatpush.msrb.mxu3 %v8040_v51  ;;  %2247 = vmatpush.msra.mxu1 %v8042_v59  ;;  %v8160_v51 = vld [vmem:[#allocation92_spill] sm:$0xff]  ;;  %v8162_v59 = vld [vmem:[#allocation93_spill] sm:$0xff] }
 0x48c   :  { %2228 = vmatpush.msra.mxu0 %v8045_v60  ;;  %2267 = vmatpush.msrb.mxu2 %v8043_v40  ;;  %v8163_v40 = vld [vmem:[#allocation121_spill] sm:$0xff] }
 0x48d   :  { %2287 = vmatpush.msrb.mxu3 %v8044_v39  ;;  %2248 = vmatpush.msra.mxu1 %v8135_v16  ;;  %v8164_v39 = vld [vmem:[#allocation137_spill] sm:$0xff] }
 0x48e   :  { %2229 = vmatpush.msra.mxu0 %v8049_v48  ;;  %2268 = vmatpush.msrb.mxu2 %v8047_v22  ;;  %v8165_v60 = vld [vmem:[#allocation13_spill] sm:$0xff]  ;;  %v8167_v22 = vld [vmem:[#allocation84_spill] sm:$0xff]  ;;  %v8169_v48 = vld [vmem:[#allocation122_spill] sm:$0xff] }
 0x48f   :  { %2288 = vmatpush.msrb.mxu3 %v8048_v5  ;;  %2249 = vmatpush.msra.mxu1 %v8136_v26  ;;  %v8168_v5 = vld [vmem:[#allocation94_spill] sm:$0xff]  ;;  %v8195_v16 = vld [vmem:[#allocation129_spill] sm:$0xff]  ;;  %v8196_v26 = vld [vmem:[#allocation35_spill] sm:$0xff] }
 0x490   :  { %2230 = vmatpush.msra.mxu0 %v8053_v11  ;;  %2269 = vmatpush.msrb.mxu2 %v8051_v10  ;;  %v8170_v10 = vld [vmem:[#allocation95_spill] sm:$0xff]  ;;  %v8172_v11 = vld [vmem:[#allocation96_spill] sm:$0xff] }
 0x491   :  { %2289 = vmatpush.msrb.mxu3 %v8137_v37  ;;  %2250 = vmatpush.msra.mxu1 %v8054_v3  ;;  %v8156_v3 = vld [vmem:[#allocation135_spill] sm:$0xff]  ;;  %v8197_v37 = vld [vmem:[#allocation85_spill] sm:$0xff] }
 0x492   :  { %2231 = vmatpush.msra.mxu0 %v8056_v30  ;;  %2270 = vmatpush.msrb.mxu2 %v5942_v56  ;;  %v8150_v56 = vld [vmem:[#allocation134_spill] sm:$0xff] }
 0x493   :  { %2290 = vmatpush.msrb.mxu3 %v8055_v20  ;;  %2251 = vmatpush.msra.mxu1 %v8138_v0  ;;  %v8151_v20 = vld [vmem:[#allocation90_spill] sm:$0xff]  ;;  %v8198_v0 = vld [vmem:[#allocation103_spill] sm:$0xff] }
 0x494   :  { %2232 = vmatpush.msra.mxu0 %v5968_v46  ;;  %2271 = vmatpush.msrb.mxu2 %v8139_v18  ;;  %v8149_v46 = vld [vmem:[#allocation117_spill] sm:$0xff]  ;;  %v8166_v30 = vld [vmem:[#allocation138_spill] sm:$0xff]  ;;  %v8199_v18 = vld [vmem:[#allocation140_spill] sm:$0xff] }
 0x495   :  { %2291 = vmatpush.msrb.mxu3 %v6294_v58  ;;  %2252 = vmatpush.msra.mxu1 %v8140_v4  ;;  %v8171_v58 = vld [vmem:[#allocation123_spill] sm:$0xff]  ;;  %v8200_v4 = vld [vmem:[#allocation104_spill] sm:$0xff] }
 0x496   :  { %2233 = vmatpush.msra.mxu0 %v8141_v63  ;;  %2272 = vmatpush.msrb.mxu2 %v8142_v8  ;;  %v8201_v63 = vld [vmem:[#allocation130_spill] sm:$0xff]  ;;  %v8202_v8 = vld [vmem:[#allocation105_spill] sm:$0xff] }
 0x497   :  { %2292 = vmatpush.msrb.mxu3 %v8143_v2  ;;  %2253 = vmatpush.msra.mxu1 %v8144_v31  ;;  %v8203_v2 = vld [vmem:[#allocation144_spill] sm:$0xff]  ;;  %v8204_v31 = vld [vmem:[#allocation139_spill] sm:$0xff] }
 0x498   :  { %2234 = vmatpush.msra.mxu0 %v8145_v13  ;;  %2273 = vmatpush.msrb.mxu2 %v8146_v54  ;;  %v8205_v13 = vld [vmem:[#allocation141_spill] sm:$0xff]  ;;  %v8206_v54 = vld [vmem:[#allocation142_spill] sm:$0xff] }
 0x499   :  { %2293 = vmatpush.msrb.mxu3 %v8147_v32  ;;  %2254 = vmatpush.msra.mxu1 %v8148_v57  ;;  %v8207_v32 = vld [vmem:[#allocation148_spill] sm:$0xff]  ;;  %v8208_v57 = vld [vmem:[#allocation143_spill] sm:$0xff] }
 0x49a   :  { %2235 = vmatpush.msra.mxu0 %v8149_v46  ;;  %2274 = vmatpush.msrb.mxu2 %v8150_v56  ;;  %v8209_v46 = vld [vmem:[#allocation145_spill] sm:$0xff]  ;;  %v8210_v56 = vld [vmem:[#allocation146_spill] sm:$0xff] }
 0x49b   :  { %2294 = vmatpush.msrb.mxu3 %v8151_v20  ;;  %2255 = vmatpush.msra.mxu1 %v8152_v38  ;;  %v8211_v20 = vld [vmem:[#allocation67_spill] sm:$0xff] }
 0x49c   :  { %2236 = vmatpush.msra.mxu0 %v8153_v7  ;;  %2275 = vmatpush.msrb.mxu2 %v8154_v47  ;;  %v8212_v38 = vld [vmem:[#allocation147_spill] sm:$0xff]  ;;  %v8213_v7 = vld [vmem:[#allocation149_spill] sm:$0xff]  ;;  %v8214_v47 = vld [vmem:[#allocation150_spill] sm:$0xff] }
 0x49d   :  { %2295 = vmatpush.msrb.mxu3 %v8156_v3  ;;  %2256 = vmatpush.msra.mxu1 %v8157_v17  ;;  %v8216_v3 = vld [vmem:[#allocation66_spill] sm:$0xff] }
 0x49e   :  { %2331 = vmatpush.msrb.mxu0 %v8155_v33  ;;  %2276 = vmatpush.msrb.mxu2 %v8158_v35  ;;  %v8215_v33 = vld [vmem:[#allocation32_spill] sm:$0xff]  ;;  %v8217_v17 = vld [vmem:[#allocation10_spill] sm:$0xff]  ;;  %v8218_v35 = vld [vmem:[#allocation9_spill] sm:$0xff] }
 0x49f   :  { %2296 = vmatpush.msrb.mxu3 %v8160_v51  ;;  %2351 = vmatpush.msrb.mxu1 %v8161_v28  ;;  %v8220_v51 = vld [vmem:[#allocation34_spill] sm:$0xff]  ;;  %v8221_v28 = vld [vmem:[#allocation31_spill] sm:$0xff] }
 0x4a0   :  { %2332 = vmatpush.msrb.mxu0 %v8159_v1  ;;  %2371 = vmatpush.msra.mxu2 %v8162_v59  ;;  %v8219_v1 = vld [vmem:[#allocation16_spill] sm:$0xff]  ;;  %v8222_v59 = vld [vmem:[#allocation5_spill] sm:$0xff] }
 0x4a1   :  { %2391 = vmatpush.msra.mxu3 %v8164_v39  ;;  %2352 = vmatpush.msrb.mxu1 %v8165_v60  ;;  %v8224_v39 = vld [vmem:[#allocation78_spill] sm:$0xff] }
 0x4a2   :  { %2333 = vmatpush.msrb.mxu0 %v8163_v40  ;;  %2372 = vmatpush.msra.mxu2 %v8166_v30  ;;  %v8223_v40 = vld [vmem:[#allocation42_spill] sm:$0xff] }
 0x4a3   :  { %2392 = vmatpush.msra.mxu3 %v8168_v5  ;;  %2353 = vmatpush.msrb.mxu1 %v8169_v48  ;;  %v145_v60 = vadd.f32 %v8224_v39, %v8223_v40  ;;  %v8225_v30 = vld [vmem:[#allocation38_spill] sm:$0xff] }
 0x4a4   :  { %2334 = vmatpush.msrb.mxu0 %v8167_v22  ;;  %2373 = vmatpush.msra.mxu2 %v8170_v10  ;;  %v8226_v22 = vld [vmem:[#allocation79_spill] sm:$0xff] }
 0x4a5   :  { %2393 = vmatpush.msra.mxu3 %v8172_v11  ;;  %2354 = vmatpush.msrb.mxu1 %v8173_v21  ;;  %v186_v5 = vadd.f32 %v8226_v22, %v8225_v30 }
 0x4a6   :  { %2335 = vmatpush.msrb.mxu0 %v8171_v58  ;;  %2374 = vmatpush.msra.mxu2 %v8174_v55 }
 0x4a7   :  { %2394 = vmatpush.msra.mxu3 %v8176_v23  ;;  %2355 = vmatpush.msrb.mxu1 %v8177_v29  ;;  %v8227_v29 = vld [vmem:[#allocation57_spill] sm:$0xff] }
 0x4a8   :  { %2336 = vmatpush.msrb.mxu0 %v8175_v19  ;;  %2375 = vmatpush.msra.mxu2 %v8178_v49  ;;  %v8228_v49 = vld [vmem:[#allocation15_spill] sm:$0xff] }
 0x4a9   :  { %2395 = vmatpush.msra.mxu3 %v8180_v6  ;;  %2356 = vmatpush.msrb.mxu1 %v8181_v15 }
 0x4aa   :  { %2337 = vmatpush.msrb.mxu0 %v8179_v9  ;;  %2376 = vmatpush.msra.mxu2 %v8182_v42  ;;  %v268_v9 = vadd.f32 %v8228_v49, %v8227_v29  ;;  %v2468_v49 = vld [vmem:[%s6988_s5 + $0x78] sm:$0xff] }
 0x4ab   :  { %2396 = vmatpush.msra.mxu3 %v8184_v61  ;;  %2357 = vmatpush.msrb.mxu1 %v8185_v24  ;;  %v8230_v61 = vld [vmem:[#allocation29_spill] sm:$0xff] }
 0x4ac   :  { %2338 = vmatpush.msrb.mxu0 %v8183_v25  ;;  %2377 = vmatpush.msra.mxu2 %v8186_v34  ;;  %v8229_v25 = vld [vmem:[#allocation54_spill] sm:$0xff] }
 0x4ad   :  { %2397 = vmatpush.msra.mxu3 %v8188_v53  ;;  %2358 = vmatpush.msrb.mxu1 %v8189_v50  ;;  %v227_v24 = vadd.f32 %v8230_v61, %v8229_v25  ;;  %v8231_v53 = vld [vmem:[#allocation49_spill] sm:$0xff]  ;;  %v8232_v50 = vld [vmem:[#allocation22_spill] sm:$0xff]  ;;  %v2464_v61 = vld [vmem:[%s6988_s5 + $0x58] sm:$0xff] }
 0x4ae   :  { %2339 = vmatpush.msrb.mxu0 %v8187_v45  ;;  %2378 = vmatpush.msra.mxu2 %v8190_v12  ;;  %v294_v12 = vadd.f32 %v8232_v50, %v8231_v53 }
 0x4af   :  { %2398 = vmatpush.msra.mxu3 %v8192_v27  ;;  %2359 = vmatpush.msrb.mxu1 %v8193_v52  ;;  %v8234_v27 = vld [vmem:[#allocation8_spill] sm:$0xff] }
 0x4b0   :  { %2340 = vmatpush.msrb.mxu0 %v8191_v44  ;;  %2379 = vmatpush.msra.mxu2 %v8194_v36  ;;  %v8233_v44 = vld [vmem:[#allocation45_spill] sm:$0xff] }
 0x4b1   :  { %2399 = vmatpush.msra.mxu3 %v8196_v26  ;;  %2360 = vmatpush.msrb.mxu1 %v8197_v37  ;;  %v335_v52 = vadd.f32 %v8234_v27, %v8233_v44  ;;  %v2461_v27 = vld [vmem:[%s6988_s5 + $0x40] sm:$0xff] }
 0x4b2   :  { %2341 = vmatpush.msrb.mxu0 %v8195_v16  ;;  %2380 = vmatpush.msra.mxu2 %v8198_v0 }
 0x4b3   :  { %2400 = vmatpush.msra.mxu3 %v8200_v4  ;;  %2361 = vmatpush.msrb.mxu1 %v8201_v63 }
 0x4b4   :  { %2342 = vmatpush.msrb.mxu0 %v8199_v18  ;;  %2381 = vmatpush.msra.mxu2 %v8202_v8 }
 0x4b5   :  { %2401 = vmatpush.msra.mxu3 %v8204_v31  ;;  %2362 = vmatpush.msrb.mxu1 %v8205_v13 }
 0x4b6   :  { %2343 = vmatpush.msrb.mxu0 %v8203_v2  ;;  %2382 = vmatpush.msra.mxu2 %v8206_v54 }
 0x4b7   :  { %2402 = vmatpush.msra.mxu3 %v8208_v57  ;;  %2363 = vmatpush.msrb.mxu1 %v8209_v46 }
 0x4b8   :  { %2344 = vmatpush.msrb.mxu0 %v8207_v32  ;;  %2383 = vmatpush.msra.mxu2 %v8210_v56 }
 0x4b9   :  { %2403 = vmatpush.msra.mxu3 %v8212_v38  ;;  %2364 = vmatpush.msrb.mxu1 %v8213_v7  ;;  %v8235_v38 = vld [vmem:[#allocation43_spill] sm:$0xff] }
 0x4ba   :  { %2345 = vmatpush.msrb.mxu0 %v8211_v20  ;;  %2384 = vmatpush.msra.mxu2 %v8214_v47 }
 0x4bb   :  { %2404 = vmatpush.msra.mxu3 %v8216_v3  ;;  %2365 = vmatpush.msrb.mxu1 %v8217_v17 }
 0x4bc   :  { %2346 = vmatpush.msrb.mxu0 %v8215_v33  ;;  %2385 = vmatpush.msra.mxu2 %v8218_v35  ;;  %v8236_v33 = vld [vmem:[#allocation26_spill] sm:$0xff] }
 0x4bd   :  { %2405 = vmatpush.msra.mxu3 %v8219_v1  ;;  %2366 = vmatpush.msrb.mxu1 %v8220_v51 }
 0x4be   :  { %2386 = vmatpush.msra.mxu2 %v8221_v28 }
 0x4bf   :  { %2406 = vmatpush.msra.mxu3 %v8222_v59 }
 0x4f8   :  { %v2018_v48 = vpop.f32.mrf.mxu0  ;;  %v2038_v10 = vpop.f32.mrf.mxu1 }
 0x4f9   :  { %v2081_v58 = vadd.f32 %v2018_v48, %v145_v60  ;;  %v2082_v11 = vadd.f32 %v2038_v10, %v186_v5 }
 0x4fb   :  { %v2085_v21 = vsub.f32 0.0, %v2081_v58  ;;  %v2090_v55 = vsub.f32 0.0, %v2082_v11 }
 0x4fd   :  { %v2086_v19 = vmul.f32 1.442695, %v2085_v21  ;;  %v2091_v23 = vmul.f32 1.442695, %v2090_v55 }
 0x4ff   :  { %2863 = vpow2.f32 %v2086_v19  ;;  %v2078_v6 = vpop.f32.mrf.mxu3  ;;  %v2058_v15 = vpop.f32.mrf.mxu2 }
 0x500   :  { %2865 = vpow2.f32 %v2091_v23  ;;  %v2084_v42 = vadd.f32 %v2078_v6, %v268_v9  ;;  %v2083_v45 = vadd.f32 %v2058_v15, %v227_v24  ;;  %v2467_v6 = vld [vmem:[%s6988_s5 + $0x70] sm:$0xff] }
 0x502   :  { %v2096_v34 = vsub.f32 0.0, %v2084_v42  ;;  %v2466_v42 = vld [vmem:[%s6988_s5 + $0x68] sm:$0xff] }
 0x504   :  { %v2097_v36 = vmul.f32 1.442695, %v2096_v34  ;;  %v2463_v34 = vld [vmem:[%s6988_s5 + $0x50] sm:$0xff] }
 0x505   :  { %v2864_v16 = vpop.eup %2863  ;;  %v2128_v26 = vpop.f32.mrf.mxu0 }
 0x506   :  { %v2148_v37 = vpop.f32.mrf.mxu1  ;;  %v2866_v0 = vpop.eup %2865  ;;  %v2088_v18 = vadd.f32 1.0, %v2864_v16  ;;  %2867 = vpow2.f32 %v2097_v36  ;;  %v2191_v4 = vadd.f32 %v2128_v26, %v294_v12  ;;  %v2462_v12 = vld [vmem:[%s6988_s5 + $0x48] sm:$0xff]  ;;  %v2459_v36 = vld [vmem:[%s6988_s5 + $0x30] sm:$0xff]  ;;  %v2457_v26 = vld [vmem:[%s6988_s5 + $0x20] sm:$0xff] }
 0x507   :  { %v2192_v63 = vadd.f32 %v2148_v37, %v335_v52  ;;  %v2093_v8 = vadd.f32 1.0, %v2866_v0  ;;  %2869 = vtanh.f32 %v2083_v45  ;;  %v2460_v52 = vld [vmem:[%s6988_s5 + $0x38] sm:$0xff]  ;;  %v2458_v16 = vld [vmem:[%s6988_s5 + $0x28] sm:$0xff]  ;;  %v2455_v0 = vld [vmem:[%s6988_s5 + $0x10] sm:$0xff] }
 0x508   :  { %2871 = vrcp.f32 %v2088_v18  ;;  %v2195_v2 = vsub.f32 0.0, %v2191_v4  ;;  %v2456_v37 = vld [vmem:[%s6988_s5 + $0x18] sm:$0xff]  ;;  %v2454_v18 = vld [vmem:[%s6988_s5 + $0x8] sm:$0xff]  ;;  %v2453_v4 = vld [vmem:[%s6988_s5] sm:$0xff] }
 0x509   :  { %v2200_v31 = vsub.f32 0.0, %v2192_v63  ;;  %2873 = vrcp.f32 %v2093_v8  ;;  %v8237_v63 = vld [vmem:[#allocation58_spill] sm:$0xff]  ;;  %v8238_v8 = vld [vmem:[#allocation48_spill] sm:$0xff] }
 0x50a   :  { %v2196_v13 = vmul.f32 1.442695, %v2195_v2  ;;  %v8239_v2 = vld [vmem:[#allocation14_spill] sm:$0xff] }
 0x50b   :  { %v2201_v54 = vmul.f32 1.442695, %v2200_v31  ;;  %v8240_v31 = vld [vmem:[#allocation17_spill] sm:$0xff] }
 0x50c   :  { %v2868_v32 = vpop.eup %2867  ;;  %2875 = vpow2.f32 %v2196_v13  ;;  %v2168_v57 = vpop.f32.mrf.mxu2  ;;  %v8241_v13 = vld [vmem:[#allocation86_spill] sm:$0xff] }
 0x50d   :  { %v2188_v46 = vpop.f32.mrf.mxu3  ;;  %v2870_v56 = vpop.eup %2869  ;;  %v2099_v20 = vadd.f32 1.0, %v2868_v32  ;;  %2877 = vpow2.f32 %v2201_v54  ;;  %v2193_v3 = vadd.f32 %v2168_v57, %v8236_v33  ;;  %v2484_v54 = vld [vmem:[%s6988_s5 + $0xf8] sm:$0xff]  ;;  %v2483_v32 = vld [vmem:[%s6988_s5 + $0xf0] sm:$0xff]  ;;  %v2482_v57 = vld [vmem:[%s6988_s5 + $0xe8] sm:$0xff] }
 0x50e   :  { %v2194_v7 = vadd.f32 %v2188_v46, %v8235_v38  ;;  %v2872_v47 = vpop.eup %2871  ;;  %v2480_v46 = vld [vmem:[%s6988_s5 + $0xd8] sm:$0xff]  ;;  %v2478_v33 = vld [vmem:[%s6988_s5 + $0xc8] sm:$0xff] }
 0x50f   :  { %v2874_v17 = vpop.eup %2873  ;;  %v2102_v35 = vmul.f32 %v2872_v47, %v2870_v56  ;;  %2879 = vrcp.f32 %v2099_v20  ;;  %v2479_v56 = vld [vmem:[%s6988_s5 + $0xd0] sm:$0xff]  ;;  %v8242_v20 = vld [vmem:[#allocation80_spill] sm:$0xff] }
 0x510   :  { %v2206_v1 = vsub.f32 0.0, %v2194_v7  ;;  %v2101_v51 = vmul.f32 %v2874_v17, %v6656_v14  ;;  %2881 = vtanh.f32 %v2193_v3  ;;  %v148_v38 = vadd.f32 %v8242_v20, %v8223_v40  ;;  %v8243_v7 = vld [vmem:[#allocation81_spill] sm:$0xff]  ;;  %v2476_v40 = vld [vmem:[%s6988_s5 + $0xb8] sm:$0xff] }
 0x511   :  { %v189_v47 = vadd.f32 %v8243_v7, %v8225_v30 }
 0x512   :  { %v2207_v28 = vmul.f32 1.442695, %v2206_v1  ;;  %v2876_v59 = vpop.eup %2875  ;;  %v6818_v39 = vadd.f32 %v2102_v35, %v2101_v51  ;;  %v2477_v51 = vld [vmem:[%s6988_s5 + $0xc0] sm:$0xff] }
 0x513   :  { %v2878_v60 = vpop.eup %2877  ;;  %v2198_v22 = vadd.f32 1.0, %v2876_v59 }
 0x514   :  { %2883 = vpow2.f32 %v2207_v28  ;;  %v2203_v5 = vadd.f32 1.0, %v2878_v60 }
 0x515   :  { %2885 = vtanh.f32 %v6818_v39  ;;  %v2880_v48 = vpop.eup %2879 }
 0x516   :  { %2887 = vrcp.f32 %v2198_v22  ;;  %v2882_v10 = vpop.eup %2881  ;;  %v8244_v22 = vld [vmem:[#allocation19_spill] sm:$0xff] }
 0x517   :  { %2889 = vrcp.f32 %v2203_v5  ;;  %v271_v5 = vadd.f32 %v8244_v22, %v8227_v29  ;;  %v2473_v29 = vld [vmem:[%s6988_s5 + $0xa0] sm:$0xff] }
 0x51a   :  { %v2884_v58 = vpop.eup %2883 }
 0x51b   :  { %v2886_v11 = vpop.eup %2885  ;;  %v2209_v23 = vadd.f32 1.0, %v2884_v58  ;;  %v2474_v58 = vld [vmem:[%s6988_s5 + $0xa8] sm:$0xff] }
 0x51c   :  { %v2888_v21 = vpop.eup %2887  ;;  %v2105_v14 = vmul.f32 %v2886_v11, %v2880_v48  ;;  %v2475_v48 = vld [vmem:[%s6988_s5 + $0xb0] sm:$0xff] }
 0x51d   :  { %v2890_v55 = vpop.eup %2889  ;;  %v2212_v19 = vmul.f32 %v2888_v21, %v2882_v10  ;;  %2891 = vrcp.f32 %v2209_v23 }
 0x51e   :  { %v2211_v9 = vmul.f32 %v2890_v55, %v6666_v43  ;;  %2237 = vmatmul.f32.vlgmr.msra.gmra.mxu0 %v2105_v14  ;;  %2257 = vmatmul.f32.vlgmr.msra.gmra.mxu1 %v2105_v14  ;;  %v2465_v43 = vld [vmem:[%s6988_s5 + $0x60] sm:$0xff] }
 0x51f   :  { %2277 = vmatmul.f32.vlgmr.msrb.gmra.mxu2 %v2105_v14  ;;  %2297 = vmatmul.f32.vlgmr.msrb.gmra.mxu3 %v2105_v14 }
 0x520   :  { %v6828_v15 = vadd.f32 %v2212_v19, %v2211_v9  ;;  %2489 = vmatpush.msra.mxu0 %v2468_v49  ;;  %2530 = vmatpush.msra.mxu1 %v2484_v54  ;;  %v2472_v49 = vld [vmem:[%s6988_s5 + $0x98] sm:$0xff]  ;;  %v8246_v9 = vld [vmem:[#allocation18_spill] sm:$0xff] }
 0x522   :  { %2893 = vtanh.f32 %v6828_v15  ;;  %2490 = vmatpush.msra.mxu0 %v2467_v6  ;;  %2531 = vmatpush.msra.mxu1 %v2483_v32  ;;  %v291_v6 = vadd.f32 %v8246_v9, %v8231_v53  ;;  %v2470_v53 = vld [vmem:[%s6988_s5 + $0x88] sm:$0xff] }
 0x523   :  { %v2892_v24 = vpop.eup %2891 }
 0x524   :  { %2491 = vmatpush.msra.mxu0 %v2466_v42  ;;  %2532 = vmatpush.msra.mxu1 %v2482_v57  ;;  %v8247_v42 = vld [vmem:[#allocation6_spill] sm:$0xff]  ;;  %v8249_v57 = vld [vmem:[#allocation23_spill] sm:$0xff] }
 0x526   :  { %2492 = vmatpush.msra.mxu0 %v2465_v43  ;;  %v332_v43 = vadd.f32 %v8247_v42, %v8233_v44 }
 0x528   :  { %v2894_v45 = vpop.eup %2893  ;;  %2493 = vmatpush.msra.mxu0 %v2464_v61 }
 0x529   :  { %v6843_v50 = vmul.f32 %v2894_v45, %v2892_v24  ;;  %v2471_v45 = vld [vmem:[%s6988_s5 + $0x90] sm:$0xff] }
 0x52a   :  { %2494 = vmatpush.msra.mxu0 %v2463_v34 }
 0x52b   :  { %2347 = vmatmul.f32.vlgmr.msrb.gmra.mxu0 %v6843_v50  ;;  %2367 = vmatmul.f32.vlgmr.msrb.gmra.mxu1 %v6843_v50 }
 0x52c   :  { %2387 = vmatmul.f32.vlgmr.msra.gmra.mxu2 %v6843_v50  ;;  %2407 = vmatmul.f32.vlgmr.msra.gmra.mxu3 %v6843_v50 }
 0x52d   :  { %2495 = vmatpush.msra.mxu0 %v2462_v12 }
 0x52f   :  { %2496 = vmatpush.msra.mxu0 %v2461_v27 }
 0x531   :  { %2497 = vmatpush.msra.mxu0 %v2460_v52 }
 0x533   :  { %2498 = vmatpush.msra.mxu0 %v2459_v36 }
 0x535   :  { %2499 = vmatpush.msra.mxu0 %v2458_v16 }
 0x537   :  { %2500 = vmatpush.msra.mxu0 %v2457_v26 }
 0x539   :  { %2501 = vmatpush.msra.mxu0 %v2456_v37  ;;  %v2469_v37 = vld [vmem:[%s6988_s5 + $0x80] sm:$0xff] }
 0x53b   :  { %2502 = vmatpush.msra.mxu0 %v2455_v0 }
 0x53d   :  { %2503 = vmatpush.msra.mxu0 %v2454_v18 }
 0x53f   :  { %2504 = vmatpush.msra.mxu0 %v2453_v4 }
 0x540   :  { %2505 = vmatmul.f32.vlgmr.msra.gmra.mxu0 %v8237_v63 }
 0x548   :  { %2508 = vmatmul.f32.gmra.mxu0 %v8238_v8 }
 0x550   :  { %2511 = vmatmul.f32.gmra.mxu0 %v8239_v2 }
 0x558   :  { %2514 = vmatmul.f32.gmra.mxu0 %v8240_v31 }
 0x560   :  { %2517 = vmatmul.f32.gmra.mxu0 %v8241_v13  ;;  %v8248_v13 = vld [vmem:[#allocation39_spill] sm:$0xff] }
 0x568   :  { %2520 = vmatmul.f32.gmra.mxu0 %v6659_v41  ;;  %v2481_v41 = vld [vmem:[%s6988_s5 + $0xe0] sm:$0xff] }
 0x569   :  { %2533 = vmatpush.msra.mxu1 %v2481_v41 }
 0x56b   :  { %2534 = vmatpush.msra.mxu1 %v2480_v46 }
 0x56d   :  { %2535 = vmatpush.msra.mxu1 %v2479_v56 }
 0x56f   :  { %2536 = vmatpush.msra.mxu1 %v2478_v33 }
 0x570   :  { %2523 = vmatmul.f32.gmra.mxu0 %v2105_v14  ;;  %v8245_v14 = vld [vmem:[#allocation33_spill] sm:$0xff] }
 0x571   :  { %2537 = vmatpush.msra.mxu1 %v2477_v51  ;;  %v230_v55 = vadd.f32 %v8245_v14, %v8229_v25  ;;  %v8251_v14 = vld [vmem:[#allocation46_spill] sm:$0xff] }
 0x573   :  { %2538 = vmatpush.msra.mxu1 %v2476_v40 }
 0x575   :  { %2539 = vmatpush.msra.mxu1 %v2475_v48 }
 0x577   :  { %2540 = vmatpush.msra.mxu1 %v2474_v58 }
 0x579   :  { %2541 = vmatpush.msra.mxu1 %v2473_v29  ;;  %v8253_v29 = vld [vmem:[#allocation68_spill] sm:$0xff] }
 0x57b   :  { %2542 = vmatpush.msra.mxu1 %v2472_v49  ;;  %v2670_v49 = vld [vmem:[%s6989_s6] ss:$0 sm:$0xff] }
 0x57d   :  { %2543 = vmatpush.msra.mxu1 %v2471_v45 }
 0x57f   :  { %2544 = vmatpush.msra.mxu1 %v2470_v53 }
 0x581   :  { %2545 = vmatpush.msra.mxu1 %v2469_v37 }
 0x59b   :  { %v2238_v3 = vpop.f32.mrf.mxu0  ;;  %v2258_v17 = vpop.f32.mrf.mxu1 }
 0x59c   :  { %v2301_v35 = vadd.f32 %v2238_v3, %v148_v38  ;;  %v2302_v1 = vadd.f32 %v2258_v17, %v189_v47 }
 0x59e   :  { %v2305_v28 = vsub.f32 0.0, %v2301_v35  ;;  %v2310_v59 = vsub.f32 0.0, %v2302_v1 }
 0x5a0   :  { %v2306_v30 = vmul.f32 1.442695, %v2305_v28  ;;  %v2311_v60 = vmul.f32 1.442695, %v2310_v59 }
 0x5a2   :  { %2895 = vpow2.f32 %v2306_v30  ;;  %v2298_v10 = vpop.f32.mrf.mxu3  ;;  %v2278_v11 = vpop.f32.mrf.mxu2 }
 0x5a3   :  { %2897 = vpow2.f32 %v2311_v60  ;;  %v2304_v21 = vadd.f32 %v2298_v10, %v271_v5  ;;  %v2303_v23 = vadd.f32 %v2278_v11, %v230_v55  ;;  %v8252_v55 = vld [vmem:[#allocation4_spill] sm:$0xff] }
 0x5a5   :  { %v2316_v19 = vsub.f32 0.0, %v2304_v21  ;;  %v8250_v21 = vld [vmem:[#allocation87_spill] sm:$0xff] }
 0x5a7   :  { %v2317_v61 = vmul.f32 1.442695, %v2316_v19 }
 0x5a8   :  { %v2896_v25 = vpop.eup %2895  ;;  %v2348_v24 = vpop.f32.mrf.mxu0 }
 0x5a9   :  { %v2368_v34 = vpop.f32.mrf.mxu1  ;;  %v2898_v12 = vpop.eup %2897  ;;  %v2308_v27 = vadd.f32 1.0, %v2896_v25  ;;  %2899 = vpow2.f32 %v2317_v61  ;;  %v2411_v52 = vadd.f32 %v2348_v24, %v291_v6 }
 0x5aa   :  { %v2412_v36 = vadd.f32 %v2368_v34, %v332_v43  ;;  %v2313_v16 = vadd.f32 1.0, %v2898_v12  ;;  %2901 = vtanh.f32 %v2303_v23 }
 0x5ab   :  { %2903 = vrcp.f32 %v2308_v27  ;;  %v2415_v44 = vsub.f32 0.0, %v2411_v52 }
 0x5ac   :  { %v2420_v26 = vsub.f32 0.0, %v2412_v36  ;;  %2905 = vrcp.f32 %v2313_v16 }
 0x5ad   :  { %v2416_v0 = vmul.f32 1.442695, %v2415_v44 }
 0x5ae   :  { %v2421_v18 = vmul.f32 1.442695, %v2420_v26 }
 0x5af   :  { %v2900_v4 = vpop.eup %2899  ;;  %2907 = vpow2.f32 %v2416_v0  ;;  %v2388_v63 = vpop.f32.mrf.mxu2 }
 0x5b0   :  { %v2408_v8 = vpop.f32.mrf.mxu3  ;;  %v2902_v2 = vpop.eup %2901  ;;  %v2319_v31 = vadd.f32 1.0, %v2900_v4  ;;  %2909 = vpow2.f32 %v2421_v18  ;;  %v2413_v41 = vadd.f32 %v2388_v63, %v8249_v57 }
 0x5b1   :  { %v2414_v54 = vadd.f32 %v2408_v8, %v8248_v13  ;;  %v2904_v32 = vpop.eup %2903 }
 0x5b2   :  { %v2906_v46 = vpop.eup %2905  ;;  %v2322_v56 = vmul.f32 %v2904_v32, %v2902_v2  ;;  %2911 = vrcp.f32 %v2319_v31 }
 0x5b3   :  { %v2426_v20 = vsub.f32 0.0, %v2414_v54  ;;  %v2321_v38 = vmul.f32 %v2906_v46, %v6818_v39  ;;  %2913 = vtanh.f32 %v2413_v41 }
 0x5b5   :  { %v2427_v7 = vmul.f32 1.442695, %v2426_v20  ;;  %v2908_v47 = vpop.eup %2907  ;;  %v2323_v33 = vadd.f32 %v2322_v56, %v2321_v38 }
 0x5b6   :  { %v2910_v3 = vpop.eup %2909  ;;  %v2418_v17 = vadd.f32 1.0, %v2908_v47 }
 0x5b7   :  { %2915 = vpow2.f32 %v2427_v7  ;;  %v2423_v35 = vadd.f32 1.0, %v2910_v3 }
 0x5b8   :  { %2917 = vtanh.f32 %v2323_v33  ;;  %v2912_v1 = vpop.eup %2911 }
 0x5b9   :  { %2919 = vrcp.f32 %v2418_v17  ;;  %v2914_v51 = vpop.eup %2913 }
 0x5ba   :  { %2921 = vrcp.f32 %v2423_v35 }
 0x5bd   :  { %v2916_v28 = vpop.eup %2915  ;;  %v2506_v19 = vpop.f32.mrf.mxu0 }
 0x5be   :  { %v2918_v59 = vpop.eup %2917  ;;  %v2429_v22 = vadd.f32 1.0, %v2916_v28  ;;  %v2507_v9 = vadd.f32 %v2670_v49, %v2506_v19 }
 0x5bf   :  { %v2920_v40 = vpop.eup %2919  ;;  %v2325_v30 = vmul.f32 %v2918_v59, %v2912_v1 }
 0x5c0   :  { %v2922_v60 = vpop.eup %2921  ;;  %v2432_v39 = vmul.f32 %v2920_v40, %v2914_v51  ;;  %2923 = vrcp.f32 %v2429_v22 }
 0x5c1   :  { %v2431_v5 = vmul.f32 %v2922_v60, %v6828_v15  ;;  %2526 = vmatmul.f32.gmra.mxu0 %v2325_v30  ;;  %v8254_v15 = vld [vmem:[#allocation61_spill] sm:$0xff] }
 0x5c3   :  { %v2433_v48 = vadd.f32 %v2432_v39, %v2431_v5 }
 0x5c5   :  { %2925 = vtanh.f32 %v2433_v48  ;;  %v2509_v23 = vpop.f32.mrf.mxu0 }
 0x5c6   :  { %v2924_v10 = vpop.eup %2923  ;;  %v2510_v42 = vadd.f32 %v2670_v49, %v2509_v23 }
 0x5cb   :  { %v2926_v58 = vpop.eup %2925 }
 0x5cc   :  { %v2435_v11 = vmul.f32 %v2926_v58, %v2924_v10 }
 0x5ce   :  { %2546 = vmatmul.f32.vlgmr.msra.gmra.mxu1 %v2435_v11 }
 0x5d6   :  { %2549 = vmatmul.f32.gmra.mxu1 %v6843_v50 }
 0x5de   :  { %2552 = vmatmul.f32.gmra.mxu1 %v6687_v62  ;;  %v2512_v62 = vpop.f32.mrf.mxu0 }
 0x5df   :  { %v2513_v24 = vadd.f32 %v2670_v49, %v2512_v62 }
 0x5e6   :  { %2555 = vmatmul.f32.gmra.mxu1 %v8250_v21  ;;  %v2515_v25 = vpop.f32.mrf.mxu0 }
 0x5e7   :  { %v2516_v12 = vadd.f32 %v2670_v49, %v2515_v25 }
 0x5ee   :  { %2558 = vmatmul.f32.gmra.mxu1 %v8251_v14  ;;  %v2518_v27 = vpop.f32.mrf.mxu0 }
 0x5ef   :  { %v2519_v16 = vadd.f32 %v2670_v49, %v2518_v27 }
 0x5f6   :  { %2561 = vmatmul.f32.gmra.mxu1 %v8252_v55  ;;  %v2521_v26 = vpop.f32.mrf.mxu0 }
 0x5f7   :  { %v2522_v37 = vadd.f32 %v2670_v49, %v2521_v26 }
 0x5fe   :  { %2564 = vmatmul.f32.gmra.mxu1 %v8253_v29  ;;  %v2524_v4 = vpop.f32.mrf.mxu0 }
 0x5ff   :  { %v2525_v63 = vadd.f32 %v2670_v49, %v2524_v4 }
 0x606   :  { %2567 = vmatmul.f32.gmra.mxu1 %v8254_v15 }
 0x63e   :  { %v2527_v31 = vpop.f32.mrf.mxu0 }
 0x63f   :  { %v2528_v13 = vadd.f32 %v2670_v49, %v2527_v31 }
 0x64b   :  { %v2547_v50 = vpop.f32.mrf.mxu1 }
 0x64c   :  { %v2548_v6 = vadd.f32 %v2547_v50, %v2507_v9 }
 0x64e   :  { %2571 = vst [vmem:[%s6990_s7] sm:$0xff] %v2548_v6 }
 0x653   :  { %v2550_v43 = vpop.f32.mrf.mxu1 }
 0x654   :  { %v2551_v61 = vadd.f32 %v2550_v43, %v2510_v42 }
 0x656   :  { %2572 = vst [vmem:[%s6990_s7 + $0x8] sm:$0xff] %v2551_v61 }
 0x65b   :  { %v2553_v34 = vpop.f32.mrf.mxu1 }
 0x65c   :  { %v2554_v45 = vadd.f32 %v2553_v34, %v2513_v24 }
 0x65e   :  { %2573 = vst [vmem:[%s6990_s7 + $0x10] sm:$0xff] %v2554_v45 }
 0x663   :  { %v2556_v52 = vpop.f32.mrf.mxu1 }
 0x664   :  { %v2557_v36 = vadd.f32 %v2556_v52, %v2516_v12 }
 0x666   :  { %2574 = vst [vmem:[%s6990_s7 + $0x18] sm:$0xff] %v2557_v36 }
 0x66b   :  { %v2559_v53 = vpop.f32.mrf.mxu1 }
 0x66c   :  { %v2560_v44 = vadd.f32 %v2559_v53, %v2519_v16 }
 0x66e   :  { %2575 = vst [vmem:[%s6990_s7 + $0x20] sm:$0xff] %v2560_v44 }
 0x673   :  { %v2562_v0 = vpop.f32.mrf.mxu1 }
 0x674   :  { %v2563_v18 = vadd.f32 %v2562_v0, %v2522_v37 }
 0x676   :  { %2576 = vst [vmem:[%s6990_s7 + $0x28] sm:$0xff] %v2563_v18 }
 0x67b   :  { %v2565_v8 = vpop.f32.mrf.mxu1 }
 0x67c   :  { %v2566_v2 = vadd.f32 %v2565_v8, %v2525_v63 }
 0x67e   :  { %2577 = vst [vmem:[%s6990_s7 + $0x30] sm:$0xff] %v2566_v2 }
 0x683   :  { %v2568_v54 = vpop.f32.mrf.mxu1 }
 0x684   :  { %v2569_v32 = vadd.f32 %v2568_v54, %v2528_v13 }
 0x686   :  { %2578 = vst [vmem:[%s6990_s7 + $0x38] sm:$0xff] %v2569_v32 }

</bundles_post_ra>
